<compile_context>
chip_gen: v5e
topology: v5e:2x2
jax: 0.10.0
libtpu: 0.0.40
codegen_flags: <defaults>
</compile_context>

<pallas_src>
import jax
import jax.numpy as jnp
from jax import lax
from jax.experimental import pallas as pl
from jax.experimental.pallas import tpu as pltpu


# Fuse the 9 taps into a single K=9*cin matmul (lane-dim concat).  Set to False to
# fall back to 9 accumulated dots if a toolchain cannot lower unaligned lane concat.
_FUSE_TAP_MATMUL = True

_COMPILER_PARAMS = pltpu.CompilerParams(
    dimension_semantics=("parallel",),
    vmem_limit_bytes=48 * 1024 * 1024,   # above v5e's 16 MiB default, below v7x physical
)


# ----------------------------------------------------------------------------
# Pallas kernels
# ----------------------------------------------------------------------------

def _make_conv3x3_kernel(H, W, Nb, *, input_affine=False, with_1x1=False,
                         compute_dtype=jnp.bfloat16):
    """3x3 conv (stride 1, pad 1) over Nb images + fused per-block channel stats.

    The kernel stages each flat (P, cin) image into a zero-padded VMEM scratch of
    length Lp = H*W + 2*W + 2 (guard row, top pad row, image rows, bottom pad row,
    guard row).  Every 3x3 tap is then a contiguous (P, cin) row slice starting at
    dy*W + dx; the W-boundary wrap of the flattened layout is fixed with in-kernel
    column masks.  The 9 masked taps are lane-concatenated and fed to the MXU as a
    single (P, 9*cin) x (9*cin, cout) matmul with f32 accumulation.
    """
    P = H * W
    Lp = P + 2 * W + 2

    def edge_masks():
        # column index of each flat pixel, computed as an exact float mod
        # (avoids vector integer div/rem; exact for integer positions < 2^24).
        pos = lax.broadcasted_iota(jnp.int32, (P, 1), 0).astype(jnp.float32)
        col = pos - jnp.floor(pos / W) * W
        not_left = col > 0.5                # col != 0
        not_right = col < (W - 1) - 0.5     # col != W-1
        return not_left, not_right

    def stage_image(xpad_ref, b, img):
        cin = xpad_ref.shape[-1]
        zpad = jnp.zeros((W + 1, cin), compute_dtype)
        xpad_ref[b, 0:W + 1, :] = zpad                     # guard + top pad row
        xpad_ref[b, W + 1 + P:Lp, :] = zpad                # bottom pad row + guard
        xpad_ref[b, W + 1:W + 1 + P, :] = img.astype(compute_dtype)

    def conv_from_padded(xpad_ref, b, wv, not_left, not_right):
        cin = xpad_ref.shape[-1]
        taps = []
        for dy in range(3):
            for dx in range(3):
                s = dy * W + dx
                t = xpad_ref[b, s:s + P, :]                # (P, cin)
                if dx == 0:
                    t = jnp.where(not_left, t, jnp.zeros_like(t))
                elif dx == 2:
                    t = jnp.where(not_right, t, jnp.zeros_like(t))
                taps.append(t)
        if _FUSE_TAP_MATMUL:
            slab = jnp.concatenate(taps, axis=-1)          # (P, 9*cin)
            return jnp.dot(slab, wv, preferred_element_type=jnp.float32)
        acc = jnp.zeros((P, wv.shape[-1]), jnp.float32)
        for k, t in enumerate(taps):
            acc = acc + jnp.dot(t, wv[k * cin:(k + 1) * cin, :],
                                preferred_element_type=jnp.float32)
        return acc

    def write_stats(st_ref, s_acc, q_acc):
        # packed stats block: row 0 = sum, row 1 = sum of squares
        st_ref[0] = jnp.concatenate([s_acc, q_acc], axis=0)

    if input_affine:
        # conv2: bn1 (scale/shift) + ReLU fused onto the staged input.
        def kernel(x_ref, sc_ref, sh_ref, w_ref, y_ref, st_ref, xpad_ref):
            wv = w_ref[...]
            sc = sc_ref[...]
            sh = sh_ref[...]
            not_left, not_right = edge_masks()
            cout = wv.shape[-1]
            s_acc = jnp.zeros((1, cout), jnp.float32)
            q_acc = jnp.zeros((1, cout), jnp.float32)
            for b in range(Nb):
                img = jnp.maximum(x_ref[b].astype(jnp.float32) * sc + sh, 0.0)
                stage_image(xpad_ref, b, img)
                acc = conv_from_padded(xpad_ref, b, wv, not_left, not_right)
                y_ref[b] = acc.astype(y_ref.dtype)
                s_acc = s_acc + jnp.sum(acc, axis=0, keepdims=True)
                q_acc = q_acc + jnp.sum(acc * acc, axis=0, keepdims=True)
            write_stats(st_ref, s_acc, q_acc)
        return kernel

    if with_1x1:
        # conv1 + fused 1x1 downsample conv (both read the same staged input once).
        def kernel(x_ref, w_ref, wd_ref, y_ref, yd_ref, st_ref, std_ref, xpad_ref):
            wv = w_ref[...]
            wdv = wd_ref[...]
            not_left, not_right = edge_masks()
            cout = wv.shape[-1]
            cd = wdv.shape[-1]
            s_acc = jnp.zeros((1, cout), jnp.float32)
            q_acc = jnp.zeros((1, cout), jnp.float32)
            sd_acc = jnp.zeros((1, cd), jnp.float32)
            qd_acc = jnp.zeros((1, cd), jnp.float32)
            for b in range(Nb):
                stage_image(xpad_ref, b, x_ref[b])
                acc = conv_from_padded(xpad_ref, b, wv, not_left, not_right)
                y_ref[b] = acc.astype(y_ref.dtype)
                s_acc = s_acc + jnp.sum(acc, axis=0, keepdims=True)
                q_acc = q_acc + jnp.sum(acc * acc, axis=0, keepdims=True)
                center = xpad_ref[b, W + 1:W + 1 + P, :]   # un-shifted image rows
                accd = jnp.dot(center, wdv, preferred_element_type=jnp.float32)
                yd_ref[b] = accd.astype(yd_ref.dtype)
                sd_acc = sd_acc + jnp.sum(accd, axis=0, keepdims=True)
                qd_acc = qd_acc + jnp.sum(accd * accd, axis=0, keepdims=True)
            write_stats(st_ref, s_acc, q_acc)
            write_stats(std_ref, sd_acc, qd_acc)
        return kernel

    def kernel(x_ref, w_ref, y_ref, st_ref, xpad_ref):
        wv = w_ref[...]
        not_left, not_right = edge_masks()
        cout = wv.shape[-1]
        s_acc = jnp.zeros((1, cout), jnp.float32)
        q_acc = jnp.zeros((1, cout), jnp.float32)
        for b in range(Nb):
            stage_image(xpad_ref, b, x_ref[b])
            acc = conv_from_padded(xpad_ref, b, wv, not_left, not_right)
            y_ref[b] = acc.astype(y_ref.dtype)
            s_acc = s_acc + jnp.sum(acc, axis=0, keepdims=True)
            q_acc = q_acc + jnp.sum(acc * acc, axis=0, keepdims=True)
        write_stats(st_ref, s_acc, q_acc)
    return kernel


def _make_bn_add_relu_kernel(residual_affine):
    """out = relu(y*scale + shift + residual_term); residual_term is either the raw
    identity residual or (yd*scale_d + shift_d) for the downsample branch."""
    if residual_affine:
        def kernel(y_ref, r_ref, sc_ref, sh_ref, scd_ref, shd_ref, o_ref):
            y = y_ref[...].astype(jnp.float32)
            r = r_ref[...].astype(jnp.float32)
            out = y * sc_ref[...] + sh_ref[...] + (r * scd_ref[...] + shd_ref[...])
            o_ref[...] = jnp.maximum(out, 0.0)
    else:
        def kernel(y_ref, r_ref, sc_ref, sh_ref, o_ref):
            out = (y_ref[...].astype(jnp.float32) * sc_ref[...] + sh_ref[...]
                   + r_ref[...].astype(jnp.float32))
            o_ref[...] = jnp.maximum(out, 0.0)
    return kernel


# ----------------------------------------------------------------------------
# Pallas wrappers
# ----------------------------------------------------------------------------

def conv3x3_bn_stats(x_flat, w, *, H, W, Nb, scale_in=None, shift_in=None, wd=None,
                     compute_dtype=jnp.bfloat16):
    """Fused 3x3 conv (+ optional input bn/ReLU, + optional 1x1 downsample conv)
    producing the conv output(s) and packed per-block channel sum / sum-of-squares."""
    N, P, cin = x_flat.shape
    assert P == H * W
    assert N % Nb == 0
    G = N // Nb
    Lp = P + 2 * W + 2
    cout = w.shape[-1]
    input_affine = scale_in is not None
    with_1x1 = wd is not None
    assert not (input_affine and with_1x1)
    act_dtype = compute_dtype            # bf16 intermediates on the bf16 path

    kernel = _make_conv3x3_kernel(H, W, Nb, input_affine=input_affine,
                                  with_1x1=with_1x1, compute_dtype=compute_dtype)

    x_spec = pl.BlockSpec((Nb, P, cin), lambda g: (g, 0, 0))
    w_spec = pl.BlockSpec((9 * cin, cout), lambda g: (0, 0))
    y_spec = pl.BlockSpec((Nb, P, cout), lambda g: (g, 0, 0))
    st_spec = pl.BlockSpec((1, 2, cout), lambda g: (g, 0, 0))

    in_specs = [x_spec]
    args = [x_flat]
    if input_affine:
        in_specs += [pl.BlockSpec((1, cin), lambda g: (0, 0)),
                     pl.BlockSpec((1, cin), lambda g: (0, 0))]
        args += [scale_in, shift_in]
    in_specs.append(w_spec)
    args.append(w)

    out_shape = [jax.ShapeDtypeStruct((N, P, cout), act_dtype),
                 jax.ShapeDtypeStruct((G, 2, cout), jnp.float32)]
    out_specs = [y_spec, st_spec]

    if with_1x1:
        cd = wd.shape[-1]
        in_specs.append(pl.BlockSpec((cin, cd), lambda g: (0, 0)))
        args.append(wd)
        out_shape = [jax.ShapeDtypeStruct((N, P, cout), act_dtype),
                     jax.ShapeDtypeStruct((N, P, cd), act_dtype),
                     jax.ShapeDtypeStruct((G, 2, cout), jnp.float32),
                     jax.ShapeDtypeStruct((G, 2, cd), jnp.float32)]
        out_specs = [y_spec,
                     pl.BlockSpec((Nb, P, cd), lambda g: (g, 0, 0)),
                     st_spec,
                     pl.BlockSpec((1, 2, cd), lambda g: (g, 0, 0))]

    return pl.pallas_call(
        kernel,
        out_shape=tuple(out_shape),
        grid=(G,),
        in_specs=in_specs,
        out_specs=tuple(out_specs),
        scratch_shapes=[pltpu.VMEM((Nb, Lp, cin), compute_dtype)],
        compiler_params=_COMPILER_PARAMS,
    )(*args)


def _largest_divisor_pref8(total, cap):
    cap = max(1, min(cap, total))
    choice = 1
    for d in range(1, cap + 1):
        if total % d:
            continue
        if d % 8 == 0 or choice % 8 != 0:
            choice = d
    return choice


def _pick_row_tile(total, target=1024):
    # large lane-dense row tiles; keep >=2 tiles when possible (v7x megacore).
    cap = min(target, total // 2 if total >= 16 else total)
    return _largest_divisor_pref8(total, cap)


def _pick_images_per_block(n, per_image_bytes, budget_bytes=4 << 20):
    nb = int(max(1, min(n, budget_bytes // max(int(per_image_bytes), 1))))
    while n % nb:
        nb -= 1
    if n >= 2 and n // nb < 2:          # keep >=2 grid steps so v7x's 2nd TC has work
        nb = max(1, nb // 2)
        while n % nb:
            nb -= 1
    return nb


def bn_add_relu(y, resid, scale, shift, scale_d=None, shift_d=None, *, row_tile=None):
    """Fused final pass on a flattened (N*P, C) view: bn2 (+ downsample bn) +
    residual add + ReLU."""
    T, C = y.shape
    rt = row_tile or _pick_row_tile(T)
    residual_affine = scale_d is not None
    kernel = _make_bn_add_relu_kernel(residual_affine)

    tile = pl.BlockSpec((rt, C), lambda i: (i, 0))
    vec = pl.BlockSpec((1, C), lambda i: (0, 0))
    in_specs = [tile, tile, vec, vec]
    args = [y, resid, scale, shift]
    if residual_affine:
        in_specs += [vec, vec]
        args += [scale_d, shift_d]

    return pl.pallas_call(
        kernel,
        out_shape=jax.ShapeDtypeStruct((T, C), jnp.float32),
        grid=(T // rt,),
        in_specs=in_specs,
        out_specs=tile,
        compiler_params=_COMPILER_PARAMS,
    )(*args)


# ----------------------------------------------------------------------------
# Tiny JAX glue ((G,2,C)-sized stats combine / scale-shift fold)
# ----------------------------------------------------------------------------

def _bn_scale_shift(stats, gamma, beta, count, eps):
    """Combine packed per-block stats and fold training-mode BN into a per-channel
    (scale, shift): bn(y) = y*scale + shift."""
    s = jnp.sum(stats[:, 0, :], axis=0)                     # (C,)
    q = jnp.sum(stats[:, 1, :], axis=0)                     # (C,)
    mean = s / count
    var = jnp.maximum(q / count - mean * mean, 0.0)         # biased var, clamped
    inv = gamma * lax.rsqrt(var + eps)
    scale = inv.reshape(1, -1)
    shift = (beta - mean * inv).reshape(1, -1)
    return scale, shift


# ----------------------------------------------------------------------------
# Bottleneck forward
# ----------------------------------------------------------------------------

def bottleneck_forward_nhwc(x_nhwc, params, ch_in, ch_out, ratio, stride=1, eps=1e-5,
                            compute_dtype=jnp.bfloat16, images_per_block=None):
    assert stride == 1  # TODO(synk): stride>1 not implemented
    N, H, W, C = x_nhwc.shape
    assert C == ch_in
    mid = ch_out // ratio
    P = H * W
    Lp = P + 2 * W + 2
    count = float(N * P)                 # BN reduces over (N, H, W)
    has_ds = (stride != 1) or (ch_in != ch_out)

    x_flat = x_nhwc.reshape(N, P, ch_in)                    # free row-major collapse
    if images_per_block is None:
        isz = jnp.dtype(compute_dtype).itemsize
        cmax = max(ch_in, mid, ch_out)
        per_img = (Lp + 13 * P) * cmax * isz                # rough per-image VMEM need
        images_per_block = _pick_images_per_block(N, per_img)
    Nb = images_per_block

    # Cast MXU inputs / weights once in the wrapper (f32 path: no-ops).
    x_c = x_flat.astype(compute_dtype)
    w1 = params["w1"].reshape(9 * ch_in, mid).astype(compute_dtype)

    # --- conv1 (3x3) [+ fused 1x1 downsample conv] + fused channel stats --------
    if has_ds:
        wd = params["wd"].astype(compute_dtype)
        y1, yd, st1, std = conv3x3_bn_stats(x_c, w1, H=H, W=W, Nb=Nb, wd=wd,
                                            compute_dtype=compute_dtype)
    else:
        y1, st1 = conv3x3_bn_stats(x_c, w1, H=H, W=W, Nb=Nb,
                                   compute_dtype=compute_dtype)
    sc1, sh1 = _bn_scale_shift(st1, params["g1"], params["b1"], count, eps)

    # --- conv2 (3x3) with bn1 + ReLU fused onto its staged input + fused stats --
    w2 = params["w2"].reshape(9 * mid, ch_out).astype(compute_dtype)
    y2, st2 = conv3x3_bn_stats(y1, w2, H=H, W=W, Nb=Nb,
                               scale_in=sc1, shift_in=sh1,
                               compute_dtype=compute_dtype)
    sc2, sh2 = _bn_scale_shift(st2, params["g2"], params["b2"], count, eps)

    # --- bn2 + (downsample bn) + residual add + ReLU, fully fused ----------------
    if has_ds:
        scd, shd = _bn_scale_shift(std, params["gd"], params["bd"], count, eps)
        out = bn_add_relu(y2.reshape(N * P, ch_out), yd.reshape(N * P, ch_out),
                          sc2, sh2, scd, shd)
    else:
        out = bn_add_relu(y2.reshape(N * P, ch_out),
                          x_flat.reshape(N * P, ch_out).astype(jnp.float32),
                          sc2, sh2)
    return out.reshape(N, H, W, ch_out)


def bottleneck_forward(x_nchw, params, ch_in, ch_out, ratio, stride=1, eps=1e-5,
                       compute_dtype=jnp.bfloat16, images_per_block=None):
    # NCHW interface-compat wrapper; NHWC callers should use bottleneck_forward_nhwc
    # directly to avoid these two transposes.
    x = jnp.transpose(x_nchw, (0, 2, 3, 1)).astype(jnp.float32)
    out = bottleneck_forward_nhwc(x, params, ch_in, ch_out, ratio, stride=stride,
                                  eps=eps, compute_dtype=compute_dtype,
                                  images_per_block=images_per_block)
    return jnp.transpose(out, (0, 3, 1, 2))


# ----------------------------------------------------------------------------
# Pure-JAX reference (same training-mode BN semantics) for a sanity check
# ----------------------------------------------------------------------------

def _ref_forward(x_nchw, params, ch_in, ch_out, ratio, eps=1e-5):
    x = jnp.transpose(x_nchw, (0, 2, 3, 1)).astype(jnp.float32)

    def conv3x3_ref(inp, w):
        return lax.conv_general_dilated(
            inp, w, (1, 1), "SAME",
            dimension_numbers=("NHWC", "HWIO", "NHWC"),
            precision=lax.Precision.HIGHEST)

    def bn_ref(y, g, b):
        mean = y.mean(axis=(0, 1, 2))
        var = y.var(axis=(0, 1, 2))          # biased, matches torch training BN
        return (y - mean) / jnp.sqrt(var + eps) * g + b

    out = jnp.maximum(bn_ref(conv3x3_ref(x, params["w1"]), params["g1"], params["b1"]), 0.0)
    out = bn_ref(conv3x3_ref(out, params["w2"]), params["g2"], params["b2"])
    if ch_in != ch_out:
        ds = jnp.einsum("nhwc,cd->nhwd", x, params["wd"])
        residual = bn_ref(ds, params["gd"], params["bd"])
    else:
        residual = x
    out = jnp.maximum(out + residual, 0.0)
    return jnp.transpose(out, (0, 3, 1, 2))


# ----------------------------------------------------------------------------
# Main
# ----------------------------------------------------------------------------

if __name__ == "__main__":
    N, ch_in, H, W = 2, 4, 16, 16
    ch_out, ratio = 8, 2
    mid = ch_out // ratio

    key = jax.random.PRNGKey(0)
    ks = jax.random.split(key, 10)
    params = {
        # conv weights stored HWIO (deterministic synthetic init, not a checkpoint)
        "w1": 0.1 * jax.random.normal(ks[0], (3, 3, ch_in, mid), jnp.float32),
        "g1": 1.0 + 0.1 * jax.random.normal(ks[1], (mid,), jnp.float32),
        "b1": 0.1 * jax.random.normal(ks[2], (mid,), jnp.float32),
        "w2": 0.1 * jax.random.normal(ks[3], (3, 3, mid, ch_out), jnp.float32),
        "g2": 1.0 + 0.1 * jax.random.normal(ks[4], (ch_out,), jnp.float32),
        "b2": 0.1 * jax.random.normal(ks[5], (ch_out,), jnp.float32),
        "wd": 0.1 * jax.random.normal(ks[6], (ch_in, ch_out), jnp.float32),
        "gd": 1.0 + 0.1 * jax.random.normal(ks[7], (ch_out,), jnp.float32),
        "bd": 0.1 * jax.random.normal(ks[8], (ch_out,), jnp.float32),
    }
    x = jax.random.normal(ks[9], (N, ch_in, H, W), jnp.float32)

    ref = _ref_forward(x, params, ch_in, ch_out, ratio)

    # Exact-path check (f32 MXU inputs / f32 intermediates).
    out_f32 = jax.block_until_ready(
        bottleneck_forward(x, params, ch_in, ch_out, ratio, stride=1,
                           compute_dtype=jnp.float32))
    assert out_f32.shape == (N, ch_out, H, W), out_f32.shape
    err_f32 = float(jnp.max(jnp.abs(out_f32 - ref)))
    assert err_f32 < 2e-3, f"f32 path max abs error {err_f32}"

    # Default fast path (bf16 MXU inputs + bf16 intermediates, f32 accumulation).
    # Looser tolerance: expected bf16 input/storage rounding, not a bug.
    out_bf16 = jax.block_until_ready(
        bottleneck_forward(x, params, ch_in, ch_out, ratio, stride=1))
    assert out_bf16.shape == (N, ch_out, H, W), out_bf16.shape
    err_bf16 = float(jnp.max(jnp.abs(out_bf16 - ref)))
    assert err_bf16 < 1e-1, f"bf16 path max abs error {err_bf16}"

    print("KERNEL_OK")
</pallas_src>

<mosaic_0001>
module attributes {stable_mosaic.version = 11 : i64} {
  func.func @kernel(%arg0: i32, %arg1: memref<1x256x4xf32, #tpu.memory_space<vmem>>, %arg2: memref<36x4xf32, #tpu.memory_space<vmem>>, %arg3: memref<4x8xf32, #tpu.memory_space<vmem>>, %arg4: memref<1x256x4xf32, #tpu.memory_space<vmem>>, %arg5: memref<1x256x8xf32, #tpu.memory_space<vmem>>, %arg6: memref<1x2x4xf32, #tpu.memory_space<vmem>>, %arg7: memref<1x2x8xf32, #tpu.memory_space<vmem>>, %arg8: memref<1x290x4xf32, #tpu.memory_space<vmem>>) attributes {dimension_semantics = [#tpu.dimension_semantics<parallel>], iteration_bounds = array<i64: 2>, scalar_prefetch = 0 : i64, scratch_operands = 1 : i64, tpu.core_type = #tpu.core_type<tc>, window_params = [{transform_indices = @transform_0, window_bounds = array<i64: 1, 256, 4>}, {pipeline_mode = #tpu.pipeline_mode<synchronous>, transform_indices = @transform_1, window_bounds = array<i64: 36, 4>}, {pipeline_mode = #tpu.pipeline_mode<synchronous>, transform_indices = @transform_2, window_bounds = array<i64: 4, 8>}, {transform_indices = @transform_3, window_bounds = array<i64: 1, 256, 4>}, {transform_indices = @transform_4, window_bounds = array<i64: 1, 256, 8>}, {transform_indices = @transform_5, window_bounds = array<i64: 1, 2, 4>}, {transform_indices = @transform_6, window_bounds = array<i64: 1, 2, 8>}]} {
    %c0 = arith.constant 0 : index
    %c0_0 = arith.constant 0 : index
    %0 = vector.load %arg2[%c0, %c0_0] : memref<36x4xf32, #tpu.memory_space<vmem>>, vector<36x4xf32>
    %c0_1 = arith.constant 0 : index
    %c0_2 = arith.constant 0 : index
    %1 = vector.load %arg3[%c0_1, %c0_2] : memref<4x8xf32, #tpu.memory_space<vmem>>, vector<4x8xf32>
    %2 = tpu.iota {dimensions = array<i32: 0>} : vector<256x1xi32>
    %3 = arith.sitofp %2 : vector<256x1xi32> to vector<256x1xf32>
    %cst = arith.constant 1.600000e+01 : f32
    %4 = vector.broadcast %cst : f32 to vector<256x1xf32>
    %5 = arith.divf %3, %4 : vector<256x1xf32>
    %6 = math.floor %5 : vector<256x1xf32>
    %cst_3 = arith.constant 1.600000e+01 : f32
    %7 = vector.broadcast %cst_3 : f32 to vector<256x1xf32>
    %8 = arith.mulf %6, %7 : vector<256x1xf32>
    %9 = arith.subf %3, %8 : vector<256x1xf32>
    %cst_4 = arith.constant 5.000000e-01 : f32
    %10 = vector.broadcast %cst_4 : f32 to vector<256x1xf32>
    %11 = arith.cmpf ogt, %9, %10 : vector<256x1xf32>
    %cst_5 = arith.constant 1.450000e+01 : f32
    %12 = vector.broadcast %cst_5 : f32 to vector<256x1xf32>
    %13 = arith.cmpf olt, %9, %12 : vector<256x1xf32>
    %cst_6 = arith.constant 0.000000e+00 : f32
    %14 = vector.broadcast %cst_6 : f32 to vector<1x4xf32>
    %cst_7 = arith.constant 0.000000e+00 : f32
    %15 = vector.broadcast %cst_7 : f32 to vector<1x4xf32>
    %cst_8 = arith.constant 0.000000e+00 : f32
    %16 = vector.broadcast %cst_8 : f32 to vector<1x8xf32>
    %cst_9 = arith.constant 0.000000e+00 : f32
    %17 = vector.broadcast %cst_9 : f32 to vector<1x8xf32>
    %c0_10 = arith.constant 0 : index
    %c0_11 = arith.constant 0 : index
    %c0_12 = arith.constant 0 : index
    %18 = vector.load %arg1[%c0_10, %c0_11, %c0_12] : memref<1x256x4xf32, #tpu.memory_space<vmem>>, vector<1x256x4xf32>
    %19 = vector.shape_cast %18 : vector<1x256x4xf32> to vector<256x4xf32>
    %cst_13 = arith.constant 0.000000e+00 : f32
    %20 = vector.broadcast %cst_13 : f32 to vector<17x4xf32>
    %c0_14 = arith.constant 0 : index
    %c0_15 = arith.constant 0 : index
    %c0_16 = arith.constant 0 : index
    %21 = vector.load %arg8[%c0_14, %c0_15, %c0_16] : memref<1x290x4xf32, #tpu.memory_space<vmem>>, vector<1x17x4xf32>
    %22 = vector.shape_cast %21 : vector<1x17x4xf32> to vector<17x4xf32>
    %23 = vector.shape_cast %20 : vector<17x4xf32> to vector<1x17x4xf32>
    tpu.vector_store %arg8[%c0_14, %c0_15, %c0_16], %23 {strides = array<i32>} : memref<1x290x4xf32, #tpu.memory_space<vmem>>, vector<1x17x4xf32>,
    %c0_17 = arith.constant 0 : index
    %c273 = arith.constant 273 : index
    %c0_18 = arith.constant 0 : index
    %24 = vector.load %arg8[%c0_17, %c273, %c0_18] : memref<1x290x4xf32, #tpu.memory_space<vmem>>, vector<1x17x4xf32>
    %25 = vector.shape_cast %24 : vector<1x17x4xf32> to vector<17x4xf32>
    %26 = vector.shape_cast %20 : vector<17x4xf32> to vector<1x17x4xf32>
    tpu.vector_store %arg8[%c0_17, %c273, %c0_18], %26 {strides = array<i32>} : memref<1x290x4xf32, #tpu.memory_space<vmem>>, vector<1x17x4xf32>,
    %c0_19 = arith.constant 0 : index
    %c17 = arith.constant 17 : index
    %c0_20 = arith.constant 0 : index
    %27 = vector.load %arg8[%c0_19, %c17, %c0_20] : memref<1x290x4xf32, #tpu.memory_space<vmem>>, vector<1x256x4xf32>
    %28 = vector.shape_cast %27 : vector<1x256x4xf32> to vector<256x4xf32>
    %29 = vector.shape_cast %19 : vector<256x4xf32> to vector<1x256x4xf32>
    tpu.vector_store %arg8[%c0_19, %c17, %c0_20], %29 {strides = array<i32>} : memref<1x290x4xf32, #tpu.memory_space<vmem>>, vector<1x256x4xf32>,
    %c0_21 = arith.constant 0 : index
    %c0_22 = arith.constant 0 : index
    %c0_23 = arith.constant 0 : index
    %30 = vector.load %arg8[%c0_21, %c0_22, %c0_23] : memref<1x290x4xf32, #tpu.memory_space<vmem>>, vector<1x256x4xf32>
    %31 = vector.shape_cast %30 : vector<1x256x4xf32> to vector<256x4xf32>
    %cst_24 = arith.constant 0.000000e+00 : f32
    %32 = vector.broadcast %cst_24 : f32 to vector<256x4xf32>
    %33 = vector.shape_cast %11 : vector<256x1xi1> to vector<256x1xi1>
    %34 = vector.broadcast %33 : vector<256x1xi1> to vector<256x4xi1>
    %35 = arith.select %34, %31, %32 : vector<256x4xi1>, vector<256x4xf32>
    %c0_25 = arith.constant 0 : index
    %c1 = arith.constant 1 : index
    %c0_26 = arith.constant 0 : index
    %36 = vector.load %arg8[%c0_25, %c1, %c0_26] : memref<1x290x4xf32, #tpu.memory_space<vmem>>, vector<1x256x4xf32>
    %37 = vector.shape_cast %36 : vector<1x256x4xf32> to vector<256x4xf32>
    %c0_27 = arith.constant 0 : index
    %c2 = arith.constant 2 : index
    %c0_28 = arith.constant 0 : index
    %38 = vector.load %arg8[%c0_27, %c2, %c0_28] : memref<1x290x4xf32, #tpu.memory_space<vmem>>, vector<1x256x4xf32>
    %39 = vector.shape_cast %38 : vector<1x256x4xf32> to vector<256x4xf32>
    %cst_29 = arith.constant 0.000000e+00 : f32
    %40 = vector.broadcast %cst_29 : f32 to vector<256x4xf32>
    %41 = vector.shape_cast %13 : vector<256x1xi1> to vector<256x1xi1>
    %42 = vector.broadcast %41 : vector<256x1xi1> to vector<256x4xi1>
    %43 = arith.select %42, %39, %40 : vector<256x4xi1>, vector<256x4xf32>
    %c0_30 = arith.constant 0 : index
    %c16 = arith.constant 16 : index
    %c0_31 = arith.constant 0 : index
    %44 = vector.load %arg8[%c0_30, %c16, %c0_31] : memref<1x290x4xf32, #tpu.memory_space<vmem>>, vector<1x256x4xf32>
    %45 = vector.shape_cast %44 : vector<1x256x4xf32> to vector<256x4xf32>
    %cst_32 = arith.constant 0.000000e+00 : f32
    %46 = vector.broadcast %cst_32 : f32 to vector<256x4xf32>
    %47 = vector.shape_cast %11 : vector<256x1xi1> to vector<256x1xi1>
    %48 = vector.broadcast %47 : vector<256x1xi1> to vector<256x4xi1>
    %49 = arith.select %48, %45, %46 : vector<256x4xi1>, vector<256x4xf32>
    %c0_33 = arith.constant 0 : index
    %c17_34 = arith.constant 17 : index
    %c0_35 = arith.constant 0 : index
    %50 = vector.load %arg8[%c0_33, %c17_34, %c0_35] : memref<1x290x4xf32, #tpu.memory_space<vmem>>, vector<1x256x4xf32>
    %51 = vector.shape_cast %50 : vector<1x256x4xf32> to vector<256x4xf32>
    %c0_36 = arith.constant 0 : index
    %c18 = arith.constant 18 : index
    %c0_37 = arith.constant 0 : index
    %52 = vector.load %arg8[%c0_36, %c18, %c0_37] : memref<1x290x4xf32, #tpu.memory_space<vmem>>, vector<1x256x4xf32>
    %53 = vector.shape_cast %52 : vector<1x256x4xf32> to vector<256x4xf32>
    %cst_38 = arith.constant 0.000000e+00 : f32
    %54 = vector.broadcast %cst_38 : f32 to vector<256x4xf32>
    %55 = vector.shape_cast %13 : vector<256x1xi1> to vector<256x1xi1>
    %56 = vector.broadcast %55 : vector<256x1xi1> to vector<256x4xi1>
    %57 = arith.select %56, %53, %54 : vector<256x4xi1>, vector<256x4xf32>
    %c0_39 = arith.constant 0 : index
    %c32 = arith.constant 32 : index
    %c0_40 = arith.constant 0 : index
    %58 = vector.load %arg8[%c0_39, %c32, %c0_40] : memref<1x290x4xf32, #tpu.memory_space<vmem>>, vector<1x256x4xf32>
    %59 = vector.shape_cast %58 : vector<1x256x4xf32> to vector<256x4xf32>
    %cst_41 = arith.constant 0.000000e+00 : f32
    %60 = vector.broadcast %cst_41 : f32 to vector<256x4xf32>
    %61 = vector.shape_cast %11 : vector<256x1xi1> to vector<256x1xi1>
    %62 = vector.broadcast %61 : vector<256x1xi1> to vector<256x4xi1>
    %63 = arith.select %62, %59, %60 : vector<256x4xi1>, vector<256x4xf32>
    %c0_42 = arith.constant 0 : index
    %c33 = arith.constant 33 : index
    %c0_43 = arith.constant 0 : index
    %64 = vector.load %arg8[%c0_42, %c33, %c0_43] : memref<1x290x4xf32, #tpu.memory_space<vmem>>, vector<1x256x4xf32>
    %65 = vector.shape_cast %64 : vector<1x256x4xf32> to vector<256x4xf32>
    %c0_44 = arith.constant 0 : index
    %c34 = arith.constant 34 : index
    %c0_45 = arith.constant 0 : index
    %66 = vector.load %arg8[%c0_44, %c34, %c0_45] : memref<1x290x4xf32, #tpu.memory_space<vmem>>, vector<1x256x4xf32>
    %67 = vector.shape_cast %66 : vector<1x256x4xf32> to vector<256x4xf32>
    %cst_46 = arith.constant 0.000000e+00 : f32
    %68 = vector.broadcast %cst_46 : f32 to vector<256x4xf32>
    %69 = vector.shape_cast %13 : vector<256x1xi1> to vector<256x1xi1>
    %70 = vector.broadcast %69 : vector<256x1xi1> to vector<256x4xi1>
    %71 = arith.select %70, %67, %68 : vector<256x4xi1>, vector<256x4xf32>
    %72 = tpu.concatenate %35, %37, %43, %49, %51, %57, %63, %65, %71 in 1 : vector<256x4xf32>, vector<256x4xf32>, vector<256x4xf32>, vector<256x4xf32>, vector<256x4xf32>, vector<256x4xf32>, vector<256x4xf32>, vector<256x4xf32>, vector<256x4xf32> -> vector<256x36xf32>
    %cst_47 = arith.constant dense<0.000000e+00> : vector<256x4xf32>
    %73 = tpu.matmul %72, %0, %cst_47 {dimension_numbers = #tpu.dot_dimension_numbers<[1], [0], [0], [1], [0, 0, 1, 1], [], []>} : vector<256x36xf32>, vector<36x4xf32>, vector<256x4xf32> -> vector<256x4xf32>
    %c0_48 = arith.constant 0 : index
    %c0_49 = arith.constant 0 : index
    %c0_50 = arith.constant 0 : index
    %74 = vector.load %arg4[%c0_48, %c0_49, %c0_50] : memref<1x256x4xf32, #tpu.memory_space<vmem>>, vector<1x256x4xf32>
    %75 = vector.shape_cast %74 : vector<1x256x4xf32> to vector<256x4xf32>
    %76 = vector.shape_cast %73 : vector<256x4xf32> to vector<1x256x4xf32>
    tpu.vector_store %arg4[%c0_48, %c0_49, %c0_50], %76 {strides = array<i32>} : memref<1x256x4xf32, #tpu.memory_space<vmem>>, vector<1x256x4xf32>,
    %cst_51 = arith.constant dense<0.000000e+00> : vector<4xf32>
    %77 = vector.multi_reduction <add>, %73, %cst_51 [0] : vector<256x4xf32> to vector<4xf32>
    %78 = vector.shape_cast %77 : vector<4xf32> to vector<1x4xf32>
    %79 = arith.addf %14, %78 : vector<1x4xf32>
    %80 = arith.mulf %73, %73 : vector<256x4xf32>
    %cst_52 = arith.constant dense<0.000000e+00> : vector<4xf32>
    %81 = vector.multi_reduction <add>, %80, %cst_52 [0] : vector<256x4xf32> to vector<4xf32>
    %82 = vector.shape_cast %81 : vector<4xf32> to vector<1x4xf32>
    %83 = arith.addf %15, %82 : vector<1x4xf32>
    %c0_53 = arith.constant 0 : index
    %c17_54 = arith.constant 17 : index
    %c0_55 = arith.constant 0 : index
    %84 = vector.load %arg8[%c0_53, %c17_54, %c0_55] : memref<1x290x4xf32, #tpu.memory_space<vmem>>, vector<1x256x4xf32>
    %85 = vector.shape_cast %84 : vector<1x256x4xf32> to vector<256x4xf32>
    %cst_56 = arith.constant dense<0.000000e+00> : vector<256x8xf32>
    %86 = tpu.matmul %85, %1, %cst_56 {dimension_numbers = #tpu.dot_dimension_numbers<[1], [0], [0], [1], [0, 0, 1, 1], [], []>} : vector<256x4xf32>, vector<4x8xf32>, vector<256x8xf32> -> vector<256x8xf32>
    %c0_57 = arith.constant 0 : index
    %c0_58 = arith.constant 0 : index
    %c0_59 = arith.constant 0 : index
    %87 = vector.load %arg5[%c0_57, %c0_58, %c0_59] : memref<1x256x8xf32, #tpu.memory_space<vmem>>, vector<1x256x8xf32>
    %88 = vector.shape_cast %87 : vector<1x256x8xf32> to vector<256x8xf32>
    %89 = vector.shape_cast %86 : vector<256x8xf32> to vector<1x256x8xf32>
    tpu.vector_store %arg5[%c0_57, %c0_58, %c0_59], %89 {strides = array<i32>} : memref<1x256x8xf32, #tpu.memory_space<vmem>>, vector<1x256x8xf32>,
    %cst_60 = arith.constant dense<0.000000e+00> : vector<8xf32>
    %90 = vector.multi_reduction <add>, %86, %cst_60 [0] : vector<256x8xf32> to vector<8xf32>
    %91 = vector.shape_cast %90 : vector<8xf32> to vector<1x8xf32>
    %92 = arith.addf %16, %91 : vector<1x8xf32>
    %93 = arith.mulf %86, %86 : vector<256x8xf32>
    %cst_61 = arith.constant dense<0.000000e+00> : vector<8xf32>
    %94 = vector.multi_reduction <add>, %93, %cst_61 [0] : vector<256x8xf32> to vector<8xf32>
    %95 = vector.shape_cast %94 : vector<8xf32> to vector<1x8xf32>
    %96 = arith.addf %17, %95 : vector<1x8xf32>
    %97 = tpu.concatenate %79, %83 in 0 : vector<1x4xf32>, vector<1x4xf32> -> vector<2x4xf32>
    %c0_62 = arith.constant 0 : index
    %c0_63 = arith.constant 0 : index
    %c0_64 = arith.constant 0 : index
    %98 = vector.load %arg6[%c0_62, %c0_63, %c0_64] : memref<1x2x4xf32, #tpu.memory_space<vmem>>, vector<1x2x4xf32>
    %99 = vector.shape_cast %98 : vector<1x2x4xf32> to vector<2x4xf32>
    %100 = vector.shape_cast %97 : vector<2x4xf32> to vector<1x2x4xf32>
    tpu.vector_store %arg6[%c0_62, %c0_63, %c0_64], %100 {strides = array<i32>} : memref<1x2x4xf32, #tpu.memory_space<vmem>>, vector<1x2x4xf32>,
    %101 = tpu.concatenate %92, %96 in 0 : vector<1x8xf32>, vector<1x8xf32> -> vector<2x8xf32>
    %c0_65 = arith.constant 0 : index
    %c0_66 = arith.constant 0 : index
    %c0_67 = arith.constant 0 : index
    %102 = vector.load %arg7[%c0_65, %c0_66, %c0_67] : memref<1x2x8xf32, #tpu.memory_space<vmem>>, vector<1x2x8xf32>
    %103 = vector.shape_cast %102 : vector<1x2x8xf32> to vector<2x8xf32>
    %104 = vector.shape_cast %101 : vector<2x8xf32> to vector<1x2x8xf32>
    tpu.vector_store %arg7[%c0_65, %c0_66, %c0_67], %104 {strides = array<i32>} : memref<1x2x8xf32, #tpu.memory_space<vmem>>, vector<1x2x8xf32>,
    return
  }
  func.func @transform_0(%arg0: i32) -> (i32, i32, i32) {
    %c0_i32 = arith.constant 0 : i32
    %c0_i32_0 = arith.constant 0 : i32
    %c0_i32_1 = arith.constant 0 : i32
    return %arg0, %c0_i32, %c0_i32_0 : i32, i32, i32
  }
  func.func @transform_1(%arg0: i32) -> (i32, i32) {
    %c0_i32 = arith.constant 0 : i32
    %c0_i32_0 = arith.constant 0 : i32
    %c0_i32_1 = arith.constant 0 : i32
    return %c0_i32, %c0_i32_0 : i32, i32
  }
  func.func @transform_2(%arg0: i32) -> (i32, i32) {
    %c0_i32 = arith.constant 0 : i32
    %c0_i32_0 = arith.constant 0 : i32
    %c0_i32_1 = arith.constant 0 : i32
    return %c0_i32, %c0_i32_0 : i32, i32
  }
  func.func @transform_3(%arg0: i32) -> (i32, i32, i32) {
    %c0_i32 = arith.constant 0 : i32
    %c0_i32_0 = arith.constant 0 : i32
    %c0_i32_1 = arith.constant 0 : i32
    return %arg0, %c0_i32, %c0_i32_0 : i32, i32, i32
  }
  func.func @transform_4(%arg0: i32) -> (i32, i32, i32) {
    %c0_i32 = arith.constant 0 : i32
    %c0_i32_0 = arith.constant 0 : i32
    %c0_i32_1 = arith.constant 0 : i32
    return %arg0, %c0_i32, %c0_i32_0 : i32, i32, i32
  }
  func.func @transform_5(%arg0: i32) -> (i32, i32, i32) {
    %c0_i32 = arith.constant 0 : i32
    %c0_i32_0 = arith.constant 0 : i32
    %c0_i32_1 = arith.constant 0 : i32
    return %arg0, %c0_i32, %c0_i32_0 : i32, i32, i32
  }
  func.func @transform_6(%arg0: i32) -> (i32, i32, i32) {
    %c0_i32 = arith.constant 0 : i32
    %c0_i32_0 = arith.constant 0 : i32
    %c0_i32_1 = arith.constant 0 : i32
    return %arg0, %c0_i32, %c0_i32_0 : i32, i32, i32
  }
}

</mosaic_0001>

<bundles_post_ra>
// kernel: tpu_custom_call.1
= control target key start
LH: loop header
LB: loop body
LE: loop exit
PB: predicated region body
PF: predicated region fallthrough
CT: control target
= control target key end

     0   :  { %12 = vsyncpa [#allocation4], 0  ;;  %s6523_s0 = inlined_call_operand.vmem [shape: f32[2,256,4], index: 0, kind: input, shape index: {}]   ;;  %s6524_s1 = inlined_call_operand.vmem [shape: f32[36,4], index: 1, kind: input, shape index: {}]   ;;  %s6525_s2 = inlined_call_operand.vmem [shape: f32[4,8], index: 2, kind: input, shape index: {}]   ;;  %s6526_s3 = inlined_call_operand.vmem [shape: f32[2,256,4], index: 3, kind: output, shape index: {0}]   ;;  %s6527_s4 = inlined_call_operand.vmem [shape: f32[2,256,8], index: 4, kind: output, shape index: {1}]   ;;  %s6528_s5 = inlined_call_operand.hbm [shape: f32[2,2,4], index: 5, kind: output, shape index: {2}]   ;;  %s6529_s6 = inlined_call_operand.hbm [shape: f32[2,2,8], index: 6, kind: output, shape index: {3}]  }
   0x1   :  { %14 = vsyncpa [#allocation4 + $0x1], 0 }
   0x2   :  { %15 = vsyncpa [#allocation6], 0 }
   0x3   :  { %17 = vsyncpa [#allocation6 + $0x1], 0  ;;  %s3730_s21 = smov 0   ;;  %s3732_s22 = smov 0  }
   0x4   :  { %s3734_s23 = smov 0   ;;  %s3736_s24 = smov 0  }
   0x5 LB: > { %s3751_s25 = sadd.s32 4294967295, %s3683_s24   ;;  %s3348_s26 = sadd.s32 4294967294, %s3683_s24   ;;  %s3683_s24 = sphi %s3736_s24, %s7227_s24   ;;  %s3679_s23 = sphi %s3734_s23, %s7226_s23   ;;  %s3675_s22 = sphi %s3732_s22, %s7225_s22   ;;  %s3671_s21 = sphi %s3730_s21, %s7224_s21  }
   0x6   : > { %s3755_s27 = sadd.s32 1, %s3683_s24   ;;  %s150_s28 = sadd.s32 1, %s3679_s23 }
   0x7   : > { %s147_s29 = ssub.s32 %s3683_s24, %s3755_s27  ;;  %p160_p0 = scmp.ne.s32.totalorder %s3679_s23, %s3675_s22 }
   0x8   : > { %p148_p1 = scmp.eq.s32.totalorder %s147_s29, 0  ;;  %p161_p2 = scmp.eq.s32.totalorder %s3751_s25, 1 }
   0x9   : > { %p166_p3 = scmp.ne.s32.totalorder %s3675_s22, %s3671_s21  ;;  %p167_p4 = scmp.eq.s32.totalorder %s3348_s26, 1 }
   0xa   : > { %s3766_s30 = scalar_select %p148_p1, %s3679_s23, %s150_s28  }
   0xb   : > { %p3768_p5 = por %p161_p2, %p160_p0  ;;  %p3772_p6 = por %p167_p4, %p166_p3 }
   0xc   : > { %p3351_p7 = scmp.ge.s32.totalorder %s3683_s24, 1  ;;  %p225_p8 = scmp.lt.s32.totalorder %s3683_s24, 3 }
   0xe   : > { %p226_p9 = pnand %p3351_p7, %p225_p8 }
  0x10   : > { %229 = sbr.rel (%p226_p9) target bundleno = 980 (0x3d4), region = 32 }
  0x15   : > { %vm6588_vm0 = vcmask 31744   ;;  %p270_p10 = scmp.lt.s32.totalorder %s3751_s25, 1  ;;  %v3685_v0 = vmov 0.0   ;;  %vm590_vm1 = vcmask 24576   ;;  %s3686_s14 = smov 4   ;;  %v3687_v40 = vmov 16.0  }
  0x16   : > { %588 = vst.msk [vmem:[#allocation2] sm:$0xff] %vm6588_vm0, %v3685_v0  ;;  %3495 = vrcp.f32 %v3687_v40  ;;  %v291_v54 = vlaneseq  ;;  %s3688_s15 = smov 8   ;;  %s3689_s16 = smov 12  }
  0x17   : > { %589 = vst.msk [vmem:[#allocation2 + $0x8] sm:$0xff] %vm6588_vm0, %v3685_v0  ;;  %s271_s9 = scalar_select %p270_p10, %s3751_s25, 1 }
  0x18   : > { %592 = vst.msk [vmem:[#allocation2 + $0x111] sm:$0xff] %vm6588_vm0, %v3685_v0  ;;  %v3872_v59 = vshrl.u32 %v291_v54, 7  ;;  %s3690_s17 = smov 16   ;;  %s3691_s18 = smov 20  }
  0x19   : > { %593 = vst.msk [vmem:[#allocation2 + $0x119] sm:$0xff] %vm6588_vm0, %v3685_v0  ;;  %s3784_s10 = sshll.u32 %s271_s9, 8  ;;  %s3692_s19 = smov 24  }
  0x1a   : > { %s3790_s13 = scalar_lea.vmem %s6523_s0, %s3784_s10  ;;  %591 = vst.msk [vmem:[#allocation2 + $0x10] sm:$0x1] %vm590_vm1, %v3685_v0  ;;  %v324_v61 = vcvt.s32.f32 %v3872_v59  ;;  %s3693_s20 = smov 28  }
  0x1b   : > { %v557_v1 = vld [vmem:[%s3790_s13 + $0x10] sm:$0xff]  ;;  %v555_v2 = vld [vmem:[%s3790_s13] sm:$0xff]  ;;  %594 = vst.msk [vmem:[#allocation2 + $0x121] sm:$0x1] %vm590_vm1, %v3685_v0  ;;  %v558_v3 = vld [vmem:[%s3790_s13 + $0x18] sm:$0xff]  ;;  %v293_v0 = vadd.s32 8, %v3872_v59  ;;  %s5654_s12 = scalar_lea.vmem %s6526_s3, %s3784_s10 }
  0x1c   : > { %597 = vst.msk [vmem:[#allocation2 + $0x21] sm:$0xff] %vm6588_vm0, %v557_v1  ;;  %v556_v4 = vld [vmem:[%s3790_s13 + $0x8] sm:$0xff]  ;;  %v559_v5 = vld [vmem:[%s3790_s13 + $0x20] sm:$0xff]  ;;  %v561_v7 = vld [vmem:[%s3790_s13 + $0x30] sm:$0xff]  ;;  %v3496_v46 = vpop.eup %3495  ;;  %s3694_s26 = smov 32  }
  0x1d   : > { %595 = vst.msk [vmem:[#allocation2 + $0x11] sm:$0xff] %vm6588_vm0, %v555_v2  ;;  %v560_v8 = vld [vmem:[%s3790_s13 + $0x28] sm:$0xff]  ;;  %v562_v9 = vld [vmem:[%s3790_s13 + $0x38] sm:$0xff]  ;;  %v563_v11 = vld [vmem:[%s3790_s13 + $0x40] sm:$0xff]  ;;  %v357_v49 = vmul.f32 16.0, %v3496_v46  ;;  %vm361_vm2 = vweird.f32 %v3496_v46 }
  0x1e   : > { %v755_v6 = vld [vmem:[#allocation2 + $0x1] sm:$0xff]  ;;  %598 = vst.msk [vmem:[#allocation2 + $0x29] sm:$0xff] %vm6588_vm0, %v558_v3  ;;  %v565_v13 = vld [vmem:[%s3790_s13 + $0x50] sm:$0xff]  ;;  %v566_v17 = vld [vmem:[%s3790_s13 + $0x58] sm:$0xff] }
  0x1f   : > { %1087 = vrot.lane.b32.xlu0 %v755_v6, %s3686_s14  ;;  %596 = vst.msk [vmem:[#allocation2 + $0x19] sm:$0xff] %vm6588_vm0, %v556_v4  ;;  %v564_v10 = vld [vmem:[%s3790_s13 + $0x48] sm:$0xff]  ;;  %v567_v16 = vld [vmem:[%s3790_s13 + $0x60] sm:$0xff]  ;;  %v570_v19 = vld [vmem:[%s3790_s13 + $0x78] sm:$0xff]  ;;  %v358_v53 = vsub.f32 1.0, %v357_v49  ;;  %v295_v4 = vadd.s32 24, %v3872_v59 }
  0x20   : > { %599 = vst.msk [vmem:[#allocation2 + $0x31] sm:$0xff] %vm6588_vm0, %v559_v5  ;;  %v568_v18 = vld [vmem:[%s3790_s13 + $0x68] sm:$0xff]  ;;  %v569_v20 = vld [vmem:[%s3790_s13 + $0x70] sm:$0xff]  ;;  %v571_v22 = vld [vmem:[%s3790_s13 + $0x80] sm:$0xff]  ;;  %v325_v5 = vcvt.s32.f32 %v293_v0  ;;  %v294_v6 = vadd.s32 16, %v3872_v59  ;;  %v3945_v0 = vadd.s32 96, %v3872_v59 }
  0x21   : > { %601 = vst.msk [vmem:[#allocation2 + $0x41] sm:$0xff] %vm6588_vm0, %v561_v7  ;;  %v756_v15 = vld [vmem:[#allocation2 + $0x9] sm:$0xff]  ;;  %v574_v27 = vld [vmem:[%s3790_s13 + $0x98] sm:$0xff]  ;;  %v575_v32 = vld [vmem:[%s3790_s13 + $0xa0] sm:$0xff]  ;;  %v359_v56 = vmul.f32 %v3496_v46, %v358_v53 }
  0x22   : > { %600 = vst.msk [vmem:[#allocation2 + $0x39] sm:$0xff] %vm6588_vm0, %v560_v8  ;;  %v573_v25 = vld [vmem:[%s3790_s13 + $0x90] sm:$0xff]  ;;  %v572_v26 = vld [vmem:[%s3790_s13 + $0x88] sm:$0xff]  ;;  %v579_v37 = vld [vmem:[%s3790_s13 + $0xc0] sm:$0xff]  ;;  %v327_v8 = vcvt.s32.f32 %v295_v4  ;;  %v3951_v4 = vadd.s32 88, %v3872_v59 }
  0x23   : > { %v759_v12 = vld [vmem:[#allocation2 + $0x21] sm:$0xff]  ;;  %602 = vst.msk [vmem:[#allocation2 + $0x49] sm:$0xff] %vm6588_vm0, %v562_v9  ;;  %v577_v33 = vld [vmem:[%s3790_s13 + $0xb0] sm:$0xff]  ;;  %v578_v38 = vld [vmem:[%s3790_s13 + $0xb8] sm:$0xff]  ;;  %v360_v60 = vadd.f32 %v3496_v46, %v359_v56 }
  0x24   : > { %1095 = vrot.lane.b32.xlu2 %v759_v12, %s3686_s14  ;;  %v757_v14 = vld [vmem:[#allocation2 + $0x11] sm:$0xff]  ;;  %604 = vst.msk [vmem:[#allocation2 + $0x59] sm:$0xff] %vm6588_vm0, %v564_v10  ;;  %v576_v31 = vld [vmem:[%s3790_s13 + $0xa8] sm:$0xff]  ;;  %v583_v47 = vld [vmem:[%s3790_s13 + $0xe0] sm:$0xff] }
  0x25   : > { %1091 = vrot.lane.b32.xlu1 %v757_v14, %s3686_s14  ;;  %603 = vst.msk [vmem:[#allocation2 + $0x51] sm:$0xff] %vm6588_vm0, %v563_v11  ;;  %v760_v21 = vld [vmem:[#allocation2 + $0x29] sm:$0xff]  ;;  %v582_v44 = vld [vmem:[%s3790_s13 + $0xd8] sm:$0xff]  ;;  %v3877_v63 = vsel %vm361_vm2, %v3496_v46, %v360_v60  ;;  %v296_v11 = vadd.s32 32, %v3872_v59  ;;  %v3927_v46 = vadd.s32 80, %v3872_v59 }
  0x26   : > { %605 = vst.msk [vmem:[#allocation2 + $0x61] sm:$0xff] %vm6588_vm0, %v565_v13  ;;  %v758_v23 = vld [vmem:[#allocation2 + $0x19] sm:$0xff]  ;;  %v580_v39 = vld [vmem:[%s3790_s13 + $0xc8] sm:$0xff]  ;;  %v581_v45 = vld [vmem:[%s3790_s13 + $0xd0] sm:$0xff]  ;;  %v363_v3 = vmul.f32 %v3877_v63, %v324_v61  ;;  %v364_v10 = vmul.f32 %v3877_v63, %v325_v5  ;;  %v326_v13 = vcvt.s32.f32 %v294_v6 }
  0x27   : > { %1089 = vrot.lane.b32.xlu0 %v756_v15, %s3686_s14  ;;  %607 = vst.msk [vmem:[#allocation2 + $0x71] sm:$0xff] %vm6588_vm0, %v567_v16  ;;  %v761_v24 = vld [vmem:[#allocation2 + $0x31] sm:$0xff]  ;;  %v584_v52 = vld [vmem:[%s3790_s13 + $0xe8] sm:$0xff]  ;;  %v366_v16 = vmul.f32 %v3877_v63, %v327_v8 }
  0x28   : > { %606 = vst.msk [vmem:[#allocation2 + $0x69] sm:$0xff] %vm6588_vm0, %v566_v17  ;;  %v763_v28 = vld [vmem:[#allocation2 + $0x41] sm:$0xff]  ;;  %v395_v7 = vfloor.f32 %v363_v3  ;;  %v3891_v17 = vadd.s32 48, %v3872_v59 }
  0x29   : > { %608 = vst.msk [vmem:[#allocation2 + $0x79] sm:$0xff] %vm6588_vm0, %v568_v18  ;;  %v762_v29 = vld [vmem:[#allocation2 + $0x39] sm:$0xff]  ;;  %v396_v18 = vfloor.f32 %v364_v10 }
  0x2a   : > { %610 = vst.msk [vmem:[#allocation2 + $0x89] sm:$0xff] %vm6588_vm0, %v570_v19  ;;  %v764_v30 = vld [vmem:[#allocation2 + $0x49] sm:$0xff]  ;;  %v427_v15 = vmul.f32 16.0, %v395_v7  ;;  %v328_v19 = vcvt.s32.f32 %v296_v11 }
  0x2b   : > { %609 = vst.msk [vmem:[#allocation2 + $0x81] sm:$0xff] %vm6588_vm0, %v569_v20  ;;  %v766_v34 = vld [vmem:[#allocation2 + $0x59] sm:$0xff]  ;;  %v365_v20 = vmul.f32 %v3877_v63, %v326_v13 }
  0x2c   : > { %1097 = vrot.lane.b32.xlu2 %v760_v21, %s3686_s14  ;;  %611 = vst.msk [vmem:[#allocation2 + $0x91] sm:$0xff] %vm6588_vm0, %v571_v22  ;;  %v765_v35 = vld [vmem:[#allocation2 + $0x51] sm:$0xff]  ;;  %v3897_v21 = vadd.s32 40, %v3872_v59  ;;  %v3899_v22 = vsub.f32 %v324_v61, %v427_v15 }
  0x2d   : > { %1093 = vrot.lane.b32.xlu1 %v758_v23, %s3686_s14  ;;  %613 = vst.msk [vmem:[#allocation2 + $0xa1] sm:$0xff] %vm6588_vm0, %v573_v25  ;;  %v767_v36 = vld [vmem:[#allocation2 + $0x61] sm:$0xff]  ;;  %v398_v23 = vfloor.f32 %v366_v16  ;;  %v335_v16 = vcvt.s32.f32 %v3951_v4 }
  0x2e   : > { %612 = vst.msk [vmem:[#allocation2 + $0x99] sm:$0xff] %vm6588_vm0, %v572_v26  ;;  %v769_v41 = vld [vmem:[#allocation2 + $0x71] sm:$0xff]  ;;  %v428_v26 = vmul.f32 16.0, %v396_v18  ;;  %vm523_vm3 = vcmp.lt.f32.partialorder %v3899_v22, 14.5 }
  0x2f   : > { %1099 = vrot.lane.b32.xlu0 %v761_v24, %s3686_s14  ;;  %614 = vst.msk [vmem:[#allocation2 + $0xa9] sm:$0xff] %vm6588_vm0, %v574_v27  ;;  %v768_v42 = vld [vmem:[#allocation2 + $0x69] sm:$0xff]  ;;  %v330_v24 = vcvt.s32.f32 %v3891_v17  ;;  %v367_v27 = vmul.f32 %v3877_v63, %v328_v19 }
  0x30   : > { %616 = vst.msk [vmem:[#allocation2 + $0xb9] sm:$0xff] %vm6588_vm0, %v576_v31  ;;  %v770_v43 = vld [vmem:[#allocation2 + $0x79] sm:$0xff]  ;;  %v329_v31 = vcvt.s32.f32 %v3897_v21 }
  0x31   : > { %615 = vst.msk [vmem:[#allocation2 + $0xb1] sm:$0xff] %vm6588_vm0, %v575_v32  ;;  %v772_v48 = vld [vmem:[#allocation2 + $0x89] sm:$0xff] }
  0x32   : > { %617 = vst.msk [vmem:[#allocation2 + $0xc1] sm:$0xff] %vm6588_vm0, %v577_v33  ;;  %v771_v50 = vld [vmem:[#allocation2 + $0x81] sm:$0xff]  ;;  %v430_v33 = vmul.f32 16.0, %v398_v23 }
  0x33   : > { %619 = vst.msk [vmem:[#allocation2 + $0xd1] sm:$0xff] %vm6588_vm0, %v579_v37  ;;  %v773_v51 = vld [vmem:[#allocation2 + $0x91] sm:$0xff]  ;;  %v399_v37 = vfloor.f32 %v367_v27 }
  0x34   : > { %1103 = vrot.lane.b32.xlu2 %v763_v28, %s3686_s14  ;;  %618 = vst.msk [vmem:[#allocation2 + $0xc9] sm:$0xff] %vm6588_vm0, %v578_v38  ;;  %v775_v55 = vld [vmem:[#allocation2 + $0xa1] sm:$0xff]  ;;  %v3904_v28 = vadd.s32 56, %v3872_v59  ;;  %v3986_v27 = vld [vmem:[#allocation2 + $0x2a] sm:$0xff] }
  0x35   : > { %1101 = vrot.lane.b32.xlu1 %v762_v29, %s3686_s14  ;;  %620 = vst.msk [vmem:[#allocation2 + $0xd9] sm:$0xff] %vm6588_vm0, %v580_v39  ;;  %v774_v57 = vld [vmem:[#allocation2 + $0x99] sm:$0xff]  ;;  %v3915_v39 = vadd.s32 72, %v3872_v59 }
  0x36   : > { %622 = vst.msk [vmem:[#allocation2 + $0xe9] sm:$0xff] %vm6588_vm0, %v582_v44  ;;  %v776_v58 = vld [vmem:[#allocation2 + $0xa9] sm:$0xff]  ;;  %v331_v38 = vcvt.s32.f32 %v3904_v28  ;;  %v3924_v44 = vsub.f32 %v327_v8, %v430_v33  ;;  %v3959_v8 = vadd.s32 104, %v3872_v59 }
  0x37   : > { %1105 = vrot.lane.b32.xlu0 %v764_v30, %s3686_s14  ;;  %621 = vst.msk [vmem:[#allocation2 + $0xe1] sm:$0xff] %vm6588_vm0, %v581_v45  ;;  %v778_v62 = vld [vmem:[#allocation2 + $0xb9] sm:$0xff]  ;;  %v397_v30 = vfloor.f32 %v365_v20 }
  0x38   : > { %623 = vst.msk [vmem:[#allocation2 + $0xf1] sm:$0xff] %vm6588_vm0, %v583_v47  ;;  %v777_v1 = vld [vmem:[#allocation2 + $0xb1] sm:$0xff]  ;;  %v370_v49 = vmul.f32 %v3877_v63, %v331_v38  ;;  %vm526_vm5 = vcmp.lt.f32.partialorder %v3924_v44, 14.5 }
  0x39   : > { %624 = vst.msk [vmem:[#allocation2 + $0xf9] sm:$0xff] %vm6588_vm0, %v584_v52  ;;  %v779_v2 = vld [vmem:[#allocation2 + $0xc1] sm:$0xff]  ;;  %v429_v40 = vmul.f32 16.0, %v397_v30  ;;  %v788_v47 = vld [vmem:[#allocation2 + $0xa] sm:$0xff]  ;;  %v3974_v20 = vld [vmem:[#allocation2 + $0x32] sm:$0xff]  ;;  %v3990_v30 = vadd.s32 112, %v3872_v59 }
  0x3a   : > { %v781_v9 = vld [vmem:[#allocation2 + $0xd1] sm:$0xff]  ;;  %v402_v61 = vfloor.f32 %v370_v49 }
  0x3b   : > { %v780_v12 = vld [vmem:[#allocation2 + $0xc9] sm:$0xff]  ;;  %v3932_v52 = vsub.f32 %v326_v13, %v429_v40 }
  0x3c   : > { %1109 = vrot.lane.b32.xlu2 %v766_v34, %s3686_s14  ;;  %v782_v14 = vld [vmem:[#allocation2 + $0xd9] sm:$0xff]  ;;  %v369_v34 = vmul.f32 %v3877_v63, %v330_v24  ;;  %v434_v10 = vmul.f32 16.0, %v402_v61  ;;  %v4020_v49 = vld [vmem:[#allocation2 + $0x4a] sm:$0xff] }
  0x3d   : > { %1107 = vrot.lane.b32.xlu1 %v765_v35, %s3686_s14  ;;  %v784_v25 = vld [vmem:[#allocation2 + $0xe9] sm:$0xff]  ;;  %vm525_vm6 = vcmp.lt.f32.partialorder %v3932_v52, 14.5 }
  0x3e   : > { %v783_v29 = vld [vmem:[#allocation2 + $0xe1] sm:$0xff]  ;;  %v401_v45 = vfloor.f32 %v369_v34  ;;  %v3976_v21 = vsub.f32 %v331_v38, %v434_v10  ;;  %v3997_v34 = vadd.s32 128, %v3872_v59 }
  0x3f   : > { %1111 = vrot.lane.b32.xlu0 %v767_v36, %s3686_s14  ;;  %v785_v32 = vld [vmem:[#allocation2 + $0xf1] sm:$0xff]  ;;  %v787_v35 = vld [vmem:[#allocation2 + $0x2] sm:$0xff]  ;;  %v3911_v36 = vsub.f32 %v325_v5, %v428_v26 }
  0x40   : > { %v433_v56 = vmul.f32 16.0, %v401_v45  ;;  %vm530_vm10 = vcmp.lt.f32.partialorder %v3976_v21, 14.5 }
  0x41   : > { %vm524_vm4 = vcmp.lt.f32.partialorder %v3911_v36, 14.5 }
  0x42   : > { %v3955_v6 = vsub.f32 %v330_v24, %v433_v56 }
  0x44   : > { %1115 = vrot.lane.b32.xlu2 %v769_v41, %s3686_s14  ;;  %v368_v41 = vmul.f32 %v3877_v63, %v329_v31  ;;  %vm529_vm8 = vcmp.lt.f32.partialorder %v3955_v6, 14.5 }
  0x45   : > { %1113 = vrot.lane.b32.xlu1 %v768_v42, %s3686_s14  ;;  %v3920_v42 = vadd.s32 64, %v3872_v59 }
  0x46   : > { %v400_v53 = vfloor.f32 %v368_v41 }
  0x47   : > { %1117 = vrot.lane.b32.xlu0 %v770_v43, %s3686_s14  ;;  %v883_v43 = vsel %vm523_vm3, %v787_v35, 0.0  ;;  %v332_v54 = vcvt.s32.f32 %v3920_v42  ;;  %v4000_v35 = vld [vmem:[#allocation2 + $0x3a] sm:$0xff] }
  0x48   : > { %v890_v45 = vsel %vm530_vm10, %v4000_v35, 0.0 }
  0x49   : > { %v371_v3 = vmul.f32 %v3877_v63, %v332_v54 }
  0x4b   : > { %v403_v15 = vfloor.f32 %v371_v3 }
  0x4c   : > { %1121 = vrot.lane.b32.xlu2 %v772_v48, %s3686_s14  ;;  %v431_v48 = vmul.f32 16.0, %v399_v37 }
  0x4d   : > { %1119 = vrot.lane.b32.xlu1 %v771_v50, %s3686_s14  ;;  %v333_v50 = vcvt.s32.f32 %v3915_v39  ;;  %v435_v28 = vmul.f32 16.0, %v403_v15 }
  0x4e   : > { %v3941_v60 = vsub.f32 %v328_v19, %v431_v48  ;;  %v337_v19 = vcvt.s32.f32 %v3959_v8  ;;  %v340_v48 = vcvt.s32.f32 %v3997_v34  ;;  %v4091_v34 = vld [vmem:[#allocation2 + $0x6a] sm:$0xff] }
  0x4f   : > { %1123 = vrot.lane.b32.xlu0 %v773_v51, %s3686_s14  ;;  %v786_v51 = vld [vmem:[#allocation2 + $0xf9] sm:$0xff]  ;;  %v4008_v41 = vsub.f32 %v332_v54, %v435_v28 }
  0x50   : > { %vm527_vm7 = vcmp.lt.f32.partialorder %v3941_v60, 14.5  ;;  %v376_v33 = vmul.f32 %v3877_v63, %v337_v19 }
  0x51   : > { %vm531_vm12 = vcmp.lt.f32.partialorder %v4008_v41, 14.5 }
  0x54   : > { %1127 = vrot.lane.b32.xlu2 %v775_v55, %s3686_s14  ;;  %v884_v55 = vsel %vm524_vm4, %v788_v47, 0.0  ;;  %v408_v47 = vfloor.f32 %v376_v33 }
  0x55   : > { %1125 = vrot.lane.b32.xlu1 %v774_v57, %s3686_s14  ;;  %v334_v57 = vcvt.s32.f32 %v3927_v46 }
  0x57   : > { %1129 = vrot.lane.b32.xlu0 %v776_v58, %s3686_s14  ;;  %v790_v58 = vld [vmem:[#allocation2 + $0x1a] sm:$0xff]  ;;  %v373_v7 = vmul.f32 %v3877_v63, %v334_v57 }
  0x58   : > { %v886_v5 = vsel %vm526_vm5, %v790_v58, 0.0  ;;  %v4034_v58 = vadd.s32 136, %v3872_v59 }
  0x59   : > { %v405_v18 = vfloor.f32 %v373_v7 }
  0x5a   : > { %v341_v10 = vcvt.s32.f32 %v4034_v58  ;;  %v4171_v58 = vld [vmem:[#allocation2 + $0x92] sm:$0xff] }
  0x5b   : > { %6662 = vst [vmem:[#allocation17_spill] sm:$0xff] %v4171_v58 }
  0x5c   : > { %1133 = vrot.lane.b32.xlu2 %v778_v62, %s3686_s14  ;;  %v372_v62 = vmul.f32 %v3877_v63, %v333_v50  ;;  %v380_v28 = vmul.f32 %v3877_v63, %v341_v10 }
  0x5d   : > { %1131 = vrot.lane.b32.xlu1 %v777_v1, %s3686_s14  ;;  %v789_v1 = vld [vmem:[#allocation2 + $0x12] sm:$0xff] }
  0x5e   : > { %v404_v11 = vfloor.f32 %v372_v62  ;;  %v885_v13 = vsel %vm525_vm6, %v789_v1, 0.0  ;;  %v440_v62 = vmul.f32 16.0, %v408_v47  ;;  %v4041_v1 = vadd.s32 152, %v3872_v59 }
  0x5f   : > { %1135 = vrot.lane.b32.xlu0 %v779_v2, %s3686_s14  ;;  %v432_v2 = vmul.f32 16.0, %v400_v53  ;;  %v4024_v53 = vadd.s32 144, %v3872_v59 }
  0x60   : > { %v436_v23 = vmul.f32 16.0, %v404_v11  ;;  %v343_v15 = vcvt.s32.f32 %v4041_v1  ;;  %v4181_v1 = vadd.s32 216, %v3872_v59 }
  0x62   : > { %v4002_v37 = vsub.f32 %v333_v50, %v436_v23  ;;  %v4068_v23 = vadd.s32 168, %v3872_v59 }
  0x64   : > { %1139 = vrot.lane.b32.xlu2 %v781_v9, %s3686_s14  ;;  %v791_v9 = vld [vmem:[#allocation2 + $0x22] sm:$0xff]  ;;  %vm532_vm11 = vcmp.lt.f32.partialorder %v4002_v37, 14.5 }
  0x65   : > { %1137 = vrot.lane.b32.xlu1 %v780_v12, %s3686_s14  ;;  %v336_v12 = vcvt.s32.f32 %v3945_v0  ;;  %v887_v17 = vsel %vm527_vm7, %v791_v9, 0.0  ;;  %v892_v61 = vsel %vm532_vm11, %v4020_v49, 0.0  ;;  %v379_v0 = vmul.f32 %v3877_v63, %v340_v48 }
  0x67   : > { %1141 = vrot.lane.b32.xlu0 %v782_v14, %s3686_s14  ;;  %v3965_v14 = vsub.f32 %v329_v31, %v432_v2  ;;  %v375_v24 = vmul.f32 %v3877_v63, %v336_v12  ;;  %v889_v31 = vsel %vm529_vm8, %v3974_v20, 0.0  ;;  %v4044_v2 = vld [vmem:[#allocation2 + $0x52] sm:$0xff] }
  0x69   : > { %vm528_vm9 = vcmp.lt.f32.partialorder %v3965_v14, 14.5  ;;  %v407_v38 = vfloor.f32 %v375_v24 }
  0x6a   : > { %v888_v40 = vsel %vm528_vm9, %v3986_v27, 0.0 }
  0x6b   : > { %v439_v50 = vmul.f32 16.0, %v407_v38 }
  0x6c   : > { %1145 = vrot.lane.b32.xlu2 %v784_v25, %s3686_s14  ;;  %v3980_v25 = vadd.s32 120, %v3872_v59 }
  0x6d   : > { %1143 = vrot.lane.b32.xlu1 %v783_v29, %s3686_s14  ;;  %v374_v29 = vmul.f32 %v3877_v63, %v335_v16  ;;  %v4046_v3 = vsub.f32 %v336_v12, %v439_v50  ;;  %v4059_v12 = vsub.f32 %v337_v19, %v440_v62  ;;  %v4074_v19 = vld [vmem:[#allocation2 + $0x5a] sm:$0xff] }
  0x6e   : > { %v339_v39 = vcvt.s32.f32 %v3980_v25 }
  0x6f   : > { %1147 = vrot.lane.b32.xlu0 %v785_v32, %s3686_s14  ;;  %v437_v32 = vmul.f32 16.0, %v405_v18  ;;  %v406_v42 = vfloor.f32 %v374_v29  ;;  %vm6558_vm14 = vcmp.lt.f32.partialorder %v4046_v3, 14.5  ;;  %v4080_v29 = vadd.s32 160, %v3872_v59 }
  0x70   : > { %vm6530_vm1 = vcmp.lt.f32.partialorder %v4059_v12, 14.5 }
  0x71   : > { %v4015_v46 = vsub.f32 %v334_v57, %v437_v32  ;;  %v438_v56 = vmul.f32 16.0, %v406_v42  ;;  %v382_v32 = vmul.f32 %v3877_v63, %v343_v15  ;;  %v6535_v42 = vcvt.s32.f32 %v4068_v23 }
  0x73   : > { %vm533_vm13 = vcmp.lt.f32.partialorder %v4015_v46, 14.5  ;;  %v4052_v8 = vsub.f32 %v335_v16, %v438_v56  ;;  %v4064_v16 = vld [vmem:[#allocation2 + $0x62] sm:$0xff]  ;;  %v384_v62 = vmul.f32 %v3877_v63, %v6535_v42 }
  0x74   : > { %1215 = vrot.lane.b32.xlu2 %v883_v43, %s3688_s15  ;;  %v338_v43 = vcvt.s32.f32 %v3990_v30  ;;  %v893_v11 = vsel %vm533_vm13, %v4044_v2, 0.0  ;;  %v895_v30 = vsel %vm6558_vm14, %v4064_v16, 0.0  ;;  %vm491_vm14 = vcmp.gt.f32.partialorder %v3899_v22, 0.5 }
  0x75   : > { %1149 = vrot.lane.b32.xlu1 %v786_v51, %s3686_s14  ;;  %v378_v51 = vmul.f32 %v3877_v63, %v339_v39  ;;  %vm6531_vm15 = vcmp.lt.f32.partialorder %v4052_v8, 14.5 }
  0x76   : > { %v377_v57 = vmul.f32 %v3877_v63, %v338_v43  ;;  %v894_v47 = vsel %vm6531_vm15, %v4074_v19, 0.0 }
  0x77   : > { %1217 = vrot.lane.b32.xlu0 %v884_v55, %s3688_s15  ;;  %v4030_v55 = vld [vmem:[#allocation2 + $0x42] sm:$0xff]  ;;  %v410_v4 = vfloor.f32 %v378_v51  ;;  %v412_v51 = vfloor.f32 %v380_v28 }
  0x78   : > { %v891_v7 = vsel %vm531_vm12, %v4030_v55, 0.0  ;;  %v409_v9 = vfloor.f32 %v377_v57  ;;  %v414_v57 = vfloor.f32 %v382_v32  ;;  %v416_v32 = vfloor.f32 %v384_v62 }
  0x7a   : > { %v441_v25 = vmul.f32 16.0, %v409_v9  ;;  %v4128_v9 = vld [vmem:[#allocation2 + $0x72] sm:$0xff] }
  0x7c   : > { %1221 = vrot.lane.b32.xlu2 %v886_v5, %s3688_s15  ;;  %v342_v5 = vcvt.s32.f32 %v4024_v53  ;;  %v4102_v50 = vsub.f32 %v338_v43, %v441_v25  ;;  %v6534_v53 = vcvt.s32.f32 %v4080_v29  ;;  %v446_v25 = vmul.f32 16.0, %v414_v57 }
  0x7d   : > { %1219 = vrot.lane.b32.xlu1 %v885_v13, %s3688_s15  ;;  %v411_v13 = vfloor.f32 %v379_v0 }
  0x7e   : > { %v3982_v26 = vpop.permute.xlu2 %1095  ;;  %v381_v18 = vmul.f32 %v3877_v63, %v342_v5 }
  0x7f   : > { %6654 = vst [vmem:[#allocation9_spill] sm:$0xff] %v3982_v26  ;;  %1223 = vrot.lane.b32.xlu0 %v887_v17, %s3688_s15  ;;  %v442_v17 = vmul.f32 16.0, %v410_v4 }
  0x81   : > { %v4093_v38 = vsub.f32 %v339_v39, %v442_v17  ;;  %v896_v39 = vsel %vm6530_vm1, %v4091_v34, 0.0  ;;  %vm6538_vm1 = vcmp.lt.f32.partialorder %v4102_v50, 14.5  ;;  %v4134_v17 = vadd.s32 184, %v3872_v59 }
  0x83   : > { %6658 = vst [vmem:[#allocation13_spill] sm:$0xff] %v4093_v38  ;;  %vm6533_vm2 = vcmp.lt.f32.partialorder %v4093_v38, 14.5 }
  0x84   : > { %1227 = vrot.lane.b32.xlu2 %v889_v31, %s3688_s15  ;;  %v443_v31 = vmul.f32 16.0, %v411_v13  ;;  %v383_v13 = vmul.f32 %v3877_v63, %v6534_v53  ;;  %v585_v53 = vld [vmem:[%s3790_s13 + $0xf0] sm:$0xff] }
  0x85   : > { %1225 = vrot.lane.b32.xlu1 %v888_v40, %s3688_s15  ;;  %v413_v40 = vfloor.f32 %v381_v18  ;;  %625 = vst.msk [vmem:[#allocation2 + $0x101] sm:$0xff] %vm6588_vm0, %v585_v53 }
  0x86   : > { %v4026_v54 = vpop.permute.xlu2 %1097  ;;  %v4109_v56 = vsub.f32 %v340_v48, %v443_v31 }
  0x87   : > { %6655 = vst [vmem:[#allocation10_spill] sm:$0xff] %v4026_v54  ;;  %1229 = vrot.lane.b32.xlu0 %v890_v45, %s3688_s15  ;;  %v4097_v45 = vadd.s32 176, %v3872_v59  ;;  %v445_v43 = vmul.f32 16.0, %v413_v40  ;;  %v4210_v54 = vadd.s32 224, %v3872_v59 }
  0x88   : > { %vm6536_vm15 = vcmp.lt.f32.partialorder %v4109_v56, 14.5 }
  0x89   : > { %v6532_v0 = vcvt.s32.f32 %v4097_v45  ;;  %v4144_v31 = vsub.f32 %v342_v5, %v445_v43  ;;  %v415_v5 = vfloor.f32 %v383_v13  ;;  %v6539_v43 = vcvt.s32.f32 %v4134_v17 }
  0x8a   : > { %v6667_v13 = vcvt.s32.f32 %v4068_v23 }
  0x8b   : > { %v385_v40 = vmul.f32 %v3877_v63, %v6532_v0  ;;  %v4167_v0 = vsub.f32 %v343_v15, %v446_v25  ;;  %v804_v25 = vld [vmem:[#allocation2 + $0x8a] sm:$0xff] }
  0x8c   : > { %1233 = vrot.lane.b32.xlu2 %v892_v61, %s3688_s15  ;;  %v4113_v61 = vld [vmem:[#allocation2 + $0x7a] sm:$0xff] }
  0x8d   : > { %1231 = vrot.lane.b32.xlu1 %v891_v7, %s3688_s15  ;;  %v4122_v7 = vadd.s32 192, %v3872_v59  ;;  %v898_v18 = vsel %vm6533_vm2, %v4113_v61, 0.0  ;;  %vm6540_vm2 = vcmp.lt.f32.partialorder %v4144_v31, 14.5 }
  0x8e   : > { %v4070_v24 = vpop.permute.xlu2 %1103 }
  0x8f   : > { %6656 = vst [vmem:[#allocation11_spill] sm:$0xff] %v4070_v24  ;;  %1235 = vrot.lane.b32.xlu0 %v893_v11, %s3688_s15  ;;  %v444_v11 = vmul.f32 16.0, %v412_v51  ;;  %v897_v51 = vsel %vm6538_vm1, %v4128_v9, 0.0  ;;  %vm6541_vm1 = vcmp.lt.f32.partialorder %v4167_v0, 14.5 }
  0x91   : > { %v4089_v33 = vpop.permute.xlu0 %1087  ;;  %v4158_v57 = vsub.f32 %v341_v10, %v444_v11  ;;  %v448_v10 = vmul.f32 16.0, %v416_v32  ;;  %v417_v11 = vfloor.f32 %v385_v40  ;;  %v447_v32 = vmul.f32 16.0, %v415_v5 }
  0x92   : > { %6657 = vst [vmem:[#allocation12_spill] sm:$0xff] %v4089_v33  ;;  %v386_v40 = vmul.f32 %v3877_v63, %v6539_v43 }
  0x93   : > { %v4204_v5 = vsub.f32 %v6667_v13, %v448_v10  ;;  %v352_v13 = vcvt.s32.f32 %v4210_v54  ;;  %v4247_v54 = vadd.s32 232, %v3872_v59 }
  0x94   : > { %1239 = vrot.lane.b32.xlu2 %v895_v30, %s3688_s15  ;;  %v4142_v30 = vld [vmem:[#allocation2 + $0x82] sm:$0xff]  ;;  %v418_v23 = vfloor.f32 %v386_v40 }
  0x95   : > { %1237 = vrot.lane.b32.xlu1 %v894_v47, %s3688_s15  ;;  %v4150_v47 = vadd.s32 200, %v3872_v59  ;;  %v899_v62 = vsel %vm6536_vm15, %v4142_v30, 0.0  ;;  %vm6542_vm15 = vcmp.lt.f32.partialorder %v4158_v57, 14.5  ;;  %6668 = vst [vmem:[#allocation22_spill] sm:$0xff] %v4204_v5 }
  0x96   : > { %v4119_v4 = vpop.permute.xlu2 %1109  ;;  %v900_v26 = vsel %vm6542_vm15, %v804_v25, 0.0 }
  0x97   : > { %6659 = vst [vmem:[#allocation14_spill] sm:$0xff] %v4119_v4  ;;  %1241 = vrot.lane.b32.xlu0 %v896_v39, %s3688_s15  ;;  %v4125_v48 = vpop.permute.xlu1 %1091  ;;  %v6537_v39 = vcvt.s32.f32 %v4122_v7  ;;  %v449_v4 = vmul.f32 16.0, %v417_v11  ;;  %v6669_v43 = vcvt.s32.f32 %v4150_v47  ;;  %v6673_v11 = vcvt.s32.f32 %v4097_v45  ;;  %v4243_v45 = vld [vmem:[#allocation2 + $0xa2] sm:$0xff] }
  0x98   : > { %6660 = vst [vmem:[#allocation15_spill] sm:$0xff] %v4125_v48 }
  0x99   : > { %v4140_v28 = vpop.permute.xlu0 %1089  ;;  %v387_v42 = vmul.f32 %v3877_v63, %v6537_v39  ;;  %v901_v39 = vsel %vm6540_vm2, %v4171_v58, 0.0  ;;  %v388_v24 = vmul.f32 %v3877_v63, %v6669_v43  ;;  %vm6547_vm2 = vcmp.lt.f32.partialorder %v4204_v5, 14.5 }
  0x9a   : > { %6661 = vst [vmem:[#allocation16_spill] sm:$0xff] %v4140_v28  ;;  %v6670_v28 = vcvt.s32.f32 %v4080_v29  ;;  %v4230_v29 = vsub.f32 %v6673_v11, %v449_v4  ;;  %v450_v4 = vmul.f32 16.0, %v418_v23  ;;  %v391_v11 = vmul.f32 %v3877_v63, %v352_v13 }
  0x9b   : > { %v419_v48 = vfloor.f32 %v387_v42  ;;  %v4226_v42 = vld [vmem:[#allocation2 + $0xaa] sm:$0xff]  ;;  %v323_v23 = vadd.s32 248, %v3872_v59  ;;  %v353_v58 = vcvt.s32.f32 %v4247_v54 }
  0x9c   : > { %1245 = vrot.lane.b32.xlu2 %v898_v18, %s3688_s15  ;;  %v4217_v33 = vsub.f32 %v6670_v28, %v447_v32  ;;  %6672 = vst [vmem:[#allocation24_spill] sm:$0xff] %v4226_v42  ;;  %v420_v28 = vfloor.f32 %v388_v24  ;;  %v4237_v32 = vadd.s32 240, %v3872_v59  ;;  %vm6548_vm15 = vcmp.lt.f32.partialorder %v4230_v29, 14.5  ;;  %v6877_v22 = vld [vmem:[#allocation22_spill] sm:$0xff] }
  0x9d   : > { %1243 = vrot.lane.b32.xlu1 %v897_v51, %s3688_s15  ;;  %v4192_v51 = vadd.s32 208, %v3872_v59  ;;  %6674 = vst [vmem:[#allocation25_spill] sm:$0xff] %v4230_v29  ;;  %v392_v54 = vmul.f32 %v3877_v63, %v353_v58 }
  0x9e   : > { %v4175_v18 = vpop.permute.xlu2 %1115  ;;  %6671 = vst [vmem:[#allocation23_spill] sm:$0xff] %v4217_v33 }
  0x9f   : > { %6663 = vst [vmem:[#allocation18_spill] sm:$0xff] %v4175_v18  ;;  %1247 = vrot.lane.b32.xlu0 %v899_v62, %s3688_s15  ;;  %v4185_v15 = vpop.permute.xlu1 %1093  ;;  %v4200_v62 = vld [vmem:[#allocation2 + $0x9a] sm:$0xff]  ;;  %v350_v10 = vcvt.s32.f32 %v4192_v51  ;;  %v4255_v51 = vld [vmem:[#allocation2 + $0xb2] sm:$0xff] }
  0xa0   : > { %6664 = vst [vmem:[#allocation19_spill] sm:$0xff] %v4185_v15  ;;  %v902_v43 = vsel %vm6541_vm1, %v4200_v62, 0.0  ;;  %vm6549_vm1 = vcmp.lt.f32.partialorder %v4217_v33, 14.5  ;;  %v6680_v15 = vcvt.s32.f32 %v4134_v17  ;;  %v905_v59 = vsel %vm6548_vm15, %v4255_v51, 0.0 }
  0xa1   : > { %v4198_v53 = vpop.permute.xlu0 %1099  ;;  %6666 = vst [vmem:[#allocation21_spill] sm:$0xff] %v4200_v62  ;;  %v389_v24 = vmul.f32 %v3877_v63, %v350_v10 }
  0xa2   : > { %6665 = vst [vmem:[#allocation20_spill] sm:$0xff] %v4198_v53  ;;  %v351_v53 = vcvt.s32.f32 %v4181_v1  ;;  %v4269_v62 = vsub.f32 %v6680_v15, %v450_v4  ;;  %v4284_v15 = vld [vmem:[#allocation2 + $0xc2] sm:$0xff] }
  0xa3   : > { %6685 = vst [vmem:[#allocation33_spill] sm:$0xff] %v4284_v15 }
  0xa4   : > { %1251 = vrot.lane.b32.xlu2 %v901_v39, %s3688_s15  ;;  %v451_v39 = vmul.f32 16.0, %v419_v48  ;;  %v390_v25 = vmul.f32 %v3877_v63, %v351_v53  ;;  %v904_v48 = vsel %vm6547_vm2, %v4226_v42, 0.0  ;;  %6681 = vst [vmem:[#allocation30_spill] sm:$0xff] %v4269_v62  ;;  %vm6552_vm15 = vcmp.lt.f32.partialorder %v4269_v62, 14.5 }
  0xa5   : > { %1249 = vrot.lane.b32.xlu1 %v900_v26, %s3688_s15 }
  0xa6   : > { %v4233_v1 = vpop.permute.xlu2 %1121  ;;  %v422_v42 = vfloor.f32 %v390_v25  ;;  %v355_v25 = vcvt.s32.f32 %v323_v23 }
  0xa7   : > { %6675 = vst [vmem:[#allocation26_spill] sm:$0xff] %v4233_v1  ;;  %1253 = vrot.lane.b32.xlu0 %v902_v43, %s3688_s15  ;;  %v4240_v26 = vpop.permute.xlu1 %1101  ;;  %v452_v43 = vmul.f32 16.0, %v420_v28  ;;  %v6678_v1 = vcvt.s32.f32 %v4122_v7  ;;  %v421_v28 = vfloor.f32 %v389_v24  ;;  %v6682_v7 = vcvt.s32.f32 %v4150_v47  ;;  %v4291_v47 = vld [vmem:[#allocation2 + $0xba] sm:$0xff] }
  0xa8   : > { %6676 = vst [vmem:[#allocation27_spill] sm:$0xff] %v4240_v26  ;;  %v903_v26 = vsel %vm6549_vm1, %v4243_v45, 0.0  ;;  %v394_v23 = vmul.f32 %v3877_v63, %v355_v25 }
  0xa9   : > { %v4252_v40 = vpop.permute.xlu0 %1105  ;;  %v4264_v18 = vsub.f32 %v6678_v1, %v451_v39  ;;  %v4279_v1 = vsub.f32 %v6682_v7, %v452_v43  ;;  %v423_v39 = vfloor.f32 %v391_v11  ;;  %6687 = vst [vmem:[#allocation35_spill] sm:$0xff] %v4291_v47 }
  0xaa   : > { %6677 = vst [vmem:[#allocation28_spill] sm:$0xff] %v4252_v40  ;;  %v354_v40 = vcvt.s32.f32 %v4237_v32  ;;  %v454_v32 = vmul.f32 16.0, %v422_v42  ;;  %v812_v42 = vld [vmem:[#allocation2 + $0xca] sm:$0xff] }
  0xab   : > { %6679 = vst [vmem:[#allocation29_spill] sm:$0xff] %v4264_v18  ;;  %vm6551_vm2 = vcmp.lt.f32.partialorder %v4264_v18, 14.5  ;;  %vm6553_vm1 = vcmp.lt.f32.partialorder %v4279_v1, 14.5  ;;  %v455_v11 = vmul.f32 16.0, %v423_v39 }
  0xac   : > { %1257 = vrot.lane.b32.xlu2 %v904_v48, %s3688_s15  ;;  %6683 = vst [vmem:[#allocation31_spill] sm:$0xff] %v4279_v1  ;;  %v393_v4 = vmul.f32 %v3877_v63, %v354_v40  ;;  %v907_v43 = vsel %vm6551_vm2, %v4284_v15, 0.0  ;;  %v4304_v7 = vsub.f32 %v351_v53, %v454_v32  ;;  %v426_v63 = vfloor.f32 %v394_v23  ;;  %v814_v53 = vld [vmem:[#allocation2 + $0xda] sm:$0xff] }
  0xad   : > { %1255 = vrot.lane.b32.xlu1 %v903_v26, %s3688_s15  ;;  %v453_v26 = vmul.f32 16.0, %v421_v28  ;;  %v4312_v39 = vsub.f32 %v352_v13, %v455_v11 }
  0xae   : > { %v4281_v17 = vpop.permute.xlu2 %1127  ;;  %6689 = vst [vmem:[#allocation37_spill] sm:$0xff] %v4304_v7  ;;  %v425_v28 = vfloor.f32 %v393_v4  ;;  %vm6554_vm2 = vcmp.lt.f32.partialorder %v4304_v7, 14.5  ;;  %v813_v4 = vld [vmem:[#allocation2 + $0xd2] sm:$0xff] }
  0xaf   : > { %6684 = vst [vmem:[#allocation32_spill] sm:$0xff] %v4281_v17  ;;  %1259 = vrot.lane.b32.xlu0 %v905_v59, %s3688_s15  ;;  %v4288_v24 = vpop.permute.xlu1 %1107  ;;  %v906_v59 = vsel %vm6552_vm15, %v4291_v47, 0.0  ;;  %v908_v17 = vsel %vm6553_vm1, %v812_v42, 0.0  ;;  %v910_v13 = vsel %vm6554_vm2, %v814_v53, 0.0  ;;  %vm6556_vm1 = vcmp.lt.f32.partialorder %v4312_v39, 14.5  ;;  %v4546_v47 = vld [vmem:[#allocation2 + $0xb8] sm:$0xff] }
  0xb0   : > { %6686 = vst [vmem:[#allocation34_spill] sm:$0xff] %v4288_v24  ;;  %v4306_v24 = vsub.f32 %v350_v10, %v453_v26  ;;  %v457_v32 = vmul.f32 16.0, %v425_v28  ;;  %v458_v42 = vmul.f32 16.0, %v426_v63  ;;  %v817_v63 = vld [vmem:[#allocation2 + $0xf2] sm:$0xff] }
  0xb1   : > { %v4294_v48 = vpop.permute.xlu0 %1111  ;;  %6691 = vst [vmem:[#allocation39_spill] sm:$0xff] %v4312_v39 }
  0xb2   : > { %6688 = vst [vmem:[#allocation36_spill] sm:$0xff] %v4294_v48  ;;  %v424_v48 = vfloor.f32 %v392_v54  ;;  %vm6555_vm15 = vcmp.lt.f32.partialorder %v4306_v24, 14.5  ;;  %v4328_v23 = vsub.f32 %v354_v40, %v457_v32 }
  0xb3   : > { %6690 = vst [vmem:[#allocation38_spill] sm:$0xff] %v4306_v24  ;;  %v909_v11 = vsel %vm6555_vm15, %v813_v4, 0.0 }
  0xb4   : > { %1263 = vrot.lane.b32.xlu2 %v907_v43, %s3688_s15  ;;  %v456_v26 = vmul.f32 16.0, %v424_v48  ;;  %v815_v43 = vld [vmem:[#allocation2 + $0xe2] sm:$0xff]  ;;  %6695 = vst [vmem:[#allocation43_spill] sm:$0xff] %v4328_v23  ;;  %vm6557_vm2 = vcmp.lt.f32.partialorder %v4328_v23, 14.5 }
  0xb5   : > { %1261 = vrot.lane.b32.xlu1 %v906_v59, %s3688_s15  ;;  %v911_v48 = vsel %vm6556_vm1, %v815_v43, 0.0  ;;  %v4336_v59 = vsub.f32 %v355_v25, %v458_v42  ;;  %v913_v32 = vsel %vm6557_vm2, %v817_v63, 0.0  ;;  %v818_v25 = vld [vmem:[#allocation2 + $0xfa] sm:$0xff]  ;;  %vm6561_vm2 = vcmp.gt.f32.partialorder %v3911_v36, 0.5  ;;  %6731 = vst [vmem:[#allocation79_spill] sm:$0xff] %v4546_v47 }
  0xb6   : > { %v4314_v15 = vpop.permute.xlu2 %1133  ;;  %v4362_v42 = vld [vmem:[#allocation2 + $0x18] sm:$0xff] }
  0xb7   : > { %6692 = vst [vmem:[#allocation40_spill] sm:$0xff] %v4314_v15  ;;  %1265 = vrot.lane.b32.xlu0 %v908_v17, %s3688_s15  ;;  %v4318_v10 = vpop.permute.xlu1 %1113  ;;  %v4330_v17 = vsub.f32 %v353_v58, %v456_v26  ;;  %v816_v58 = vld [vmem:[#allocation2 + $0xea] sm:$0xff]  ;;  %vm6559_vm1 = vcmp.lt.f32.partialorder %v4336_v59, 14.5  ;;  %v918_v63 = vsel %vm6561_vm2, %v4362_v42, 0.0  ;;  %vm6564_vm2 = vcmp.gt.f32.partialorder %v3924_v44, 0.5 }
  0xb8   : > { %6693 = vst [vmem:[#allocation41_spill] sm:$0xff] %v4318_v10  ;;  %v914_v26 = vsel %vm6559_vm1, %v818_v25, 0.0  ;;  %vm6562_vm1 = vcmp.gt.f32.partialorder %v3932_v52, 0.5  ;;  %v642_v10 = vld [vmem:[#allocation2 + $0x78] sm:$0xff] }
  0xb9   : > { %v4321_v54 = vpop.permute.xlu0 %1117  ;;  %6696 = vst [vmem:[#allocation44_spill] sm:$0xff] %v4330_v17  ;;  %vm6560_vm15 = vcmp.lt.f32.partialorder %v4330_v17, 14.5 }
  0xba   : > { %6694 = vst [vmem:[#allocation42_spill] sm:$0xff] %v4321_v54  ;;  %v912_v4 = vsel %vm6560_vm15, %v816_v58, 0.0  ;;  %vm6563_vm15 = vcmp.gt.f32.partialorder %v3941_v60, 0.5  ;;  %v4391_v54 = vld [vmem:[#allocation2 + $0x28] sm:$0xff] }
  0xbb   : > { %6697 = vst [vmem:[#allocation45_spill] sm:$0xff] %v4336_v59 }
  0xbc   : > { %1269 = vrot.lane.b32.xlu2 %v910_v13, %s3688_s15 }
  0xbd   : > { %1267 = vrot.lane.b32.xlu1 %v909_v11, %s3688_s15  ;;  %v4365_v11 = vld [vmem:[#allocation2 + $0x10] sm:$0xff] }
  0xbe   : > { %v4338_v28 = vpop.permute.xlu2 %1139  ;;  %6703 = vst [vmem:[#allocation51_spill] sm:$0xff] %v4365_v11  ;;  %v917_v58 = vsel %vm491_vm14, %v4365_v11, 0.0  ;;  %v4443_v11 = vld [vmem:[#allocation2 + $0x60] sm:$0xff] }
  0xbf   : > { %6698 = vst [vmem:[#allocation46_spill] sm:$0xff] %v4338_v28  ;;  %1271 = vrot.lane.b32.xlu0 %v911_v48, %s3688_s15  ;;  %v4342_v40 = vpop.permute.xlu1 %1119  ;;  %v4403_v28 = vld [vmem:[#allocation2 + $0x38] sm:$0xff] }
  0xc0   : > { %6699 = vst [vmem:[#allocation47_spill] sm:$0xff] %v4342_v40 }
  0xc1   : > { %v4345_v53 = vpop.permute.xlu0 %1123  ;;  %6712 = vst [vmem:[#allocation60_spill] sm:$0xff] %v4443_v11 }
  0xc2   : > { %6700 = vst [vmem:[#allocation48_spill] sm:$0xff] %v4345_v53 }
  0xc4   : > { %1275 = vrot.lane.b32.xlu2 %v913_v32, %s3688_s15  ;;  %v4375_v32 = vld [vmem:[#allocation2 + $0x20] sm:$0xff] }
  0xc5   : > { %1273 = vrot.lane.b32.xlu1 %v912_v4, %s3688_s15  ;;  %v919_v25 = vsel %vm6562_vm1, %v4375_v32, 0.0  ;;  %vm6565_vm1 = vcmp.gt.f32.partialorder %v3965_v14, 0.5 }
  0xc6   : > { %v4356_v13 = vpop.permute.xlu2 %1145  ;;  %v922_v15 = vsel %vm6565_vm1, %v4403_v28, 0.0  ;;  %vm6569_vm1 = vcmp.gt.f32.partialorder %v4008_v41, 0.5 }
  0xc7   : > { %6701 = vst [vmem:[#allocation49_spill] sm:$0xff] %v4356_v13  ;;  %1277 = vrot.lane.b32.xlu0 %v914_v26, %s3688_s15  ;;  %v4359_v43 = vpop.permute.xlu1 %1125  ;;  %v4389_v13 = vld [vmem:[#allocation2 + $0x30] sm:$0xff]  ;;  %s5664_s15 = scalar_lea.vmem %s6527_s4, %s3784_s10  ;;  %s6348_s10 = sand.u32 1, %s3675_s22  }
  0xc8   : > { %6702 = vst [vmem:[#allocation50_spill] sm:$0xff] %v4359_v43  ;;  %v4418_v43 = vld [vmem:[#allocation2 + $0x40] sm:$0xff]  ;;  %s3171_s9 = scalar_lea.sflag [#allocation6], %s6348_s10 }
  0xc9   : > { %v4367_v48 = vpop.permute.xlu0 %1129 }
  0xca   : > { %6704 = vst [vmem:[#allocation52_spill] sm:$0xff] %v4367_v48  ;;  %v4416_v48 = vld [vmem:[#allocation2 + $0x48] sm:$0xff] }
  0xcc   : > { %1345 = vrot.lane.b32.xlu2 %v918_v63, %s3689_s16 }
  0xcd   : > { %1343 = vrot.lane.b32.xlu1 %v917_v58, %s3689_s16  ;;  %v921_v58 = vsel %vm6563_vm15, %v4389_v13, 0.0  ;;  %vm6566_vm15 = vcmp.gt.f32.partialorder %v3976_v21, 0.5 }
  0xce   : > { %v4383_v4 = vpop.permute.xlu2 %1215 }
  0xcf   : > { %6705 = vst [vmem:[#allocation53_spill] sm:$0xff] %v4383_v4  ;;  %1347 = vrot.lane.b32.xlu0 %v919_v25, %s3689_s16  ;;  %v4386_v26 = vpop.permute.xlu1 %1131  ;;  %v920_v25 = vsel %vm6564_vm2, %v4391_v54, 0.0  ;;  %vm6568_vm2 = vcmp.gt.f32.partialorder %v3955_v6, 0.5  ;;  %v4445_v4 = vld [vmem:[#allocation2 + $0x58] sm:$0xff] }
  0xd0   : > { %6706 = vst [vmem:[#allocation54_spill] sm:$0xff] %v4386_v26 }
  0xd1   : > { %v4394_v63 = vpop.permute.xlu0 %1135  ;;  %6713 = vst [vmem:[#allocation61_spill] sm:$0xff] %v4445_v4 }
  0xd2   : > { %6707 = vst [vmem:[#allocation55_spill] sm:$0xff] %v4394_v63 }
  0xd4   : > { %1351 = vrot.lane.b32.xlu2 %v921_v58, %s3689_s16 }
  0xd5   : > { %1349 = vrot.lane.b32.xlu1 %v920_v25, %s3689_s16  ;;  %v924_v25 = vsel %vm6566_vm15, %v4416_v48, 0.0  ;;  %vm6571_vm15 = vcmp.gt.f32.partialorder %v4015_v46, 0.5 }
  0xd6   : > { %v4410_v63 = vpop.permute.xlu2 %1221 }
  0xd7   : > { %1353 = vrot.lane.b32.xlu0 %v922_v15, %s3689_s16  ;;  %v4413_v26 = vpop.permute.xlu1 %1137  ;;  %v923_v15 = vsel %vm6568_vm2, %v4418_v43, 0.0  ;;  %vm6573_vm2 = vcmp.gt.f32.partialorder %v4002_v37, 0.5 }
  0xd8   : > { %6708 = vst [vmem:[#allocation56_spill] sm:$0xff] %v4413_v26  ;;  %v4430_v26 = vld [vmem:[#allocation2 + $0x50] sm:$0xff] }
  0xd9   : > { %v4421_v58 = vpop.permute.xlu0 %1141  ;;  %v925_v53 = vsel %vm6569_vm1, %v4430_v26, 0.0  ;;  %vm6576_vm1 = vcmp.gt.f32.partialorder %v4052_v8, 0.5 }
  0xda   : > { %6709 = vst [vmem:[#allocation57_spill] sm:$0xff] %v4421_v58 }
  0xdc   : > { %1357 = vrot.lane.b32.xlu2 %v924_v25, %s3689_s16 }
  0xdd   : > { %1355 = vrot.lane.b32.xlu1 %v923_v15, %s3689_s16  ;;  %v927_v15 = vsel %vm6571_vm15, %v4443_v11, 0.0  ;;  %vm6580_vm15 = vcmp.gt.f32.partialorder %v4059_v12, 0.5 }
  0xde   : > { %v4437_v58 = vpop.permute.xlu2 %1227 }
  0xdf   : > { %6710 = vst [vmem:[#allocation58_spill] sm:$0xff] %v4437_v58  ;;  %1359 = vrot.lane.b32.xlu0 %v925_v53, %s3689_s16  ;;  %v4440_v40 = vpop.permute.xlu1 %1143  ;;  %v926_v53 = vsel %vm6573_vm2, %v4445_v4, 0.0  ;;  %v4470_v4 = vld [vmem:[#allocation2 + $0x70] sm:$0xff]  ;;  %vm6577_vm2 = vcmp.gt.f32.partialorder %v4046_v3, 0.5 }
  0xe0   : > { %6711 = vst [vmem:[#allocation59_spill] sm:$0xff] %v4440_v40  ;;  %v4457_v40 = vld [vmem:[#allocation2 + $0x68] sm:$0xff] }
  0xe1   : > { %v4448_v25 = vpop.permute.xlu0 %1147  ;;  %6715 = vst [vmem:[#allocation63_spill] sm:$0xff] %v4457_v40  ;;  %v928_v58 = vsel %vm6576_vm1, %v4457_v40, 0.0  ;;  %v930_v40 = vsel %vm6580_vm15, %v642_v10, 0.0  ;;  %vm6582_vm1 = vcmp.gt.f32.partialorder %v4102_v50, 0.5  ;;  %vm6583_vm15 = vcmp.gt.f32.partialorder %v4093_v38, 0.5  ;;  %v4517_v38 = vld [vmem:[#allocation2 + $0xa8] sm:$0xff] }
  0xe2   : > { %6714 = vst [vmem:[#allocation62_spill] sm:$0xff] %v4448_v25 }
  0xe3   : > { %6718 = vst [vmem:[#allocation66_spill] sm:$0xff] %v4470_v4 }
  0xe4   : > { %1363 = vrot.lane.b32.xlu2 %v927_v15, %s3689_s16 }
  0xe5   : > { %1361 = vrot.lane.b32.xlu1 %v926_v53, %s3689_s16  ;;  %v929_v53 = vsel %vm6577_vm2, %v4470_v4, 0.0  ;;  %vm6587_vm2 = vcmp.gt.f32.partialorder %v4109_v56, 0.5  ;;  %v4494_v4 = vld [vmem:[#allocation2 + $0x88] sm:$0xff] }
  0xe6   : > { %v4464_v25 = vpop.permute.xlu2 %1233  ;;  %6723 = vst [vmem:[#allocation71_spill] sm:$0xff] %v4494_v4 }
  0xe7   : > { %6716 = vst [vmem:[#allocation64_spill] sm:$0xff] %v4464_v25  ;;  %1365 = vrot.lane.b32.xlu0 %v928_v58, %s3689_s16  ;;  %v4467_v11 = vpop.permute.xlu1 %1149  ;;  %v4481_v58 = vld [vmem:[#allocation2 + $0x80] sm:$0xff] }
  0xe8   : > { %6717 = vst [vmem:[#allocation65_spill] sm:$0xff] %v4467_v11  ;;  %v931_v11 = vsel %vm6582_vm1, %v4481_v58, 0.0  ;;  %vm508_vm1 = vcmp.gt.f32.partialorder %v4158_v57, 0.5 }
  0xe9   : > { %v4473_v15 = vpop.permute.xlu0 %1217  ;;  %6720 = vst [vmem:[#allocation68_spill] sm:$0xff] %v4481_v58 }
  0xea   : > { %6719 = vst [vmem:[#allocation67_spill] sm:$0xff] %v4473_v15  ;;  %v645_v15 = vld [vmem:[#allocation2 + $0x90] sm:$0xff] }
  0xeb   : > { %v933_v58 = vsel %vm6587_vm2, %v645_v15, 0.0  ;;  %vm6592_vm2 = vcmp.gt.f32.partialorder %v4144_v31, 0.5 }
  0xec   : > { %1369 = vrot.lane.b32.xlu2 %v930_v40, %s3689_s16 }
  0xed   : > { %1367 = vrot.lane.b32.xlu1 %v929_v53, %s3689_s16  ;;  %v932_v53 = vsel %vm6583_vm15, %v4494_v4, 0.0  ;;  %vm6589_vm15 = vcmp.gt.f32.partialorder %v4167_v0, 0.5  ;;  %v4519_v4 = vld [vmem:[#allocation2 + $0xa0] sm:$0xff] }
  0xee   : > { %v4488_v25 = vpop.permute.xlu2 %1239 }
  0xef   : > { %6721 = vst [vmem:[#allocation69_spill] sm:$0xff] %v4488_v25  ;;  %1371 = vrot.lane.b32.xlu0 %v931_v11, %s3689_s16  ;;  %v4491_v10 = vpop.permute.xlu1 %1219  ;;  %v646_v11 = vld [vmem:[#allocation2 + $0x98] sm:$0xff] }
  0xf0   : > { %6722 = vst [vmem:[#allocation70_spill] sm:$0xff] %v4491_v10  ;;  %v586_v25 = vld [vmem:[%s3790_s13 + $0xf8] sm:$0xff]  ;;  %v934_v10 = vsel %vm508_vm1, %v646_v11, 0.0 }
  0xf1   : > { %v4497_v40 = vpop.permute.xlu0 %1223  ;;  %626 = vst.msk [vmem:[#allocation2 + $0x109] sm:$0xff] %vm6588_vm0, %v586_v25  ;;  %v936_v25 = vsel %vm6589_vm15, %v4517_v38, 0.0  ;;  %vm6593_vm0 = vcmp.gt.f32.partialorder %v4217_v33, 0.5  ;;  %vm6596_vm15 = vcmp.gt.f32.partialorder %v4230_v29, 0.5  ;;  %v4762_v33 = vld [vmem:[#allocation2 + $0xd1] sm:$0xff] }
  0xf2   : > { %6724 = vst [vmem:[#allocation72_spill] sm:$0xff] %v4497_v40 }
  0xf3   : > { %6782 = vst [vmem:[#allocation130_spill] sm:$0xff] %v4762_v33 }
  0xf4   : > { %1375 = vrot.lane.b32.xlu2 %v933_v58, %s3689_s16 }
  0xf5   : > { %1373 = vrot.lane.b32.xlu1 %v932_v53, %s3689_s16  ;;  %v4531_v53 = vld [vmem:[#allocation2 + $0xb0] sm:$0xff] }
  0xf6   : > { %v4511_v40 = vpop.permute.xlu2 %1245  ;;  %v937_v11 = vsel %vm6593_vm0, %v4531_v53, 0.0  ;;  %vm6601_vm0 = vcmp.gt.f32.partialorder %v4269_v62, 0.5 }
  0xf7   : > { %6725 = vst [vmem:[#allocation73_spill] sm:$0xff] %v4511_v40  ;;  %1377 = vrot.lane.b32.xlu0 %v934_v10, %s3689_s16  ;;  %v4514_v15 = vpop.permute.xlu1 %1225  ;;  %v935_v10 = vsel %vm6592_vm2, %v4519_v4, 0.0  ;;  %vm6600_vm2 = vcmp.gt.f32.partialorder %v4204_v5, 0.5  ;;  %v4571_v5 = vld [vmem:[#allocation2 + $0xd8] sm:$0xff] }
  0xf8   : > { %6726 = vst [vmem:[#allocation74_spill] sm:$0xff] %v4514_v15  ;;  %v4544_v15 = vld [vmem:[#allocation2 + $0xc0] sm:$0xff] }
  0xf9   : > { %v4522_v58 = vpop.permute.xlu0 %1229  ;;  %6730 = vst [vmem:[#allocation78_spill] sm:$0xff] %v4544_v15 }
  0xfa   : > { %6727 = vst [vmem:[#allocation75_spill] sm:$0xff] %v4522_v58 }
  0xfb   : > { %6736 = vst [vmem:[#allocation84_spill] sm:$0xff] %v4571_v5 }
  0xfc   : > { %1381 = vrot.lane.b32.xlu2 %v936_v25, %s3689_s16 }
  0xfd   : > { %1379 = vrot.lane.b32.xlu1 %v935_v10, %s3689_s16  ;;  %v939_v10 = vsel %vm6596_vm15, %v4544_v15, 0.0  ;;  %vm6606_vm15 = vcmp.gt.f32.partialorder %v4279_v1, 0.5  ;;  %v4573_v15 = vld [vmem:[#allocation2 + $0xd0] sm:$0xff] }
  0xfe   : > { %v4538_v40 = vpop.permute.xlu2 %1251  ;;  %6737 = vst [vmem:[#allocation85_spill] sm:$0xff] %v4573_v15 }
  0xff   : > { %6728 = vst [vmem:[#allocation76_spill] sm:$0xff] %v4538_v40  ;;  %1383 = vrot.lane.b32.xlu0 %v937_v11, %s3689_s16  ;;  %v4541_v58 = vpop.permute.xlu1 %1231  ;;  %v938_v11 = vsel %vm6600_vm2, %v4546_v47, 0.0  ;;  %vm6610_vm2 = vcmp.gt.f32.partialorder %v4264_v18, 0.5  ;;  %v657_v18 = vld [vmem:[#allocation2 + $0xf0] sm:$0xff] }
 0x100   : > { %6729 = vst [vmem:[#allocation77_spill] sm:$0xff] %v4541_v58  ;;  %v4558_v58 = vld [vmem:[#allocation2 + $0xc8] sm:$0xff] }
 0x101   : > { %v4549_v25 = vpop.permute.xlu0 %1235  ;;  %6733 = vst [vmem:[#allocation81_spill] sm:$0xff] %v4558_v58  ;;  %v940_v40 = vsel %vm6601_vm0, %v4558_v58, 0.0  ;;  %vm6613_vm0 = vcmp.gt.f32.partialorder %v4306_v24, 0.5  ;;  %v4704_v58 = vld [vmem:[#allocation2 + $0x81] sm:$0xff]  ;;  %v950_v47 = vld [vmem:[#allocation2 + $0x109] sm:$0xff] }
 0x102   : > { %6732 = vst [vmem:[#allocation80_spill] sm:$0xff] %v4549_v25 }
 0x103   : > { %6767 = vst [vmem:[#allocation115_spill] sm:$0xff] %v4704_v58 }
 0x104   : > { %1387 = vrot.lane.b32.xlu2 %v939_v10, %s3689_s16 }
 0x105   : > { %1385 = vrot.lane.b32.xlu1 %v938_v11, %s3689_s16  ;;  %v942_v11 = vsel %vm6606_vm15, %v4571_v5, 0.0  ;;  %vm6617_vm15 = vcmp.gt.f32.partialorder %v4312_v39, 0.5  ;;  %v4598_v5 = vld [vmem:[#allocation2 + $0xe8] sm:$0xff]  ;;  %v915_v39 = vld [vmem:[#allocation2 + $0x100] sm:$0xff] }
 0x106   : > { %v4565_v25 = vpop.permute.xlu2 %1257  ;;  %6742 = vst [vmem:[#allocation90_spill] sm:$0xff] %v4598_v5  ;;  %v945_v24 = vsel %vm6617_vm15, %v657_v18, 0.0  ;;  %vm6649_vm15 = vcmp.gt.f32.partialorder %v4336_v59, 0.5  ;;  %v4654_v59 = vld [vmem:[#allocation2 + $0x31] sm:$0xff] }
 0x107   : > { %6734 = vst [vmem:[#allocation82_spill] sm:$0xff] %v4565_v25  ;;  %1389 = vrot.lane.b32.xlu0 %v940_v40, %s3689_s16  ;;  %v4568_v29 = vpop.permute.xlu1 %1237  ;;  %v941_v40 = vsel %vm6610_vm2, %v4573_v15, 0.0  ;;  %vm6618_vm2 = vcmp.gt.f32.partialorder %v4304_v7, 0.5  ;;  %v4690_v15 = vld [vmem:[#allocation2 + $0x61] sm:$0xff] }
 0x108   : > { %6735 = vst [vmem:[#allocation83_spill] sm:$0xff] %v4568_v29  ;;  %v4585_v29 = vld [vmem:[#allocation2 + $0xe0] sm:$0xff] }
 0x109   : > { %v4576_v10 = vpop.permute.xlu0 %1241  ;;  %6739 = vst [vmem:[#allocation87_spill] sm:$0xff] %v4585_v29  ;;  %v943_v25 = vsel %vm6613_vm0, %v4585_v29, 0.0  ;;  %vm6651_vm0 = vcmp.gt.f32.partialorder %v4330_v17, 0.5 }
 0x10a   : > { %6738 = vst [vmem:[#allocation86_spill] sm:$0xff] %v4576_v10  ;;  %v4734_v10 = vld [vmem:[#allocation2 + $0xb1] sm:$0xff] }
 0x10b   : > { %6762 = vst [vmem:[#allocation110_spill] sm:$0xff] %v4690_v15 }
 0x10c   : > { %1393 = vrot.lane.b32.xlu2 %v942_v11, %s3689_s16 }
 0x10d   : > { %1391 = vrot.lane.b32.xlu1 %v941_v40, %s3689_s16  ;;  %v944_v40 = vsel %vm6618_vm2, %v4598_v5, 0.0  ;;  %vm6650_vm2 = vcmp.gt.f32.partialorder %v4328_v23, 0.5  ;;  %v4660_v23 = vld [vmem:[#allocation2 + $0x41] sm:$0xff] }
 0x10e   : > { %v4592_v62 = vpop.permute.xlu2 %1263 }
 0x10f   : > { %6740 = vst [vmem:[#allocation88_spill] sm:$0xff] %v4592_v62  ;;  %1395 = vrot.lane.b32.xlu0 %v943_v25, %s3689_s16  ;;  %v4595_v1 = vpop.permute.xlu1 %1243  ;;  %v658_v25 = vld [vmem:[#allocation2 + $0xf8] sm:$0xff] }
 0x110   : > { %6741 = vst [vmem:[#allocation89_spill] sm:$0xff] %v4595_v1  ;;  %v946_v62 = vsel %vm6651_vm0, %v658_v25, 0.0  ;;  %v3497_v25 = vld [vmem:[#allocation2 + $0x11] sm:$0xff]  ;;  %vm6804_vm0 = vcmp.lt.f32.partialorder %v4059_v12, 14.5 }
 0x111   : > { %v4601_v11 = vpop.permute.xlu0 %1247 }
 0x112   : > { %6743 = vst [vmem:[#allocation91_spill] sm:$0xff] %v4601_v11  ;;  %v916_v11 = vld [vmem:[#allocation2 + $0x108] sm:$0xff] }
 0x114   : > { %1399 = vrot.lane.b32.xlu2 %v945_v24, %s3689_s16  ;;  %v948_v24 = vsel %vm6649_vm15, %v916_v11, 0.0  ;;  %vm6802_vm15 = vcmp.lt.f32.partialorder %v4046_v3, 14.5 }
 0x115   : > { %1397 = vrot.lane.b32.xlu1 %v944_v40, %s3689_s16  ;;  %v947_v40 = vsel %vm6650_vm2, %v915_v39, 0.0  ;;  %v3499_v39 = vld [vmem:[#allocation2 + $0x19] sm:$0xff]  ;;  %vm6803_vm2 = vcmp.lt.f32.partialorder %v4052_v8, 14.5 }
 0x116   : > { %v4613_v29 = vpop.permute.xlu2 %1269 }
 0x117   : > { %6744 = vst [vmem:[#allocation92_spill] sm:$0xff] %v4613_v29  ;;  %1401 = vrot.lane.b32.xlu0 %v946_v62, %s3689_s16  ;;  %v4616_v18 = vpop.permute.xlu1 %1249 }
 0x118   : > { %6745 = vst [vmem:[#allocation93_spill] sm:$0xff] %v4616_v18  ;;  %v4686_v18 = vld [vmem:[#allocation2 + $0x69] sm:$0xff] }
 0x119   : > { %v4620_v7 = vpop.permute.xlu0 %1253  ;;  %6761 = vst [vmem:[#allocation109_spill] sm:$0xff] %v4686_v18 }
 0x11a   : > { %6746 = vst [vmem:[#allocation94_spill] sm:$0xff] %v4620_v7  ;;  %v4635_v7 = vld [vmem:[#allocation2 + $0x21] sm:$0xff] }
 0x11c   : > { %1405 = vrot.lane.b32.xlu2 %v948_v24, %s3689_s16  ;;  %v4642_v24 = vld [vmem:[#allocation2 + $0x29] sm:$0xff] }
 0x11d   : > { %1403 = vrot.lane.b32.xlu1 %v947_v40, %s3689_s16 }
 0x11e   : > { %v4628_v62 = vpop.permute.xlu2 %1275 }
 0x11f   : > { %6747 = vst [vmem:[#allocation95_spill] sm:$0xff] %v4628_v62  ;;  %1441 = vrot.lane.b32.xlu0 %v3497_v25, %s3690_s17  ;;  %v4631_v29 = vpop.permute.xlu1 %1255  ;;  %v4650_v62 = vld [vmem:[#allocation2 + $0x39] sm:$0xff] }
 0x120   : > { %6748 = vst [vmem:[#allocation96_spill] sm:$0xff] %v4631_v29  ;;  %v4672_v29 = vld [vmem:[#allocation2 + $0x49] sm:$0xff] }
 0x121   : > { %v4633_v17 = vpop.permute.xlu0 %1259 }
 0x122   : > { %6749 = vst [vmem:[#allocation97_spill] sm:$0xff] %v4633_v17  ;;  %v4668_v17 = vld [vmem:[#allocation2 + $0x51] sm:$0xff] }
 0x123   : > { %6756 = vst [vmem:[#allocation104_spill] sm:$0xff] %v4668_v17 }
 0x124   : > { %1445 = vrot.lane.b32.xlu2 %v4635_v7, %s3690_s17 }
 0x125   : > { %1443 = vrot.lane.b32.xlu1 %v3499_v39, %s3690_s17 }
 0x126   : > { %v4640_v11 = vpop.permute.xlu2 %1345 }
 0x127   : > { %6750 = vst [vmem:[#allocation98_spill] sm:$0xff] %v4640_v11  ;;  %1447 = vrot.lane.b32.xlu0 %v4642_v24, %s3690_s17  ;;  %v4646_v40 = vpop.permute.xlu1 %1261  ;;  %v4696_v11 = vld [vmem:[#allocation2 + $0x71] sm:$0xff] }
 0x128   : > { %6751 = vst [vmem:[#allocation99_spill] sm:$0xff] %v4646_v40 }
 0x129   : > { %v4648_v25 = vpop.permute.xlu0 %1265  ;;  %6764 = vst [vmem:[#allocation112_spill] sm:$0xff] %v4696_v11 }
 0x12a   : > { %6752 = vst [vmem:[#allocation100_spill] sm:$0xff] %v4648_v25 }
 0x12c   : > { %1451 = vrot.lane.b32.xlu2 %v4650_v62, %s3690_s17 }
 0x12d   : > { %1449 = vrot.lane.b32.xlu1 %v4654_v59, %s3690_s17 }
 0x12e   : > { %v4658_v39 = vpop.permute.xlu2 %1351 }
 0x12f   : > { %6753 = vst [vmem:[#allocation101_spill] sm:$0xff] %v4658_v39  ;;  %1453 = vrot.lane.b32.xlu0 %v4660_v23, %s3690_s17  ;;  %v4664_v40 = vpop.permute.xlu1 %1267  ;;  %v4678_v39 = vld [vmem:[#allocation2 + $0x59] sm:$0xff] }
 0x130   : > { %6754 = vst [vmem:[#allocation102_spill] sm:$0xff] %v4664_v40 }
 0x131   : > { %v4666_v25 = vpop.permute.xlu0 %1271  ;;  %6758 = vst [vmem:[#allocation106_spill] sm:$0xff] %v4678_v39 }
 0x132   : > { %6755 = vst [vmem:[#allocation103_spill] sm:$0xff] %v4666_v25 }
 0x134   : > { %1457 = vrot.lane.b32.xlu2 %v4668_v17, %s3690_s17  ;;  %v4789_v17 = vld [vmem:[#allocation2 + $0xf1] sm:$0xff] }
 0x135   : > { %1455 = vrot.lane.b32.xlu1 %v4672_v29, %s3690_s17  ;;  %6791 = vst [vmem:[#allocation139_spill] sm:$0xff] %v4789_v17 }
 0x136   : > { %v4676_v5 = vpop.permute.xlu2 %1357 }
 0x137   : > { %6757 = vst [vmem:[#allocation105_spill] sm:$0xff] %v4676_v5  ;;  %1459 = vrot.lane.b32.xlu0 %v4678_v39, %s3690_s17  ;;  %v4682_v40 = vpop.permute.xlu1 %1273  ;;  %v4756_v39 = vld [vmem:[#allocation2 + $0xc1] sm:$0xff] }
 0x138   : > { %6759 = vst [vmem:[#allocation107_spill] sm:$0xff] %v4682_v40 }
 0x139   : > { %v4684_v25 = vpop.permute.xlu0 %1277  ;;  %6780 = vst [vmem:[#allocation128_spill] sm:$0xff] %v4756_v39 }
 0x13a   : > { %6760 = vst [vmem:[#allocation108_spill] sm:$0xff] %v4684_v25 }
 0x13c   : > { %1463 = vrot.lane.b32.xlu2 %v4686_v18, %s3690_s17  ;;  %v4708_v18 = vld [vmem:[#allocation2 + $0x79] sm:$0xff] }
 0x13d   : > { %1461 = vrot.lane.b32.xlu1 %v4690_v15, %s3690_s17  ;;  %6768 = vst [vmem:[#allocation116_spill] sm:$0xff] %v4708_v18  ;;  %v4714_v15 = vld [vmem:[#allocation2 + $0x89] sm:$0xff] }
 0x13e   : > { %v4694_v5 = vpop.permute.xlu2 %1363  ;;  %6770 = vst [vmem:[#allocation118_spill] sm:$0xff] %v4714_v15 }
 0x13f   : > { %6763 = vst [vmem:[#allocation111_spill] sm:$0xff] %v4694_v5  ;;  %1465 = vrot.lane.b32.xlu0 %v4696_v11, %s3690_s17  ;;  %v4700_v40 = vpop.permute.xlu1 %1343 }
 0x140   : > { %6765 = vst [vmem:[#allocation113_spill] sm:$0xff] %v4700_v40  ;;  %v3513_v40 = vld [vmem:[#allocation2 + $0x99] sm:$0xff] }
 0x141   : > { %v4702_v25 = vpop.permute.xlu0 %1347 }
 0x142   : > { %6766 = vst [vmem:[#allocation114_spill] sm:$0xff] %v4702_v25 }
 0x144   : > { %1469 = vrot.lane.b32.xlu2 %v4704_v58, %s3690_s17  ;;  %v3514_v58 = vld [vmem:[#allocation2 + $0x91] sm:$0xff] }
 0x145   : > { %1467 = vrot.lane.b32.xlu1 %v4708_v18, %s3690_s17  ;;  %v4726_v18 = vld [vmem:[#allocation2 + $0xa1] sm:$0xff] }
 0x146   : > { %v4712_v5 = vpop.permute.xlu2 %1369 }
 0x147   : > { %6769 = vst [vmem:[#allocation117_spill] sm:$0xff] %v4712_v5  ;;  %1471 = vrot.lane.b32.xlu0 %v4714_v15, %s3690_s17  ;;  %v4718_v11 = vpop.permute.xlu1 %1349 }
 0x149   : > { %v4720_v25 = vpop.permute.xlu0 %1353 }
 0x14a   : > { %6771 = vst [vmem:[#allocation119_spill] sm:$0xff] %v4720_v25  ;;  %v4744_v25 = vld [vmem:[#allocation2 + $0xb9] sm:$0xff] }
 0x14b   : > { %6776 = vst [vmem:[#allocation124_spill] sm:$0xff] %v4744_v25 }
 0x14c   : > { %1475 = vrot.lane.b32.xlu2 %v3513_v40, %s3690_s17  ;;  %v4738_v40 = vld [vmem:[#allocation2 + $0xa9] sm:$0xff] }
 0x14d   : > { %1473 = vrot.lane.b32.xlu1 %v3514_v58, %s3690_s17 }
 0x14e   : > { %v4724_v1 = vpop.permute.xlu2 %1375 }
 0x14f   : > { %6772 = vst [vmem:[#allocation120_spill] sm:$0xff] %v4724_v1  ;;  %1477 = vrot.lane.b32.xlu0 %v4726_v18, %s3690_s17  ;;  %v4730_v5 = vpop.permute.xlu1 %1355  ;;  %v4752_v1 = vld [vmem:[#allocation2 + $0xc9] sm:$0xff] }
 0x150   : > { %6773 = vst [vmem:[#allocation121_spill] sm:$0xff] %v4730_v5 }
 0x151   : > { %v4732_v15 = vpop.permute.xlu0 %1359  ;;  %6779 = vst [vmem:[#allocation127_spill] sm:$0xff] %v4752_v1 }
 0x152   : > { %6774 = vst [vmem:[#allocation122_spill] sm:$0xff] %v4732_v15 }
 0x154   : > { %1481 = vrot.lane.b32.xlu2 %v4734_v10, %s3690_s17 }
 0x155   : > { %1479 = vrot.lane.b32.xlu1 %v4738_v40, %s3690_s17 }
 0x156   : > { %v4742_v58 = vpop.permute.xlu2 %1381 }
 0x157   : > { %6775 = vst [vmem:[#allocation123_spill] sm:$0xff] %v4742_v58  ;;  %1483 = vrot.lane.b32.xlu0 %v4744_v25, %s3690_s17  ;;  %v4748_v5 = vpop.permute.xlu1 %1361  ;;  %v4770_v25 = vld [vmem:[#allocation2 + $0xe1] sm:$0xff] }
 0x158   : > { %6777 = vst [vmem:[#allocation125_spill] sm:$0xff] %v4748_v5 }
 0x159   : > { %v4750_v15 = vpop.permute.xlu0 %1365  ;;  %6785 = vst [vmem:[#allocation133_spill] sm:$0xff] %v4770_v25 }
 0x15a   : > { %6778 = vst [vmem:[#allocation126_spill] sm:$0xff] %v4750_v15 }
 0x15c   : > { %1487 = vrot.lane.b32.xlu2 %v4752_v1, %s3690_s17  ;;  %v4774_v1 = vld [vmem:[#allocation2 + $0xd9] sm:$0xff] }
 0x15d   : > { %1485 = vrot.lane.b32.xlu1 %v4756_v39, %s3690_s17  ;;  %6786 = vst [vmem:[#allocation134_spill] sm:$0xff] %v4774_v1  ;;  %v4780_v39 = vld [vmem:[#allocation2 + $0xe9] sm:$0xff] }
 0x15e   : > { %v4760_v58 = vpop.permute.xlu2 %1387  ;;  %6788 = vst [vmem:[#allocation136_spill] sm:$0xff] %v4780_v39 }
 0x15f   : > { %6781 = vst [vmem:[#allocation129_spill] sm:$0xff] %v4760_v58  ;;  %1489 = vrot.lane.b32.xlu0 %v4762_v33, %s3690_s17  ;;  %v4766_v5 = vpop.permute.xlu1 %1367 }
 0x160   : > { %6783 = vst [vmem:[#allocation131_spill] sm:$0xff] %v4766_v5 }
 0x161   : > { %v4768_v15 = vpop.permute.xlu0 %1371 }
 0x162   : > { %6784 = vst [vmem:[#allocation132_spill] sm:$0xff] %v4768_v15  ;;  %v3525_v15 = vld [vmem:[#allocation2 + $0xf9] sm:$0xff] }
 0x164   : > { %1493 = vrot.lane.b32.xlu2 %v4770_v25, %s3690_s17  ;;  %v949_v25 = vld [vmem:[#allocation2 + $0x101] sm:$0xff] }
 0x165   : > { %1491 = vrot.lane.b32.xlu1 %v4774_v1, %s3690_s17 }
 0x166   : > { %v4778_v58 = vpop.permute.xlu2 %1393 }
 0x167   : > { %6787 = vst [vmem:[#allocation135_spill] sm:$0xff] %v4778_v58  ;;  %1495 = vrot.lane.b32.xlu0 %v4780_v39, %s3690_s17  ;;  %v4784_v5 = vpop.permute.xlu1 %1373 }
 0x168   : > { %6789 = vst [vmem:[#allocation137_spill] sm:$0xff] %v4784_v5  ;;  %v3527_v5 = vld [vmem:[#allocation2 + $0x12] sm:$0xff] }
 0x169   : > { %v4786_v33 = vpop.permute.xlu0 %1377 }
 0x16a   : > { %6790 = vst [vmem:[#allocation138_spill] sm:$0xff] %v4786_v33  ;;  %v953_v33 = vsel %vm523_vm3, %v3527_v5, 0.0  ;;  %v956_v5 = vsel %vm526_vm5, %v3986_v27, 0.0  ;;  %v959_v27 = vsel %vm529_vm8, %v4030_v55, 0.0  ;;  %v961_v55 = vsel %vm531_vm12, %v4044_v2, 0.0 }
 0x16b   : > { %v965_v2 = vsel %vm6802_vm15, %v4128_v9, 0.0  ;;  %vm6806_vm15 = vcmp.lt.f32.partialorder %v4102_v50, 14.5 }
 0x16c   : > { %1499 = vrot.lane.b32.xlu2 %v3525_v15, %s3690_s17  ;;  %v3528_v15 = vld [vmem:[#allocation2 + $0x1a] sm:$0xff]  ;;  %v967_v9 = vsel %vm6806_vm15, %v4142_v30, 0.0  ;;  %vm6817_vm15 = vcmp.gt.f32.partialorder %v4109_v56, 0.5 }
 0x16d   : > { %1497 = vrot.lane.b32.xlu1 %v4789_v17, %s3690_s17  ;;  %v954_v17 = vsel %vm524_vm4, %v3528_v15, 0.0 }
 0x16e   : > { %v4793_v1 = vpop.permute.xlu2 %1399 }
 0x16f   : > { %6792 = vst [vmem:[#allocation140_spill] sm:$0xff] %v4793_v1  ;;  %1501 = vrot.lane.b32.xlu0 %v949_v25, %s3690_s17  ;;  %v4796_v58 = vpop.permute.xlu1 %1379 }
 0x170   : > { %6793 = vst [vmem:[#allocation141_spill] sm:$0xff] %v4796_v58  ;;  %v3529_v58 = vld [vmem:[#allocation2 + $0x22] sm:$0xff] }
 0x171   : > { %v4798_v39 = vpop.permute.xlu0 %1383  ;;  %v1023_v30 = vsel %vm523_vm3, %v3529_v58, 0.0  ;;  %vm6812_vm3 = vcmp.gt.f32.partialorder %v3924_v44, 0.5 }
 0x172   : > { %6794 = vst [vmem:[#allocation142_spill] sm:$0xff] %v4798_v39 }
 0x174   : > { %1569 = vrot.lane.b32.xlu2 %v953_v33, %s3691_s18  ;;  %v955_v33 = vsel %vm525_vm6, %v3529_v58, 0.0 }
 0x175   : > { %1503 = vrot.lane.b32.xlu1 %v950_v47, %s3690_s17  ;;  %v957_v47 = vsel %vm527_vm7, %v3974_v20, 0.0  ;;  %v960_v20 = vsel %vm530_vm10, %v4020_v49, 0.0  ;;  %v963_v49 = vsel %vm533_vm13, %v4064_v16, 0.0  ;;  %v966_v16 = vsel %vm6804_vm0, %v4113_v61, 0.0 }
 0x176   : > { %v4806_v1 = vpop.permute.xlu2 %1405  ;;  %vm6807_vm0 = vcmp.gt.f32.partialorder %v3911_v36, 0.5 }
 0x177   : > { %6795 = vst [vmem:[#allocation143_spill] sm:$0xff] %v4806_v1  ;;  %1571 = vrot.lane.b32.xlu0 %v954_v17, %s3691_s18  ;;  %v4809_v25 = vpop.permute.xlu1 %1385 }
 0x179   : > { %v4811_v39 = vpop.permute.xlu0 %1389 }
 0x17a   : > { %6796 = vst [vmem:[#allocation144_spill] sm:$0xff] %v4811_v39  ;;  %v6864_v39 = vld [vmem:[#allocation117_spill] sm:$0xff] }
 0x17c   : > { %1575 = vrot.lane.b32.xlu2 %v956_v5, %s3691_s18  ;;  %v958_v5 = vsel %vm528_vm9, %v4000_v35, 0.0  ;;  %v962_v35 = vsel %vm532_vm11, %v4074_v19, 0.0  ;;  %v964_v19 = vsel %vm6803_vm2, %v4091_v34, 0.0  ;;  %v987_v34 = vsel %vm491_vm14, %v4375_v32, 0.0 }
 0x17d   : > { %1573 = vrot.lane.b32.xlu1 %v955_v33, %s3691_s18  ;;  %v988_v32 = vsel %vm6807_vm0, %v4391_v54, 0.0  ;;  %vm6809_vm2 = vcmp.gt.f32.partialorder %v3932_v52, 0.5  ;;  %vm6823_vm0 = vcmp.lt.f32.partialorder %v4158_v57, 14.5 }
 0x17e   : > { %v4823_v17 = vpop.permute.xlu2 %1445  ;;  %v989_v54 = vsel %vm6809_vm2, %v4389_v13, 0.0  ;;  %v990_v13 = vsel %vm6812_vm3, %v4403_v28, 0.0  ;;  %v1003_v28 = vsel %vm6817_vm15, %v4519_v4, 0.0  ;;  %vm6825_vm2 = vmmov %vm6812_vm3  ;;  %vm6828_vm3 = vcmask 31744  }
 0x17f   : > { %1577 = vrot.lane.b32.xlu0 %v957_v47, %s3691_s18  ;;  %v4826_v15 = vpop.permute.xlu1 %1391  ;;  %vm2084_vm15 = vcmask 97280  }
 0x180   : > { %6797 = vst [vmem:[#allocation145_spill] sm:$0xff] %v4826_v15 }
 0x181   : > { %v4828_v1 = vpop.permute.xlu0 %1395 }
 0x182   : > { %6798 = vst [vmem:[#allocation146_spill] sm:$0xff] %v4828_v1 }
 0x184   : > { %1581 = vrot.lane.b32.xlu2 %v959_v27, %s3691_s18 }
 0x185   : > { %1579 = vrot.lane.b32.xlu1 %v958_v5, %s3691_s18 }
 0x186   : > { %v4841_v33 = vpop.permute.xlu2 %1451 }
 0x187   : > { %1583 = vrot.lane.b32.xlu0 %v960_v20, %s3691_s18  ;;  %v4844_v47 = vpop.permute.xlu1 %1397 }
 0x188   : > { %6799 = vst [vmem:[#allocation147_spill] sm:$0xff] %v4844_v47 }
 0x189   : > { %v4846_v1 = vpop.permute.xlu0 %1401 }
 0x18a   : > { %6800 = vst [vmem:[#allocation148_spill] sm:$0xff] %v4846_v1 }
 0x18c   : > { %1587 = vrot.lane.b32.xlu2 %v962_v35, %s3691_s18 }
 0x18d   : > { %1585 = vrot.lane.b32.xlu1 %v961_v55, %s3691_s18 }
 0x18e   : > { %v4859_v27 = vpop.permute.xlu2 %1457 }
 0x18f   : > { %1589 = vrot.lane.b32.xlu0 %v963_v49, %s3691_s18  ;;  %v4862_v5 = vpop.permute.xlu1 %1403 }
 0x190   : > { %6801 = vst [vmem:[#allocation149_spill] sm:$0xff] %v4862_v5  ;;  %v3531_v5 = vld [vmem:[#allocation2 + $0x32] sm:$0xff] }
 0x191   : > { %v4864_v20 = vpop.permute.xlu0 %1441 }
 0x194   : > { %1593 = vrot.lane.b32.xlu2 %v965_v2, %s3691_s18 }
 0x195   : > { %1591 = vrot.lane.b32.xlu1 %v964_v19, %s3691_s18 }
 0x196   : > { %v4877_v35 = vpop.permute.xlu2 %1463 }
 0x197   : > { %6805 = vst [vmem:[#allocation150_spill] sm:$0xff] %v4877_v35  ;;  %1595 = vrot.lane.b32.xlu0 %v966_v16, %s3691_s18  ;;  %v4880_v55 = vpop.permute.xlu1 %1443 }
 0x199   : > { %v4882_v49 = vpop.permute.xlu0 %1447 }
 0x19c   : > { %1697 = vrot.lane.b32.xlu2 %v987_v34, %s3692_s19 }
 0x19d   : > { %1597 = vrot.lane.b32.xlu1 %v967_v9, %s3691_s18  ;;  %v3530_v9 = vld [vmem:[#allocation2 + $0x2a] sm:$0xff] }
 0x19e   : > { %v4892_v61 = vpop.permute.xlu2 %1469  ;;  %v1024_v58 = vsel %vm524_vm4, %v3530_v9, 0.0  ;;  %v1025_v9 = vsel %vm525_vm6, %v3531_v5, 0.0  ;;  %vm6814_vm4 = vcmp.lt.f32.partialorder %v4109_v56, 14.5  ;;  %v3532_v5 = vld [vmem:[#allocation2 + $0x3a] sm:$0xff] }
 0x19f   : > { %1795 = vrot.lane.b32.xlu0 %v4635_v7, %s3693_s20  ;;  %v4896_v2 = vpop.permute.xlu1 %1449  ;;  %vm6819_vm6 = vmmov %vm6814_vm4 }
 0x1a0   : > { %v1039_v4 = vsel %vm6819_vm6, %v4243_v45, 0.0  ;;  %vm6830_vm6 = vmmov %vm6823_vm0 }
 0x1a1   : > { %v4898_v19 = vpop.permute.xlu0 %1453 }
 0x1a4   : > { %1699 = vrot.lane.b32.xlu2 %v988_v32, %s3692_s19 }
 0x1a5   : > { %1923 = vrot.lane.b32.xlu1 %v1023_v30, %s3694_s26 }
 0x1a6   : > { %v4907_v16 = vpop.permute.xlu2 %1475 }
 0x1a7   : > { %1797 = vrot.lane.b32.xlu0 %v4642_v24, %s3693_s20  ;;  %v4911_v7 = vpop.permute.xlu1 %1455 }
 0x1a9   : > { %v4913_v34 = vpop.permute.xlu0 %1459 }
 0x1aa   : > { %6808 = vst [vmem:[#allocation151_spill] sm:$0xff] %v4913_v34 }
 0x1ac   : > { %1701 = vrot.lane.b32.xlu2 %v989_v54, %s3692_s19  ;;  %v6813_v54 = vld [vmem:[#allocation17_spill] sm:$0xff] }
 0x1ad   : > { %1925 = vrot.lane.b32.xlu1 %v1024_v58, %s3694_s26  ;;  %v969_v58 = vsel %vm6814_vm4, %v6813_v54, 0.0  ;;  %vm2051_vm4 = vcmask 64512  }
 0x1ae   : > { %v4922_v32 = vpop.permute.xlu2 %1481 }
 0x1af   : > { %1799 = vrot.lane.b32.xlu0 %v4654_v59, %s3693_s20  ;;  %v4926_v24 = vpop.permute.xlu1 %1461 }
 0x1b0   : > { %6810 = vst [vmem:[#allocation152_spill] sm:$0xff] %v4926_v24 }
 0x1b1   : > { %v4928_v30 = vpop.permute.xlu0 %1465 }
 0x1b2   : > { %6811 = vst [vmem:[#allocation153_spill] sm:$0xff] %v4928_v30  ;;  %v6827_v30 = vld [vmem:[#allocation19_spill] sm:$0xff] }
 0x1b4   : > { %1703 = vrot.lane.b32.xlu2 %v990_v13, %s3692_s19  ;;  %v1026_v13 = vsel %vm526_vm5, %v3532_v5, 0.0  ;;  %vm6820_vm5 = vcmp.gt.f32.partialorder %v3941_v60, 0.5 }
 0x1b5   : > { %1927 = vrot.lane.b32.xlu1 %v1025_v9, %s3694_s26 }
 0x1b6   : > { %v4940_v59 = vpop.permute.xlu2 %1487 }
 0x1b7   : > { %6815 = vst [vmem:[#allocation17_spill] sm:$0xff] %v4940_v59  ;;  %1601 = vrot.lane.b32.xlu0 %v969_v58, %s3691_s18  ;;  %v4943_v1 = vpop.permute.xlu1 %1467  ;;  %v6862_v59 = vld [vmem:[#allocation86_spill] sm:$0xff] }
 0x1b9   : > { %v4945_v47 = vpop.permute.xlu0 %1471 }
 0x1ba   : > { %6816 = vst [vmem:[#allocation154_spill] sm:$0xff] %v4945_v47  ;;  %v6822_v47 = vld [vmem:[#allocation21_spill] sm:$0xff] }
 0x1bc   : > { %1729 = vrot.lane.b32.xlu2 %v1003_v28, %s3692_s19  ;;  %v991_v28 = vsel %vm6820_vm5, %v4418_v43, 0.0  ;;  %v1004_v43 = vsel %vm508_vm1, %v4517_v38, 0.0  ;;  %vm2117_vm5 = vcmask 130048  }
 0x1bd   : > { %1801 = vrot.lane.b32.xlu1 %v4650_v62, %s3693_s20 }
 0x1be   : > { %v4955_v9 = vpop.permute.xlu2 %1493 }
 0x1bf   : > { %6818 = vst [vmem:[#allocation155_spill] sm:$0xff] %v4955_v9  ;;  %1929 = vrot.lane.b32.xlu0 %v1026_v13, %s3694_s26  ;;  %v4958_v54 = vpop.permute.xlu1 %1473  ;;  %v970_v9 = vsel %vm6823_vm0, %v6822_v47, 0.0  ;;  %vm6833_vm0 = vcmp.lt.f32.partialorder %v4144_v31, 14.5 }
 0x1c1   : > { %v4960_v58 = vpop.permute.xlu0 %1477 }
 0x1c4   : > { %1955 = vrot.lane.b32.xlu2 %v1039_v4, %s3694_s26 }
 0x1c5   : > { %1827 = vrot.lane.b32.xlu1 %v4726_v18, %s3693_s20 }
 0x1c6   : > { %v4971_v62 = vpop.permute.xlu2 %1499 }
 0x1c7   : > { %6821 = vst [vmem:[#allocation156_spill] sm:$0xff] %v4971_v62  ;;  %1705 = vrot.lane.b32.xlu0 %v991_v28, %s3692_s19  ;;  %v4974_v5 = vpop.permute.xlu1 %1479  ;;  %v726_v28 = vsel %vm6825_vm2, %v4362_v42, 0.0  ;;  %v3533_v62 = vld [vmem:[#allocation2 + $0x42] sm:$0xff]  ;;  %vm6834_vm2 = vcmp.gt.f32.partialorder %v3965_v14, 0.5 }
 0x1c8   : > { %v2022_v38 = vsel %vm6828_vm3, %v726_v28, %v6827_v30  ;;  %vm6837_vm3 = vcmp.gt.f32.partialorder %v4144_v31, 0.5 }
 0x1c9   : > { %v4976_v13 = vpop.permute.xlu0 %1483 }
 0x1cc   : > { %1803 = vrot.lane.b32.xlu2 %v4660_v23, %s3693_s20  ;;  %v1027_v23 = vsel %vm527_vm7, %v3533_v62, 0.0  ;;  %vm2150_vm7 = vcmask 162816  }
 0x1cd   : > { %1603 = vrot.lane.b32.xlu1 %v970_v9, %s3691_s18  ;;  %v2055_v9 = vsel %vm2051_vm4, %v2022_v38, %v4410_v63 }
 0x1ce   : > { %v4987_v18 = vpop.permute.xlu2 %1569  ;;  %v2088_v42 = vsel %vm2084_vm15, %v2055_v9, %v4718_v11  ;;  %v971_v11 = vsel %vm6833_vm0, %v4243_v45, 0.0 }
 0x1cf   : > { %1731 = vrot.lane.b32.xlu0 %v1004_v43, %s3692_s19  ;;  %v4990_v4 = vpop.permute.xlu1 %1485  ;;  %v6829_v43 = vld [vmem:[#allocation24_spill] sm:$0xff]  ;;  %v2121_v30 = vsel %vm2117_vm5, %v2088_v42, %v4882_v49 }
 0x1d0   : > { %6824 = vst [vmem:[#allocation21_spill] sm:$0xff] %v4990_v4  ;;  %v1040_v44 = vsel %vm6830_vm6, %v6829_v43, 0.0  ;;  %vm6841_vm6 = vmmov %vm6833_vm0  ;;  %vm6842_vm0 = vcmp.lt.f32.partialorder %v4167_v0, 14.5  ;;  %v6865_v4 = vld [vmem:[#allocation66_spill] sm:$0xff] }
 0x1d1   : > { %v4995_v47 = vpop.permute.xlu0 %1489 }
 0x1d2   : > { %6826 = vst [vmem:[#allocation157_spill] sm:$0xff] %v4995_v47 }
 0x1d4   : > { %1829 = vrot.lane.b32.xlu2 %v4738_v40, %s3693_s20 }
 0x1d5   : > { %1931 = vrot.lane.b32.xlu1 %v1027_v23, %s3694_s26  ;;  %v992_v23 = vsel %vm6834_vm2, %v4416_v48, 0.0  ;;  %v1005_v48 = vsel %vm6837_vm3, %v4531_v53, 0.0  ;;  %v1041_v53 = vsel %vm6841_vm6, %v4255_v51, 0.0  ;;  %vm2379_vm2 = vcmask 1043456  }
 0x1d6   : > { %v1576_v62 = vpop.permute.xlu2 %1575  ;;  %vm6845_vm3 = vcmp.gt.f32.partialorder %v4167_v0, 0.5 }
 0x1d7   : > { %1957 = vrot.lane.b32.xlu0 %v1040_v44, %s3694_s26  ;;  %v5015_v63 = vsel %vm2150_vm7, %v2121_v30, %v1576_v62  ;;  %v5017_v40 = vpop.permute.xlu1 %1491  ;;  %v3534_v44 = vld [vmem:[#allocation2 + $0x4a] sm:$0xff] }
 0x1d8   : > { %6831 = vst [vmem:[#allocation19_spill] sm:$0xff] %v5017_v40  ;;  %v1028_v45 = vsel %vm528_vm9, %v3534_v44, 0.0  ;;  %vm6840_vm9 = vcmp.gt.f32.partialorder %v3955_v6, 0.5 }
 0x1d9   : > { %v5019_v28 = vpop.permute.xlu0 %1495  ;;  %v993_v62 = vsel %vm6840_vm9, %v4430_v26, 0.0  ;;  %v289_v26 = vld [vmem:[%s6524_s1 + $0x20] sm:$0xf]  ;;  %vm6850_vm9 = vcmp.gt.f32.partialorder %v3976_v21, 0.5 }
 0x1da   : > { %6832 = vst [vmem:[#allocation24_spill] sm:$0xff] %v5019_v28  ;;  %3360 = vmatpush.msk.msra.mxu0 %vm2379_vm2, %v289_v26  ;;  %3435 = vmatpush.msk.msra.mxu2 %vm2379_vm2, %v289_v26  ;;  %v6846_v26 = vld [vmem:[#allocation104_spill] sm:$0xff] }
 0x1dc   : > { %1605 = vrot.lane.b32.xlu2 %v971_v11, %s3691_s18  ;;  %v972_v11 = vsel %vm6842_vm0, %v6829_v43, 0.0  ;;  %v6844_v43 = vld [vmem:[#allocation79_spill] sm:$0xff] }
 0x1dd   : > { %1707 = vrot.lane.b32.xlu1 %v992_v23, %s3692_s19 }
 0x1de   : > { %v5029_v49 = vpop.permute.xlu2 %1581 }
 0x1df   : > { %1805 = vrot.lane.b32.xlu0 %v4672_v29, %s3693_s20  ;;  %v5033_v38 = vpop.permute.xlu1 %1497 }
 0x1e0   : > { %6835 = vst [vmem:[#allocation158_spill] sm:$0xff] %v5033_v38  ;;  %v6851_v38 = vld [vmem:[#allocation124_spill] sm:$0xff] }
 0x1e1   : > { %v5035_v9 = vpop.permute.xlu0 %1501 }
 0x1e2   : > { %6836 = vst [vmem:[#allocation159_spill] sm:$0xff] %v5035_v9 }
 0x1e4   : > { %1933 = vrot.lane.b32.xlu2 %v1028_v45, %s3694_s26  ;;  %v1006_v45 = vsel %vm6845_vm3, %v6844_v43, 0.0  ;;  %v286_v43 = vld [vmem:[%s6524_s1 + $0x8] sm:$0xff] }
 0x1e5   : > { %1733 = vrot.lane.b32.xlu1 %v1005_v48, %s3692_s19  ;;  %v288_v48 = vld [vmem:[%s6524_s1 + $0x18] sm:$0xff] }
 0x1e6   : > { %v5044_v42 = vpop.permute.xlu2 %1587  ;;  %2395 = vmatpush.msra.mxu0 %v288_v48  ;;  %3436 = vmatpush.msra.mxu2 %v288_v48 }
 0x1e7   : > { %6838 = vst [vmem:[#allocation160_spill] sm:$0xff] %v5044_v42  ;;  %1831 = vrot.lane.b32.xlu0 %v4734_v10, %s3693_s20  ;;  %v5048_v29 = vpop.permute.xlu1 %1503  ;;  %v3536_v42 = vld [vmem:[#allocation2 + $0x5a] sm:$0xff] }
 0x1e8   : > { %6839 = vst [vmem:[#allocation161_spill] sm:$0xff] %v5048_v29 }
 0x1e9   : > { %v5050_v30 = vpop.permute.xlu0 %1571 }
 0x1ec   : > { %1709 = vrot.lane.b32.xlu2 %v993_v62, %s3692_s19  ;;  %v287_v62 = vld [vmem:[%s6524_s1 + $0x10] sm:$0xff] }
 0x1ed   : > { %1959 = vrot.lane.b32.xlu1 %v1041_v53, %s3694_s26  ;;  %v3535_v53 = vld [vmem:[#allocation2 + $0x52] sm:$0xff]  ;;  %2396 = vmatpush.msra.mxu0 %v287_v62 }
 0x1ee   : > { %v5063_v10 = vpop.permute.xlu2 %1593  ;;  %3437 = vmatpush.msra.mxu2 %v287_v62  ;;  %v6849_v62 = vld [vmem:[#allocation61_spill] sm:$0xff] }
 0x1ef   : > { %6843 = vst [vmem:[#allocation162_spill] sm:$0xff] %v5063_v10  ;;  %1607 = vrot.lane.b32.xlu0 %v972_v11, %s3691_s18  ;;  %v5066_v23 = vpop.permute.xlu1 %1573  ;;  %v1029_v11 = vsel %vm529_vm8, %v3535_v53, 0.0  ;;  %2397 = vmatpush.msra.mxu0 %v286_v43  ;;  %vm6848_vm8 = vmmov %vm6842_vm0  ;;  %v6853_v10 = vld [vmem:[#allocation23_spill] sm:$0xff]  ;;  %vm6856_vm0 = vcmp.gt.f32.partialorder %v4059_v12, 0.5 }
 0x1f0   : > { %3438 = vmatpush.msra.mxu2 %v286_v43  ;;  %vm6854_vm6 = vcmp.lt.f32.partialorder %v6853_v10, 14.5  ;;  %vm6859_vm3 = vcmp.gt.f32.partialorder %v6853_v10, 0.5 }
 0x1f1   : > { %v5073_v44 = vpop.permute.xlu0 %1577 }
 0x1f4   : > { %1735 = vrot.lane.b32.xlu2 %v1006_v45, %s3692_s19  ;;  %v285_v45 = vld [vmem:[%s6524_s1] sm:$0xff] }
 0x1f5   : > { %1807 = vrot.lane.b32.xlu1 %v6846_v26, %s3693_s20  ;;  %2398 = vmatpush.msra.mxu0 %v285_v45  ;;  %v6847_v26 = vld [vmem:[#allocation35_spill] sm:$0xff] }
 0x1f6   : > { %v5092_v29 = vpop.permute.xlu2 %1697  ;;  %v1042_v9 = vsel %vm6848_vm8, %v6847_v26, 0.0  ;;  %3439 = vmatpush.msra.mxu2 %v285_v45  ;;  %v973_v45 = vsel %vm6854_vm6, %v4255_v51, 0.0  ;;  %vm6861_vm8 = vcmask 31744  }
 0x1f7   : > { %1935 = vrot.lane.b32.xlu0 %v1029_v11, %s3694_s26  ;;  %v5095_v48 = vpop.permute.xlu1 %1579  ;;  %v994_v11 = vsel %vm6850_vm9, %v6849_v62, 0.0  ;;  %v6857_v62 = vld [vmem:[#allocation106_spill] sm:$0xff]  ;;  %vm6866_vm9 = vcmp.gt.f32.partialorder %v4102_v50, 0.5  ;;  %vm6869_vm6 = vmmov %vm6861_vm8 }
 0x1f9   : > { %v5100_v53 = vpop.permute.xlu0 %1583 }
 0x1fc   : > { %1961 = vrot.lane.b32.xlu2 %v1042_v9, %s3694_s26  ;;  %v6855_v9 = vld [vmem:[#allocation63_spill] sm:$0xff] }
 0x1fd   : > { %1833 = vrot.lane.b32.xlu1 %v6851_v38, %s3693_s20  ;;  %v736_v47 = vsel %vm6856_vm0, %v6855_v9, 0.0  ;;  %v6858_v38 = vld [vmem:[#allocation78_spill] sm:$0xff]  ;;  %vm6872_vm0 = vcmp.lt.f32.partialorder %v6853_v10, 14.5 }
 0x1fe   : > { %v5111_v28 = vpop.permute.xlu2 %1699  ;;  %v1007_v15 = vsel %vm6859_vm3, %v6858_v38, 0.0  ;;  %v737_v38 = vsel %vm6866_vm9, %v6865_v4, 0.0  ;;  %vm6881_vm3 = vcmp.gt.f32.partialorder %v4008_v41, 0.5  ;;  %vm2216_vm9 = vcmask 228352  }
 0x1ff   : > { %1711 = vrot.lane.b32.xlu0 %v994_v11, %s3692_s19  ;;  %v5114_v43 = vpop.permute.xlu1 %1585  ;;  %v6860_v11 = vld [vmem:[#allocation41_spill] sm:$0xff] }
 0x200   : > { %v2032_v35 = vsel %vm6861_vm8, %v736_v47, %v6860_v11  ;;  %vm2183_vm8 = vcmask 195584  }
 0x201   : > { %v5116_v40 = vpop.permute.xlu0 %1589  ;;  %v2065_v51 = vsel %vm2051_vm4, %v2032_v35, %v6862_v59  ;;  %v627_v35 = vld [vmem:[#allocation2] sm:$0xff]  ;;  %v6868_v59 = vld [vmem:[#allocation18_spill] sm:$0xff] }
 0x202   : > { %6852 = vst [vmem:[#allocation79_spill] sm:$0xff] %v5116_v40 }
 0x204   : > { %1809 = vrot.lane.b32.xlu2 %v6857_v62, %s3693_s20  ;;  %v2098_v62 = vsel %vm2084_vm15, %v2065_v51, %v6864_v39  ;;  %v6870_v39 = vld [vmem:[#allocation128_spill] sm:$0xff]  ;;  %v6871_v51 = vld [vmem:[#allocation33_spill] sm:$0xff] }
 0x205   : > { %1609 = vrot.lane.b32.xlu1 %v973_v45, %s3691_s18  ;;  %v2131_v45 = vsel %vm2117_vm5, %v2098_v62, %v4943_v1  ;;  %v1043_v34 = vsel %vm6872_vm0, %v6871_v51, 0.0  ;;  %v6873_v1 = vld [vmem:[#allocation89_spill] sm:$0xff]  ;;  %vm6883_vm0 = vcmp.gt.f32.partialorder %v3911_v36, 0.5 }
 0x206   : > { %v5132_v40 = vpop.permute.xlu2 %1701  ;;  %v2700_v36 = vld [vmem:[#allocation2 + $0x11] sm:$0xff] }
 0x207   : > { %1737 = vrot.lane.b32.xlu0 %v1007_v15, %s3692_s19  ;;  %v5137_v24 = vpop.permute.xlu1 %1591  ;;  %v1030_v15 = vsel %vm530_vm10, %v3536_v42, 0.0  ;;  %v6874_v42 = vld [vmem:[#allocation132_spill] sm:$0xff]  ;;  %vm6876_vm10 = vmmov %vm6869_vm6 }
 0x208   : > { %6863 = vst [vmem:[#allocation104_spill] sm:$0xff] %v5137_v24  ;;  %v2033_v24 = vsel %vm6869_vm6, %v737_v38, %v6868_v59  ;;  %vm2249_vm6 = vcmask 261120  }
 0x209   : > { %v1596_v47 = vpop.permute.xlu0 %1595  ;;  %v2066_v62 = vsel %vm2051_vm4, %v2033_v24, %v6873_v1  ;;  %v6875_v24 = vld [vmem:[#allocation12_spill] sm:$0xff]  ;;  %v6879_v1 = vld [vmem:[#allocation53_spill] sm:$0xff] }
 0x20a   : > { %v5147_v11 = vsel %vm2150_vm7, %v2131_v45, %v1596_v47  ;;  %v723_v45 = vsel %vm491_vm14, %v627_v35, 0.0  ;;  %v2099_v47 = vsel %vm2084_vm15, %v2066_v62, %v6874_v42  ;;  %vm6878_vm14 = vcmp.lt.f32.partialorder %v6877_v22, 14.5  ;;  %v6880_v42 = vld [vmem:[#allocation60_spill] sm:$0xff] }
 0x20b   : > { %6867 = vst [vmem:[#allocation35_spill] sm:$0xff] %v5147_v11  ;;  %v2132_v38 = vsel %vm2117_vm5, %v2099_v47, %v4892_v61  ;;  %v974_v35 = vsel %vm6878_vm14, %v6847_v26, 0.0  ;;  %v995_v61 = vsel %vm6881_vm3, %v6880_v42, 0.0  ;;  %v6882_v47 = vld [vmem:[#allocation113_spill] sm:$0xff]  ;;  %vm6886_vm14 = vcmask 31744  }
 0x20c   : > { %1835 = vrot.lane.b32.xlu2 %v6870_v39, %s3693_s20  ;;  %vm6887_vm3 = vmmov %vm6886_vm14 }
 0x20d   : > { %1937 = vrot.lane.b32.xlu1 %v1030_v15, %s3694_s26  ;;  %v2019_v15 = vsel %vm6876_vm10, %v723_v45, %v6875_v24  ;;  %vm2282_vm10 = vcmask 293888  }
 0x20e   : > { %v5165_v11 = vpop.permute.xlu2 %1703  ;;  %v2052_v62 = vsel %vm2051_vm4, %v2019_v15, %v6879_v1  ;;  %v6884_v1 = vld [vmem:[#allocation110_spill] sm:$0xff] }
 0x20f   : > { %1963 = vrot.lane.b32.xlu0 %v1043_v34, %s3694_s26  ;;  %v1598_v59 = vpop.permute.xlu1 %1597  ;;  %v628_v34 = vld [vmem:[#allocation2 + $0x8] sm:$0xff] }
 0x210   : > { %v5171_v39 = vsel %vm2150_vm7, %v2132_v38, %v1598_v59  ;;  %v2085_v38 = vsel %vm2084_vm15, %v2052_v62, %v6882_v47  ;;  %v724_v59 = vsel %vm6883_vm0, %v628_v34, 0.0  ;;  %v6888_v47 = vld [vmem:[#allocation67_spill] sm:$0xff]  ;;  %vm6890_vm0 = vcmp.gt.f32.partialorder %v6877_v22, 0.5 }
 0x211   : > { %v1796_v51 = vpop.permute.xlu0 %1795  ;;  %v2118_v45 = vsel %vm2117_vm5, %v2085_v38, %v4864_v20 }
 0x212   : > { %v2151_v26 = vsel %vm2150_vm7, %v2118_v45, %v4987_v18  ;;  %v290_v18 = vld [vmem:[%s6525_s2] sm:$0xf]  ;;  %v6889_v45 = vld [vmem:[#allocation81_spill] sm:$0xff] }
 0x213   : > { %v2184_v24 = vsel %vm2183_vm8, %v2151_v26, %v5092_v29  ;;  %3393 = vmatpush.msk.msra.mxu1 %vm2379_vm2, %v290_v18  ;;  %3440 = vmatpush.msk.msra.mxu3 %vm2379_vm2, %v290_v18  ;;  %v6885_v29 = vld [vmem:[#allocation16_spill] sm:$0xff]  ;;  %v1008_v26 = vsel %vm6890_vm0, %v6889_v45, 0.0  ;;  %vm6896_vm2 = vmmov %vm6887_vm3  ;;  %vm6900_vm0 = vcmp.lt.f32.partialorder %v6877_v22, 14.5 }
 0x214   : > { %1611 = vrot.lane.b32.xlu2 %v974_v35, %s3691_s18  ;;  %v2217_v20 = vsel %vm2216_vm9, %v2184_v24, %v1796_v51  ;;  %v2020_v42 = vsel %vm6886_vm14, %v724_v59, %v6885_v29  ;;  %v3537_v51 = vld [vmem:[#allocation2 + $0x62] sm:$0xff]  ;;  %3394 = vmatmul.msk.f32.vlgmr.msra.gmra.mxu1 %vm6887_vm3, %v2700_v36  ;;  %v6891_v24 = vld [vmem:[#allocation98_spill] sm:$0xff]  ;;  %vm6897_vm14 = vcmp.gt.f32.partialorder %v4002_v37, 0.5  ;;  %vm6898_vm3 = vmmov %vm6896_vm2 }
 0x215   : > { %1713 = vrot.lane.b32.xlu1 %v995_v61, %s3692_s19  ;;  %v1031_v34 = vsel %vm531_vm12, %v3537_v51, 0.0  ;;  %v2053_v38 = vsel %vm2051_vm4, %v2020_v42, %v6888_v47  ;;  %vm6893_vm12 = vcmp.gt.f32.partialorder %v3932_v52, 0.5  ;;  %v996_v52 = vsel %vm6897_vm14, %v6855_v9, 0.0  ;;  %v3538_v45 = vld [vmem:[#allocation2 + $0xca] sm:$0xff]  ;;  %vm6906_vm14 = vmmov %vm6898_vm3 }
 0x216   : > { %v5195_v15 = vpop.permute.xlu2 %1729 }
 0x217   : > { %1811 = vrot.lane.b32.xlu0 %v6884_v1, %s3693_s20  ;;  %v1924_v35 = vpop.permute.xlu1 %1923 }
 0x218   : > { %v2250_v62 = vsel %vm2249_vm6, %v2217_v20, %v1924_v35  ;;  %v2086_v20 = vsel %vm2084_vm15, %v2053_v38, %v6891_v24  ;;  %v6892_v35 = vld [vmem:[#allocation51_spill] sm:$0xff]  ;;  %v6901_v24 = vld [vmem:[#allocation114_spill] sm:$0xff] }
 0x219   : > { %v1798_v61 = vpop.permute.xlu0 %1797  ;;  %3361 = vmatmul.msk.f32.vlgmr.msra.gmra.mxu0 %vm2282_vm10, %v2250_v62  ;;  %v2119_v59 = vsel %vm2117_vm5, %v2086_v20, %v4880_v55  ;;  %v725_v18 = vsel %vm6893_vm12, %v6892_v35, 0.0  ;;  %v6894_v55 = vld [vmem:[#allocation127_spill] sm:$0xff]  ;;  %v6902_v35 = vld [vmem:[#allocation25_spill] sm:$0xff] }
 0x21a   : > { %v2152_v1 = vsel %vm2150_vm7, %v2119_v59, %v5050_v30  ;;  %v2701_v30 = vld [vmem:[#allocation2 + $0x19] sm:$0xff]  ;;  %vm6903_vm12 = vcmp.lt.f32.partialorder %v6902_v35, 14.5 }
 0x21b   : > { %v2185_v62 = vsel %vm2183_vm8, %v2152_v1, %v5111_v28  ;;  %v6899_v28 = vld [vmem:[#allocation70_spill] sm:$0xff]  ;;  %v3539_v1 = vld [vmem:[#allocation2 + $0xc2] sm:$0xff] }
 0x21c   : > { %1939 = vrot.lane.b32.xlu2 %v1031_v34, %s3694_s26  ;;  %v2218_v29 = vsel %vm2216_vm9, %v2185_v62, %v1798_v61  ;;  %v6895_v34 = vld [vmem:[#allocation15_spill] sm:$0xff]  ;;  %3395 = vmatmul.msk.f32.gmra.mxu1 %vm6898_vm3, %v2701_v30  ;;  %v975_v9 = vsel %vm6903_vm12, %v3539_v1, 0.0  ;;  %vm6908_vm3 = vcmp.gt.f32.partialorder %v4109_v56, 0.5 }
 0x21d   : > { %1739 = vrot.lane.b32.xlu1 %v1008_v26, %s3692_s19  ;;  %v2021_v47 = vsel %vm6896_vm2, %v725_v18, %v6895_v34  ;;  %v1044_v26 = vsel %vm6900_vm0, %v3538_v45, 0.0  ;;  %v6904_v34 = vld [vmem:[#allocation85_spill] sm:$0xff]  ;;  %vm6905_vm2 = vcmp.gt.f32.partialorder %v6902_v35, 0.5  ;;  %vm6911_vm0 = vmmov %vm6906_vm14  ;;  %v6912_v56 = vld [vmem:[#allocation91_spill] sm:$0xff] }
 0x21e   : > { %v5230_v36 = vpop.permute.xlu2 %1955  ;;  %v2054_v61 = vsel %vm2051_vm4, %v2021_v47, %v6899_v28  ;;  %v6909_v28 = vld [vmem:[#allocation109_spill] sm:$0xff] }
 0x21f   : > { %1837 = vrot.lane.b32.xlu0 %v6894_v55, %s3693_s20  ;;  %v1926_v42 = vpop.permute.xlu1 %1925  ;;  %v2087_v20 = vsel %vm2084_vm15, %v2054_v61, %v6901_v24 }
 0x220   : > { %v2251_v51 = vsel %vm2249_vm6, %v2218_v29, %v1926_v42  ;;  %v2120_v59 = vsel %vm2117_vm5, %v2087_v20, %v4823_v17  ;;  %v2702_v42 = vld [vmem:[#allocation2 + $0x21] sm:$0xff] }
 0x221   : > { %v1800_v38 = vpop.permute.xlu0 %1799  ;;  %3362 = vmatmul.msk.f32.gmra.mxu0 %vm2282_vm10, %v2251_v51  ;;  %v2153_v18 = vsel %vm2150_vm7, %v2120_v59, %v5066_v23  ;;  %v1009_v23 = vsel %vm6905_vm2, %v6904_v34, 0.0  ;;  %v6910_v20 = vld [vmem:[#allocation47_spill] sm:$0xff]  ;;  %vm6916_vm2 = vcmp.gt.f32.partialorder %v4015_v46, 0.5 }
 0x222   : > { %v2186_v62 = vsel %vm2183_vm8, %v2153_v18, %v5132_v40  ;;  %v3540_v40 = vld [vmem:[#allocation2 + $0x6a] sm:$0xff] }
 0x223   : > { %v2219_v55 = vsel %vm2216_vm9, %v2186_v62, %v1800_v38  ;;  %v1032_v47 = vsel %vm532_vm11, %v3540_v40, 0.0  ;;  %v6907_v38 = vld [vmem:[#allocation68_spill] sm:$0xff]  ;;  %vm6913_vm11 = vmmov %vm6903_vm12  ;;  %v6917_v40 = vld [vmem:[#allocation130_spill] sm:$0xff] }
 0x224   : > { %1715 = vrot.lane.b32.xlu2 %v996_v52, %s3692_s19  ;;  %3396 = vmatmul.msk.f32.gmra.mxu1 %vm6906_vm14, %v2702_v42  ;;  %v739_v52 = vsel %vm6908_vm3, %v6907_v38, 0.0  ;;  %vm6914_vm12 = vmmov %vm6911_vm0 }
 0x225   : > { %1965 = vrot.lane.b32.xlu1 %v1044_v26, %s3694_s26  ;;  %v2187_v26 = vsel %vm2183_vm8, %v5015_v63, %v5165_v11  ;;  %v2035_v59 = vsel %vm6911_vm0, %v739_v52, %v6910_v20  ;;  %v6915_v63 = vld [vmem:[#allocation120_spill] sm:$0xff]  ;;  %vm6918_vm14 = vmmov %vm6911_vm0  ;;  %v3542_v20 = vld [vmem:[#allocation2 + $0x20] sm:$0xff]  ;;  %vm6921_vm0 = vcmp.gt.f32.partialorder %v3941_v60, 0.5 }
 0x226   : > { %v5259_v29 = vpop.permute.xlu2 %1803  ;;  %v2068_v18 = vsel %vm2051_vm4, %v2035_v59, %v6912_v56  ;;  %v727_v59 = vsel %vm6921_vm0, %v3542_v20, 0.0  ;;  %v6924_v56 = vld [vmem:[#allocation84_spill] sm:$0xff]  ;;  %v6927_v60 = vld [vmem:[#allocation26_spill] sm:$0xff] }
 0x227   : > { %1613 = vrot.lane.b32.xlu0 %v975_v9, %s3691_s18  ;;  %v1928_v17 = vpop.permute.xlu1 %1927  ;;  %v2703_v9 = vld [vmem:[#allocation2 + $0x29] sm:$0xff]  ;;  %v2101_v11 = vsel %vm2084_vm15, %v2068_v18, %v6915_v63  ;;  %v2705_v63 = vld [vmem:[#allocation2 + $0x39] sm:$0xff] }
 0x228   : > { %v2252_v51 = vsel %vm2249_vm6, %v2219_v55, %v1928_v17  ;;  %v5288_v55 = vld [vmem:[#allocation2 + $0xd2] sm:$0xff] }
 0x229   : > { %v1602_v30 = vpop.permute.xlu0 %1601  ;;  %3363 = vmatmul.msk.f32.gmra.mxu0 %vm2282_vm10, %v2252_v51  ;;  %v1045_v17 = vsel %vm6913_vm11, %v5288_v55, 0.0  ;;  %v2134_v51 = vsel %vm2117_vm5, %v2101_v11, %v4958_v54  ;;  %v2717_v11 = vld [vmem:[#allocation2 + $0x99] sm:$0xff] }
 0x22a   : > { %v2167_v34 = vsel %vm2150_vm7, %v2134_v51, %v1602_v30  ;;  %v2704_v30 = vld [vmem:[#allocation2 + $0x31] sm:$0xff] }
 0x22b   : > { %v2200_v54 = vsel %vm2183_vm8, %v2167_v34, %v5195_v15  ;;  %v6922_v15 = vld [vmem:[#allocation71_spill] sm:$0xff]  ;;  %v6930_v34 = vld [vmem:[#allocation93_spill] sm:$0xff] }
 0x22c   : > { %1741 = vrot.lane.b32.xlu2 %v1009_v23, %s3692_s19  ;;  %3397 = vmatmul.msk.f32.gmra.mxu1 %vm6914_vm12, %v2703_v9  ;;  %v997_v23 = vsel %vm6916_vm2, %v6865_v4, 0.0  ;;  %v6919_v4 = vld [vmem:[#allocation30_spill] sm:$0xff]  ;;  %v6923_v9 = vld [vmem:[#allocation112_spill] sm:$0xff]  ;;  %vm6928_vm2 = vmmov %vm6914_vm12 }
 0x22d   : > { %1813 = vrot.lane.b32.xlu1 %v6909_v28, %s3693_s20  ;;  %vm6920_vm3 = vcmp.lt.f32.partialorder %v6919_v4, 14.5  ;;  %vm6925_vm11 = vcmp.gt.f32.partialorder %v6919_v4, 0.5  ;;  %v3543_v20 = vld [vmem:[#allocation2 + $0x72] sm:$0xff] }
 0x22e   : > { %v5277_v61 = vpop.permute.xlu2 %1829 }
 0x22f   : > { %1941 = vrot.lane.b32.xlu0 %v1032_v47, %s3694_s26  ;;  %v1802_v24 = vpop.permute.xlu1 %1801 }
 0x230   : > { %v2220_v1 = vsel %vm2216_vm9, %v2187_v26, %v1802_v24  ;;  %v976_v24 = vsel %vm6920_vm3, %v3538_v45, 0.0  ;;  %v6926_v45 = vld [vmem:[#allocation9_spill] sm:$0xff] }
 0x231   : > { %v1930_v62 = vpop.permute.xlu0 %1929 }
 0x232   : > { %v2253_v42 = vsel %vm2249_vm6, %v2220_v1, %v1930_v62  ;;  %v740_v1 = vsel %vm508_vm1, %v6922_v15, 0.0  ;;  %v2023_v62 = vsel %vm6914_vm12, %v727_v59, %v6926_v45  ;;  %vm6931_vm1 = vmmov %vm6928_vm2  ;;  %v1033_v59 = vsel %vm533_vm13, %v3543_v20, 0.0  ;;  %v6945_v20 = vld [vmem:[#allocation116_spill] sm:$0xff] }
 0x233   : > { %3364 = vmatmul.msk.f32.gmra.mxu0 %vm2282_vm10, %v2253_v42  ;;  %v6929_v42 = vld [vmem:[#allocation72_spill] sm:$0xff]  ;;  %3411 = vmatmul.msk.f32.vlgmr.msra.gmra.mxu3 %vm6931_vm1, %v2717_v11  ;;  %vm6936_vm13 = vcmp.gt.f32.partialorder %v3965_v14, 0.5  ;;  %v3546_v14 = vld [vmem:[#allocation2 + $0x78] sm:$0xff]  ;;  %vm6940_vm12 = vcmp.gt.f32.partialorder %v4052_v8, 0.5 }
 0x234   : > { %1967 = vrot.lane.b32.xlu2 %v1045_v17, %s3694_s26  ;;  %3398 = vmatmul.msk.f32.gmra.mxu1 %vm6918_vm14, %v2704_v30  ;;  %v2036_v17 = vsel %vm6928_vm2, %v740_v1, %v6927_v60  ;;  %v2056_v51 = vsel %vm2051_vm4, %v2023_v62, %v6929_v42  ;;  %vm6934_vm14 = vmmov %vm6931_vm1  ;;  %v3545_v62 = vld [vmem:[#allocation2 + $0x28] sm:$0xff] }
 0x235   : > { %1839 = vrot.lane.b32.xlu1 %v6917_v40, %s3693_s20  ;;  %v6932_v40 = vld [vmem:[#allocation101_spill] sm:$0xff]  ;;  %v728_v60 = vsel %vm6936_vm13, %v3545_v62, 0.0  ;;  %vm6941_vm2 = vmmov %vm6931_vm1 }
 0x236   : > { %v5307_v47 = vpop.permute.xlu2 %1605  ;;  %v5413_v62 = vld [vmem:[#allocation2 + $0x90] sm:$0xff] }
 0x237   : > { %1717 = vrot.lane.b32.xlu0 %v997_v23, %s3692_s19  ;;  %v1828_v38 = vpop.permute.xlu1 %1827  ;;  %v2069_v23 = vsel %vm2051_vm4, %v2036_v17, %v6930_v34 }
 0x238   : > { %v2233_v52 = vsel %vm2216_vm9, %v2200_v54, %v1828_v38  ;;  %v2089_v54 = vsel %vm2084_vm15, %v2056_v51, %v6932_v40  ;;  %v6933_v38 = vld [vmem:[#allocation138_spill] sm:$0xff]  ;;  %v6937_v51 = vld [vmem:[#allocation29_spill] sm:$0xff] }
 0x239   : > { %v1706_v28 = vpop.permute.xlu0 %1705  ;;  %v2266_v26 = vsel %vm2249_vm6, %v2233_v52, %v5230_v36  ;;  %v1010_v36 = vsel %vm6925_vm11, %v6924_v56, 0.0  ;;  %v2102_v52 = vsel %vm2084_vm15, %v2069_v23, %v6933_v38  ;;  %v6935_v56 = vld [vmem:[#allocation134_spill] sm:$0xff]  ;;  %vm6938_vm0 = vcmp.lt.f32.partialorder %v6937_v51, 14.5  ;;  %vm6939_vm11 = vmmov %vm6931_vm1 }
 0x23a   : > { %3377 = vmatmul.msk.f32.vlgmr.msra.gmra.mxu2 %vm2282_vm10, %v2266_v26  ;;  %v2122_v26 = vsel %vm2117_vm5, %v2089_v54, %v4896_v2  ;;  %v977_v34 = vsel %vm6938_vm0, %v5288_v55, 0.0  ;;  %v998_v23 = vsel %vm6940_vm12, %v3546_v14, 0.0  ;;  %v6942_v40 = vld [vmem:[#allocation10_spill] sm:$0xff]  ;;  %v6944_v55 = vld [vmem:[#allocation119_spill] sm:$0xff]  ;;  %vm6949_vm13 = vcmp.gt.f32.partialorder %v6937_v51, 0.5  ;;  %vm6950_vm0 = vmmov %vm6931_vm1 }
 0x23b   : > { %v2155_v15 = vsel %vm2150_vm7, %v2122_v26, %v5073_v44  ;;  %v2024_v54 = vsel %vm6931_vm1, %v728_v60, %v6942_v40  ;;  %vm6953_vm12 = vmmov %vm6950_vm0  ;;  %v6956_v14 = vld [vmem:[#allocation141_spill] sm:$0xff] }
 0x23c   : > { %1815 = vrot.lane.b32.xlu2 %v6923_v9, %s3693_s20  ;;  %3399 = vmatmul.msk.f32.gmra.mxu1 %vm6934_vm14, %v2705_v63  ;;  %v2188_v9 = vsel %vm2183_vm8, %v2155_v15, %v1706_v28  ;;  %v2718_v63 = vld [vmem:[#allocation2 + $0xa1] sm:$0xff]  ;;  %vm6946_vm14 = vcmp.lt.f32.partialorder %v4052_v8, 14.5 }
 0x23d   : > { %1615 = vrot.lane.b32.xlu1 %v976_v24, %s3691_s18  ;;  %v2135_v24 = vsel %vm2117_vm5, %v2102_v52, %v4907_v16  ;;  %v2221_v28 = vsel %vm2216_vm9, %v2188_v9, %v5259_v29  ;;  %3412 = vmatmul.msk.f32.gmra.mxu3 %vm6941_vm2, %v2718_v63  ;;  %v2719_v9 = vld [vmem:[#allocation2 + $0xa9] sm:$0xff]  ;;  %vm6957_vm2 = vcmp.gt.f32.partialorder %v4046_v3, 0.5 }
 0x23e   : > { %v5330_v18 = vpop.permute.xlu2 %1933 }
 0x23f   : > { %1743 = vrot.lane.b32.xlu0 %v1010_v36, %s3692_s19  ;;  %v1604_v57 = vpop.permute.xlu1 %1603  ;;  %v5359_v36 = vld [vmem:[#allocation2 + $0xda] sm:$0xff] }
 0x240   : > { %v2168_v1 = vsel %vm2150_vm7, %v2135_v24, %v1604_v57  ;;  %v1046_v2 = vsel %vm6920_vm3, %v5359_v36, 0.0  ;;  %v2706_v57 = vld [vmem:[#allocation2 + $0x41] sm:$0xff]  ;;  %vm6947_vm3 = vmmov %vm6931_vm1 }
 0x241   : > { %v1732_v30 = vpop.permute.xlu0 %1731  ;;  %vm6958_vm1 = vmmov %vm6950_vm0 }
 0x242   : > { %v2201_v16 = vsel %vm2183_vm8, %v2168_v1, %v1732_v30  ;;  %v2707_v1 = vld [vmem:[#allocation2 + $0x49] sm:$0xff] }
 0x243   : > { %v2234_v42 = vsel %vm2216_vm9, %v2201_v16, %v5277_v61  ;;  %v6943_v61 = vld [vmem:[#allocation74_spill] sm:$0xff] }
 0x244   : > { %1841 = vrot.lane.b32.xlu2 %v6935_v56, %s3693_s20  ;;  %3400 = vmatmul.msk.f32.gmra.mxu1 %vm6939_vm11, %v2706_v57  ;;  %v2057_v38 = vsel %vm2051_vm4, %v2024_v54, %v6943_v61  ;;  %vm6951_vm11 = vcmp.gt.f32.partialorder %v4144_v31, 0.5  ;;  %v6952_v57 = vld [vmem:[#allocation48_spill] sm:$0xff]  ;;  %v2708_v31 = vld [vmem:[#allocation2 + $0x51] sm:$0xff]  ;;  %v3549_v54 = vld [vmem:[#allocation2 + $0x80] sm:$0xff] }
 0x245   : > { %1943 = vrot.lane.b32.xlu1 %v1033_v59, %s3694_s26  ;;  %v2090_v52 = vsel %vm2084_vm15, %v2057_v38, %v6944_v55  ;;  %3413 = vmatmul.msk.f32.gmra.mxu3 %vm6950_vm0, %v2719_v9  ;;  %v741_v60 = vsel %vm6951_vm11, %v5413_v62, 0.0  ;;  %v999_v61 = vsel %vm6957_vm2, %v3549_v54, 0.0  ;;  %v5436_v55 = vld [vmem:[#allocation2 + $0xe2] sm:$0xff]  ;;  %vm6968_vm2 = vmmov %vm6958_vm1 }
 0x246   : > { %v5366_v45 = vpop.permute.xlu2 %1709  ;;  %v2123_v30 = vsel %vm2117_vm5, %v2090_v52, %v4841_v33  ;;  %v2037_v63 = vsel %vm6953_vm12, %v741_v60, %v6952_v57  ;;  %vm6966_vm12 = vmmov %vm6958_vm1  ;;  %v6970_v57 = vld [vmem:[#allocation121_spill] sm:$0xff] }
 0x247   : > { %1969 = vrot.lane.b32.xlu0 %v1046_v2, %s3694_s26  ;;  %v1932_v44 = vpop.permute.xlu1 %1931  ;;  %v2156_v24 = vsel %vm2150_vm7, %v2123_v30, %v5095_v48  ;;  %v3547_v2 = vld [vmem:[#allocation2 + $0x7a] sm:$0xff] }
 0x248   : > { %v2254_v17 = vsel %vm2249_vm6, %v2221_v28, %v1932_v44  ;;  %v1034_v16 = vsel %vm6946_vm14, %v3547_v2, 0.0  ;;  %v6948_v44 = vld [vmem:[#allocation87_spill] sm:$0xff]  ;;  %vm6959_vm14 = vcmp.lt.f32.partialorder %v6937_v51, 14.5 }
 0x249   : > { %v1958_v11 = vpop.permute.xlu0 %1957  ;;  %3365 = vmatmul.msk.f32.gmra.mxu0 %vm2282_vm10, %v2254_v17  ;;  %v1011_v48 = vsel %vm6949_vm13, %v6948_v44, 0.0  ;;  %v1047_v52 = vsel %vm6959_vm14, %v5436_v55, 0.0  ;;  %v2721_v2 = vld [vmem:[#allocation2 + $0xb9] sm:$0xff]  ;;  %vm6971_vm14 = vcmp.lt.f32.partialorder %v4046_v3, 14.5 }
 0x24a   : > { %v2267_v29 = vsel %vm2249_vm6, %v2234_v42, %v1958_v11  ;;  %v6954_v11 = vld [vmem:[#allocation133_spill] sm:$0xff]  ;;  %v6955_v42 = vld [vmem:[#allocation76_spill] sm:$0xff] }
 0x24b   : > { %3378 = vmatmul.msk.f32.gmra.mxu2 %vm2282_vm10, %v2267_v29  ;;  %v2720_v29 = vld [vmem:[#allocation2 + $0xb1] sm:$0xff] }
 0x24c   : > { %1617 = vrot.lane.b32.xlu2 %v977_v34, %s3691_s18  ;;  %3401 = vmatmul.msk.f32.gmra.mxu1 %vm6947_vm3, %v2707_v1  ;;  %v2070_v34 = vsel %vm2051_vm4, %v2037_v63, %v6955_v42  ;;  %vm6960_vm3 = vmmov %vm6950_vm0  ;;  %vm6963_vm0 = vcmp.gt.f32.partialorder %v3955_v6, 0.5  ;;  %v6967_v6 = vld [vmem:[#allocation20_spill] sm:$0xff]  ;;  %v5472_v42 = vld [vmem:[#allocation2 + $0x98] sm:$0xff] }
 0x24d   : > { %1719 = vrot.lane.b32.xlu1 %v998_v23, %s3692_s19  ;;  %v2103_v23 = vsel %vm2084_vm15, %v2070_v34, %v6956_v14  ;;  %3414 = vmatmul.msk.f32.gmra.mxu3 %vm6960_vm3, %v2720_v29  ;;  %vm6972_vm3 = vcmp.gt.f32.partialorder %v4167_v0, 0.5  ;;  %v6973_v29 = vld [vmem:[#allocation115_spill] sm:$0xff] }
 0x24e   : > { %v5396_v26 = vpop.permute.xlu2 %1735  ;;  %v2136_v38 = vsel %vm2117_vm5, %v2103_v23, %v4960_v58  ;;  %v742_v34 = vsel %vm6972_vm3, %v5472_v42, 0.0  ;;  %vm6985_vm3 = vmmov %vm6958_vm1 }
 0x24f   : > { %1817 = vrot.lane.b32.xlu0 %v6945_v20, %s3693_s20  ;;  %v1708_v59 = vpop.permute.xlu1 %1707  ;;  %v2169_v30 = vsel %vm2150_vm7, %v2136_v38, %v5307_v47  ;;  %v6961_v20 = vld [vmem:[#allocation31_spill] sm:$0xff] }
 0x250   : > { %v2189_v15 = vsel %vm2183_vm8, %v2156_v24, %v1708_v59  ;;  %vm6962_vm13 = vcmp.lt.f32.partialorder %v6961_v20, 14.5  ;;  %vm6965_vm11 = vcmp.gt.f32.partialorder %v6961_v20, 0.5 }
 0x251   : > { %v1806_v56 = vpop.permute.xlu0 %1805  ;;  %v978_v59 = vsel %vm6962_vm13, %v5359_v36, 0.0  ;;  %v6964_v36 = vld [vmem:[#allocation90_spill] sm:$0xff]  ;;  %vm6975_vm13 = vmmov %vm6958_vm1 }
 0x252   : > { %v2222_v33 = vsel %vm2216_vm9, %v2189_v15, %v1806_v56  ;;  %v3551_v15 = vld [vmem:[#allocation2 + $0x30] sm:$0xff]  ;;  %v2709_v56 = vld [vmem:[#allocation2 + $0x59] sm:$0xff]  ;;  %v1012_v44 = vsel %vm6965_vm11, %v6964_v36, 0.0  ;;  %vm6978_vm11 = vmmov %vm6958_vm1 }
 0x253   : > { %v2255_v28 = vsel %vm2249_vm6, %v2222_v33, %v5330_v18  ;;  %v729_v1 = vsel %vm6963_vm0, %v3551_v15, 0.0  ;;  %vm6977_vm0 = vcmp.lt.f32.partialorder %v6961_v20, 14.5  ;;  %v6979_v15 = vld [vmem:[#allocation123_spill] sm:$0xff]  ;;  %v6982_v36 = vld [vmem:[#allocation136_spill] sm:$0xff] }
 0x254   : > { %3366 = vmatmul.msk.f32.gmra.mxu0 %vm2282_vm10, %v2255_v28  ;;  %1945 = vrot.lane.b32.xlu2 %v1034_v16, %s3694_s26  ;;  %v6969_v28 = vld [vmem:[#allocation58_spill] sm:$0xff] }
 0x255   : > { %1745 = vrot.lane.b32.xlu1 %v1011_v48, %s3692_s19  ;;  %3402 = vmatmul.msk.f32.gmra.mxu1 %vm6958_vm1, %v2708_v31  ;;  %v2025_v48 = vsel %vm6968_vm2, %v729_v1, %v6967_v6  ;;  %vm6981_vm2 = vcmp.gt.f32.partialorder %v4059_v12, 0.5 }
 0x256   : > { %v5421_v17 = vpop.permute.xlu2 %1961  ;;  %3415 = vmatmul.msk.f32.gmra.mxu3 %vm6958_vm1, %v2721_v2  ;;  %v2058_v60 = vsel %vm2051_vm4, %v2025_v48, %v6969_v28  ;;  %v3555_v2 = vld [vmem:[#allocation2 + $0x88] sm:$0xff] }
 0x257   : > { %1843 = vrot.lane.b32.xlu0 %v6954_v11, %s3693_s20  ;;  %v1734_v18 = vpop.permute.xlu1 %1733  ;;  %v2091_v63 = vsel %vm2084_vm15, %v2058_v60, %v6970_v57  ;;  %v3552_v11 = vld [vmem:[#allocation2 + $0x82] sm:$0xff] }
 0x258   : > { %v2202_v24 = vsel %vm2183_vm8, %v2169_v30, %v1734_v18  ;;  %v1035_v18 = vsel %vm6971_vm14, %v3552_v11, 0.0  ;;  %v2124_v31 = vsel %vm2117_vm5, %v2091_v63, %v4898_v19  ;;  %v2710_v19 = vld [vmem:[#allocation2 + $0x61] sm:$0xff]  ;;  %v6976_v30 = vld [vmem:[#allocation94_spill] sm:$0xff]  ;;  %v2723_v28 = vld [vmem:[#allocation2 + $0xc9] sm:$0xff] }
 0x259   : > { %v1832_v40 = vpop.permute.xlu0 %1831  ;;  %v2157_v14 = vsel %vm2150_vm7, %v2124_v31, %v5029_v49  ;;  %v5493_v49 = vld [vmem:[#allocation2 + $0xea] sm:$0xff]  ;;  %v6983_v63 = vld [vmem:[#allocation38_spill] sm:$0xff] }
 0x25a   : > { %v2235_v9 = vsel %vm2216_vm9, %v2202_v24, %v1832_v40  ;;  %v2190_v40 = vsel %vm2183_vm8, %v2157_v14, %v5366_v45  ;;  %v1048_v45 = vsel %vm6977_vm0, %v5493_v49, 0.0  ;;  %vm6984_vm14 = vcmp.lt.f32.partialorder %v6983_v63, 14.5 }
 0x25b   : > { %v979_v11 = vsel %vm6984_vm14, %v5436_v55, 0.0  ;;  %vm6987_vm0 = vcmp.gt.f32.partialorder %v6853_v10, 0.5  ;;  %vm6998_vm14 = vcmp.lt.f32.partialorder %v4059_v12, 14.5 }
 0x25c   : > { %1721 = vrot.lane.b32.xlu2 %v999_v61, %s3692_s19  ;;  %v6974_v61 = vld [vmem:[#allocation50_spill] sm:$0xff] }
 0x25d   : > { %1971 = vrot.lane.b32.xlu1 %v1047_v52, %s3694_s26  ;;  %3403 = vmatmul.msk.f32.gmra.mxu1 %vm6966_vm12, %v2709_v56  ;;  %v2038_v0 = vsel %vm6975_vm13, %v742_v34, %v6974_v61  ;;  %v2722_v52 = vld [vmem:[#allocation2 + $0xc1] sm:$0xff]  ;;  %vm6980_vm12 = vmmov %vm6958_vm1  ;;  %vm6986_vm13 = vcmp.gt.f32.partialorder %v3976_v21, 0.5 }
 0x25e   : > { %v5450_v58 = vpop.permute.xlu2 %1809  ;;  %v2071_v24 = vsel %vm2051_vm4, %v2038_v0, %v6976_v30  ;;  %3416 = vmatmul.msk.f32.gmra.mxu3 %vm6980_vm12, %v2722_v52  ;;  %v3557_v34 = vld [vmem:[#allocation2 + $0xa0] sm:$0xff]  ;;  %vm6991_vm12 = vmmov %vm6958_vm1  ;;  %v6992_v21 = vld [vmem:[#allocation32_spill] sm:$0xff] }
 0x25f   : > { %1619 = vrot.lane.b32.xlu0 %v978_v59, %s3691_s18  ;;  %v1960_v47 = vpop.permute.xlu1 %1959  ;;  %v2104_v1 = vsel %vm2084_vm15, %v2071_v24, %v6979_v15  ;;  %v743_v31 = vsel %vm6987_vm0, %v3557_v34, 0.0  ;;  %v6994_v0 = vld [vmem:[#allocation75_spill] sm:$0xff]  ;;  %v2712_v30 = vld [vmem:[#allocation2 + $0x71] sm:$0xff]  ;;  %vm7002_vm0 = vcmp.gt.f32.partialorder %v4008_v41, 0.5 }
 0x260   : > { %v2268_v16 = vsel %vm2249_vm6, %v2235_v9, %v1960_v47  ;;  %v2137_v47 = vsel %vm2117_vm5, %v2104_v1, %v4974_v5  ;;  %v2724_v24 = vld [vmem:[#allocation2 + $0xd1] sm:$0xff] }
 0x261   : > { %v1608_v33 = vpop.permute.xlu0 %1607  ;;  %3379 = vmatmul.msk.f32.gmra.mxu2 %vm2282_vm10, %v2268_v16  ;;  %v1000_v16 = vsel %vm6981_vm2, %v3555_v2, 0.0  ;;  %vm6993_vm2 = vmmov %vm6958_vm1  ;;  %v6997_v15 = vld [vmem:[#allocation142_spill] sm:$0xff]  ;;  %v5555_v2 = vld [vmem:[#allocation2 + $0x8a] sm:$0xff] }
 0x262   : > { %v2170_v56 = vsel %vm2150_vm7, %v2137_v47, %v1608_v33  ;;  %v2711_v33 = vld [vmem:[#allocation2 + $0x69] sm:$0xff]  ;;  %v2039_v61 = vsel %vm6993_vm2, %v743_v31, %v6992_v21  ;;  %vm7006_vm2 = vcmp.gt.f32.partialorder %v4102_v50, 0.5 }
 0x263   : > { %v2203_v5 = vsel %vm2183_vm8, %v2170_v56, %v5396_v26  ;;  %v3556_v26 = vld [vmem:[#allocation2 + $0x38] sm:$0xff]  ;;  %v1001_v41 = vsel %vm7006_vm2, %v5413_v62, 0.0  ;;  %vm7017_vm2 = vmmov %vm6958_vm1 }
 0x264   : > { %1747 = vrot.lane.b32.xlu2 %v1012_v44, %s3692_s19 }
 0x265   : > { %1819 = vrot.lane.b32.xlu1 %v6973_v29, %s3693_s20  ;;  %3404 = vmatmul.msk.f32.gmra.mxu1 %vm6978_vm11, %v2710_v19  ;;  %v3558_v29 = vld [vmem:[#allocation2 + $0xf0] sm:$0xff]  ;;  %vm6989_vm11 = vcmp.gt.f32.partialorder %v6983_v63, 0.5  ;;  %v6995_v19 = vld [vmem:[#allocation96_spill] sm:$0xff] }
 0x266   : > { %v5483_v23 = vpop.permute.xlu2 %1835  ;;  %3417 = vmatmul.msk.f32.gmra.mxu3 %vm6985_vm3, %v2723_v28  ;;  %v1013_v14 = vsel %vm6989_vm11, %v3558_v29, 0.0  ;;  %v2072_v52 = vsel %vm2051_vm4, %v2039_v61, %v6995_v19  ;;  %vm6999_vm3 = vmmov %vm6958_vm1 }
 0x267   : > { %1947 = vrot.lane.b32.xlu0 %v1035_v18, %s3694_s26  ;;  %v1808_v54 = vpop.permute.xlu1 %1807  ;;  %v730_v18 = vsel %vm6986_vm13, %v3556_v26, 0.0  ;;  %v2105_v1 = vsel %vm2084_vm15, %v2072_v52, %v6997_v15  ;;  %vm7001_vm13 = vcmp.lt.f32.partialorder %v6983_v63, 14.5  ;;  %v2713_v26 = vld [vmem:[#allocation2 + $0x79] sm:$0xff]  ;;  %v2714_v52 = vld [vmem:[#allocation2 + $0x81] sm:$0xff] }
 0x268   : > { %v2223_v38 = vsel %vm2216_vm9, %v2190_v40, %v1808_v54  ;;  %v6990_v40 = vld [vmem:[#allocation27_spill] sm:$0xff]  ;;  %v2138_v56 = vsel %vm2117_vm5, %v2105_v1, %v4922_v32  ;;  %v3564_v15 = vld [vmem:[#allocation2 + $0xf8] sm:$0xff] }
 0x269   : > { %v1936_v59 = vpop.permute.xlu0 %1935  ;;  %v2026_v54 = vsel %vm6991_vm12, %v730_v18, %v6990_v40  ;;  %v2725_v18 = vld [vmem:[#allocation2 + $0xd9] sm:$0xff]  ;;  %vm7005_vm12 = vmmov %vm6958_vm1 }
 0x26a   : > { %v2256_v9 = vsel %vm2249_vm6, %v2223_v38, %v1936_v59  ;;  %v2059_v38 = vsel %vm2051_vm4, %v2026_v54, %v6994_v0  ;;  %v6996_v59 = vld [vmem:[#allocation105_spill] sm:$0xff] }
 0x26b   : > { %3367 = vmatmul.msk.f32.gmra.mxu0 %vm2282_vm10, %v2256_v9  ;;  %v3562_v0 = vld [vmem:[#allocation2 + $0x91] sm:$0xff] }
 0x26c   : > { %1973 = vrot.lane.b32.xlu2 %v1048_v45, %s3694_s26  ;;  %v2092_v45 = vsel %vm2084_vm15, %v2059_v38, %v6996_v59  ;;  %v3563_v59 = vld [vmem:[#allocation2 + $0x92] sm:$0xff] }
 0x26d   : > { %1845 = vrot.lane.b32.xlu1 %v6982_v36, %s3693_s20  ;;  %3405 = vmatmul.msk.f32.gmra.mxu1 %vm6958_vm1, %v2711_v33  ;;  %v2125_v47 = vsel %vm2117_vm5, %v2092_v45, %v4911_v7  ;;  %v7000_v7 = vld [vmem:[#allocation139_spill] sm:$0xff] }
 0x26e   : > { %v5512_v44 = vpop.permute.xlu2 %1611  ;;  %3418 = vmatmul.msk.f32.gmra.mxu3 %vm6999_vm3, %v2724_v24  ;;  %v2158_v36 = vsel %vm2150_vm7, %v2125_v47, %v5100_v53  ;;  %vm7011_vm3 = vcmp.lt.f32.partialorder %v4102_v50, 14.5 }
 0x26f   : > { %1723 = vrot.lane.b32.xlu0 %v1000_v16, %s3692_s19  ;;  %v1834_v6 = vpop.permute.xlu1 %1833  ;;  %v1036_v16 = vsel %vm6998_vm14, %v5555_v2, 0.0  ;;  %vm7008_vm14 = vmmov %vm6958_vm1  ;;  %v1037_v45 = vsel %vm7011_vm3, %v3563_v59, 0.0  ;;  %v3570_v59 = vld [vmem:[#allocation2 + $0x99] sm:$0xff] }
 0x270   : > { %v2236_v48 = vsel %vm2216_vm9, %v2203_v5, %v1834_v6 }
 0x271   : > { %v1712_v60 = vpop.permute.xlu0 %1711  ;;  %v2269_v57 = vsel %vm2249_vm6, %v2236_v48, %v5421_v17  ;;  %v6988_v17 = vld [vmem:[#allocation118_spill] sm:$0xff] }
 0x272   : > { %3380 = vmatmul.msk.f32.gmra.mxu2 %vm2282_vm10, %v2269_v57  ;;  %v2191_v6 = vsel %vm2183_vm8, %v2158_v36, %v1712_v60  ;;  %v5567_v48 = vld [vmem:[#allocation2 + $0xf2] sm:$0xff]  ;;  %v3561_v60 = vld [vmem:[#allocation2 + $0x40] sm:$0xff] }
 0x273   : > { %v1049_v32 = vsel %vm7001_vm13, %v5567_v48, 0.0  ;;  %v2224_v28 = vsel %vm2216_vm9, %v2191_v6, %v5450_v58  ;;  %v731_v57 = vsel %vm7002_vm0, %v3561_v60, 0.0  ;;  %vm7012_vm13 = vmmov %vm6958_vm1  ;;  %v3566_v36 = vld [vmem:[#allocation2 + $0xf9] sm:$0xff]  ;;  %v2715_v6 = vld [vmem:[#allocation2 + $0x89] sm:$0xff] }
 0x274   : > { %1821 = vrot.lane.b32.xlu2 %v6988_v17, %s3693_s20  ;;  %v7003_v17 = vld [vmem:[#allocation37_spill] sm:$0xff] }
 0x275   : > { %1621 = vrot.lane.b32.xlu1 %v979_v11, %s3691_s18  ;;  %3406 = vmatmul.msk.f32.gmra.mxu1 %vm6958_vm1, %v2712_v30  ;;  %vm7004_vm11 = vcmp.lt.f32.partialorder %v7003_v17, 14.5  ;;  %v2726_v30 = vld [vmem:[#allocation2 + $0xe1] sm:$0xff]  ;;  %vm7013_vm0 = vcmp.gt.f32.partialorder %v7003_v17, 0.5  ;;  %vm7022_vm3 = vcmp.lt.f32.partialorder %v7003_v17, 14.5 }
 0x276   : > { %v5535_v55 = vpop.permute.xlu2 %1939  ;;  %v980_v29 = vsel %vm7004_vm11, %v5493_v49, 0.0  ;;  %3419 = vmatmul.msk.f32.gmra.mxu3 %vm6958_vm1, %v2725_v18  ;;  %v7010_v49 = vld [vmem:[#allocation122_spill] sm:$0xff]  ;;  %vm7014_vm11 = vmmov %vm6958_vm1 }
 0x277   : > { %1749 = vrot.lane.b32.xlu0 %v1013_v14, %s3692_s19  ;;  %v1610_v10 = vpop.permute.xlu1 %1609  ;;  %v7007_v14 = vld [vmem:[#allocation11_spill] sm:$0xff] }
 0x278   : > { %v2171_v5 = vsel %vm2150_vm7, %v2138_v56, %v1610_v10  ;;  %v2027_v40 = vsel %vm7008_vm14, %v731_v57, %v7007_v14  ;;  %v7016_v56 = vld [vmem:[#allocation52_spill] sm:$0xff]  ;;  %vm7021_vm14 = vmmov %vm7017_vm2  ;;  %v5640_v57 = vld [vmem:[#allocation2 + $0xfa] sm:$0xff] }
 0x279   : > { %v1738_v9 = vpop.permute.xlu0 %1737 }
 0x27a   : > { %v2204_v12 = vsel %vm2183_vm8, %v2171_v5, %v1738_v9  ;;  %v3565_v9 = vld [vmem:[#allocation2 + $0xa8] sm:$0xff]  ;;  %v7018_v5 = vld [vmem:[#allocation82_spill] sm:$0xff] }
 0x27b   : > { %v2237_v31 = vsel %vm2216_vm9, %v2204_v12, %v5483_v23  ;;  %v7009_v23 = vld [vmem:[#allocation77_spill] sm:$0xff] }
 0x27c   : > { %1847 = vrot.lane.b32.xlu2 %v7000_v7, %s3693_s20  ;;  %v2060_v54 = vsel %vm2051_vm4, %v2027_v40, %v7009_v23  ;;  %v2727_v7 = vld [vmem:[#allocation2 + $0xe9] sm:$0xff] }
 0x27d   : > { %1949 = vrot.lane.b32.xlu1 %v1036_v16, %s3694_s26  ;;  %3407 = vmatmul.msk.f32.gmra.mxu1 %vm7005_vm12, %v2713_v26  ;;  %v2093_v21 = vsel %vm2084_vm15, %v2060_v54, %v7010_v49  ;;  %vm7015_vm12 = vcmp.gt.f32.partialorder %v6877_v22, 0.5  ;;  %v7027_v40 = vld [vmem:[#allocation28_spill] sm:$0xff]  ;;  %v3569_v54 = vld [vmem:[#allocation2 + $0xb0] sm:$0xff] }
 0x27e   : > { %v5574_v33 = vpop.permute.xlu2 %1715  ;;  %v2126_v62 = vsel %vm2117_vm5, %v2093_v21, %v4859_v27  ;;  %3420 = vmatmul.msk.f32.gmra.mxu3 %vm7014_vm11, %v2726_v30  ;;  %v744_v47 = vsel %vm7015_vm12, %v3565_v9, 0.0  ;;  %vm7025_vm11 = vcmp.gt.f32.partialorder %v4002_v37, 0.5  ;;  %vm7026_vm12 = vmmov %vm7017_vm2  ;;  %v7030_v21 = vld [vmem:[#allocation64_spill] sm:$0xff]  ;;  %v7035_v30 = vld [vmem:[#allocation151_spill] sm:$0xff] }
 0x27f   : > { %1975 = vrot.lane.b32.xlu0 %v1049_v32, %s3694_s26  ;;  %v1938_v53 = vpop.permute.xlu1 %1937  ;;  %v2159_v10 = vsel %vm2150_vm7, %v2126_v62, %v5114_v43  ;;  %v1014_v43 = vsel %vm7013_vm0, %v3564_v15, 0.0  ;;  %v2040_v16 = vsel %vm7017_vm2, %v744_v47, %v7016_v56  ;;  %v7039_v15 = vld [vmem:[#allocation160_spill] sm:$0xff]  ;;  %v7040_v9 = vld [vmem:[#allocation97_spill] sm:$0xff] }
 0x280   : > { %v2257_v11 = vsel %vm2249_vm6, %v2224_v28, %v1938_v53  ;;  %v2073_v22 = vsel %vm2051_vm4, %v2040_v16, %v7018_v5  ;;  %v7019_v53 = vld [vmem:[#allocation13_spill] sm:$0xff] }
 0x281   : > { %v1964_v34 = vpop.permute.xlu0 %1963  ;;  %3368 = vmatmul.msk.f32.gmra.mxu0 %vm2282_vm10, %v2257_v11  ;;  %v2106_v32 = vsel %vm2084_vm15, %v2073_v22, %v4809_v25  ;;  %vm7020_vm1 = vcmp.lt.f32.partialorder %v7019_v53, 14.5  ;;  %v1050_v11 = vsel %vm7022_vm3, %v5640_v57, 0.0  ;;  %vm7024_vm0 = vcmp.gt.f32.partialorder %v7019_v53, 0.5 }
 0x282   : > { %v2270_v58 = vsel %vm2249_vm6, %v2237_v31, %v1964_v34  ;;  %v968_v28 = vsel %vm7020_vm1, %v5555_v2, 0.0  ;;  %v2139_v60 = vsel %vm2117_vm5, %v2106_v32, %v4976_v13  ;;  %v1002_v13 = vsel %vm7024_vm0, %v5472_v42, 0.0  ;;  %vm7028_vm1 = vmmov %vm7017_vm2 }
 0x283   : > { %3381 = vmatmul.msk.f32.gmra.mxu2 %vm2282_vm10, %v2270_v58  ;;  %v2172_v25 = vsel %vm2150_vm7, %v2139_v60, %v5512_v44  ;;  %v3568_v44 = vld [vmem:[#allocation2 + $0x48] sm:$0xff]  ;;  %v2716_v58 = vld [vmem:[#allocation2 + $0x91] sm:$0xff] }
 0x284   : > { %1623 = vrot.lane.b32.xlu2 %v980_v29, %s3691_s18  ;;  %v732_v2 = vsel %vm7025_vm11, %v3568_v44, 0.0  ;;  %vm7038_vm11 = vmmov %vm7028_vm1 }
 0x285   : > { %1725 = vrot.lane.b32.xlu1 %v1001_v41, %s3692_s19  ;;  %3408 = vmatmul.msk.f32.gmra.mxu1 %vm7012_vm13, %v2714_v52  ;;  %vm7023_vm13 = vmmov %vm7017_vm2  ;;  %v2728_v41 = vld [vmem:[#allocation2 + $0xf1] sm:$0xff]  ;;  %v2028_v37 = vsel %vm7017_vm2, %v732_v2, %v7027_v40 }
 0x286   : > { %v5605_v61 = vpop.permute.xlu2 %1741  ;;  %3421 = vmatmul.msk.f32.gmra.mxu3 %vm7023_vm13, %v2727_v7  ;;  %v2061_v62 = vsel %vm2051_vm4, %v2028_v37, %v7030_v21  ;;  %vm7033_vm13 = vmmov %vm7028_vm1  ;;  %v7048_v37 = vld [vmem:[#allocation21_spill] sm:$0xff] }
 0x287   : > { %1823 = vrot.lane.b32.xlu0 %v3562_v0, %s3693_s20  ;;  %v1714_v38 = vpop.permute.xlu1 %1713  ;;  %vm7042_vm2 = vmmov %vm7028_vm1 }
 0x288   : > { %v2192_v19 = vsel %vm2183_vm8, %v2159_v10, %v1714_v38  ;;  %v7031_v10 = vld [vmem:[#allocation39_spill] sm:$0xff]  ;;  %v7034_v38 = vld [vmem:[#allocation125_spill] sm:$0xff] }
 0x289   : > { %v1812_v24 = vpop.permute.xlu0 %1811  ;;  %vm7032_vm3 = vcmp.lt.f32.partialorder %v7031_v10, 14.5  ;;  %vm7036_vm0 = vcmp.gt.f32.partialorder %v7031_v10, 0.5 }
 0x28a   : > { %v2225_v27 = vsel %vm2216_vm9, %v2192_v19, %v1812_v24  ;;  %v981_v0 = vsel %vm7032_vm3, %v5567_v48, 0.0  ;;  %v2094_v19 = vsel %vm2084_vm15, %v2061_v62, %v7034_v38  ;;  %vm7045_vm3 = vmmov %vm7028_vm1  ;;  %v3573_v62 = vld [vmem:[#allocation2 + $0x101] sm:$0xff] }
 0x28b   : > { %v2258_v1 = vsel %vm2249_vm6, %v2225_v27, %v5535_v55  ;;  %v2127_v24 = vsel %vm2117_vm5, %v2094_v19, %v7035_v30  ;;  %v7037_v27 = vld [vmem:[#allocation54_spill] sm:$0xff] }
 0x28c   : > { %3369 = vmatmul.msk.f32.gmra.mxu0 %vm2282_vm10, %v2258_v1  ;;  %1951 = vrot.lane.b32.xlu2 %v1037_v45, %s3694_s26 }
 0x28d   : > { %1751 = vrot.lane.b32.xlu1 %v1014_v43, %s3692_s19  ;;  %3409 = vmatmul.msk.f32.gmra.mxu1 %vm7021_vm14, %v2715_v6  ;;  %vm7029_vm14 = vcmp.gt.f32.partialorder %v6902_v35, 0.5  ;;  %v3571_v35 = vld [vmem:[#allocation2 + $0x100] sm:$0xff]  ;;  %v2160_v43 = vsel %vm2150_vm7, %v2127_v24, %v7039_v15 }
 0x28e   : > { %v5625_v50 = vpop.permute.xlu2 %1967  ;;  %v745_v49 = vsel %vm7029_vm14, %v3569_v54, 0.0  ;;  %3422 = vmatmul.msk.f32.gmra.mxu3 %vm7033_vm13, %v2728_v41  ;;  %v1015_v45 = vsel %vm7036_vm0, %v3571_v35, 0.0  ;;  %v2193_v56 = vsel %vm2183_vm8, %v2160_v43, %v5574_v33  ;;  %vm7044_vm14 = vmmov %vm7028_vm1  ;;  %v3572_v41 = vld [vmem:[#allocation2 + $0x9a] sm:$0xff]  ;;  %vm7046_vm13 = vcmp.lt.f32.partialorder %v7019_v53, 14.5 }
 0x28f   : > { %1849 = vrot.lane.b32.xlu0 %v3566_v36, %s3693_s20  ;;  %v1740_v55 = vpop.permute.xlu1 %1739  ;;  %v2041_v48 = vsel %vm7038_vm11, %v745_v49, %v7037_v27  ;;  %vm7047_vm0 = vmmov %vm7028_vm1  ;;  %vm7049_vm11 = vcmp.lt.f32.partialorder %v7031_v10, 14.5  ;;  %v2730_v27 = vld [vmem:[#allocation2 + $0x101] sm:$0xff] }
 0x290   : > { %v2205_v26 = vsel %vm2183_vm8, %v2172_v25, %v1740_v55  ;;  %v2074_v47 = vsel %vm2051_vm4, %v2041_v48, %v7040_v9  ;;  %v2729_v25 = vld [vmem:[#allocation2 + $0xf9] sm:$0xff]  ;;  %v3574_v48 = vld [vmem:[#allocation2 + $0x50] sm:$0xff] }
 0x291   : > { %v1838_v12 = vpop.permute.xlu0 %1837  ;;  %v2848_v29 = vpop.f32.mrf.mxu1 }
 0x292   : > { %v2238_v31 = vsel %vm2216_vm9, %v2205_v26, %v1838_v12  ;;  %2944 = vst.msk [vmem:[%s5664_s15] sm:$0xff] %vm2051_vm4, %v2848_v29  ;;  %v3046_v52 = vmul.f32 %v2848_v29, %v2848_v29  ;;  %v2976_v55 = vsel %vm2051_vm4, %v2848_v29, 0.0  ;;  %v7043_v26 = vld [vmem:[#allocation129_spill] sm:$0xff] }
 0x294   : > { %1599 = vrot.lane.b32.xlu2 %v968_v28, %s3691_s18  ;;  %v3078_v32 = vsel %vm2051_vm4, %v3046_v52, 0.0 }
 0x295   : > { %1977 = vrot.lane.b32.xlu1 %v1050_v11, %s3694_s26  ;;  %3410 = vmatmul.msk.f32.gmra.mxu1 %vm7028_vm1, %v2716_v58 }
 0x296   : > { %v2400_v18 = vpop.f32.mrf.mxu0  ;;  %v5668_v34 = vpop.permute.xlu2 %1815  ;;  %3423 = vmatmul.msk.f32.gmra.mxu3 %vm7047_vm0, %v2729_v25  ;;  %v7063_v25 = vld [vmem:[#allocation99_spill] sm:$0xff] }
 0x297   : > { %2496 = vst.msk [vmem:[%s5654_s12] sm:$0xff] %vm7026_vm12, %v2400_v18  ;;  %1727 = vrot.lane.b32.xlu0 %v1002_v13, %s3692_s19  ;;  %v1966_v42 = vpop.permute.xlu1 %1965  ;;  %v2598_v1 = vmul.f32 %v2400_v18, %v2400_v18  ;;  %vm7041_vm12 = vmmov %vm7028_vm1  ;;  %v2107_v13 = vsel %vm2084_vm15, %v2074_v47, %v7043_v26  ;;  %v3575_v47 = vld [vmem:[#allocation2 + $0x108] sm:$0xff] }
 0x298   : > { %v2271_v14 = vsel %vm2249_vm6, %v2238_v31, %v1966_v42  ;;  %v2528_v5 = vsel %vm7041_vm12, %v2400_v18, 0.0  ;;  %v5722_v31 = vld [vmem:[#allocation2 + $0x102] sm:$0xff]  ;;  %v2140_v54 = vsel %vm2117_vm5, %v2107_v13, %v7048_v37  ;;  %vm7050_vm12 = vmmov %vm7047_vm0 }
 0x299   : > { %v1614_v23 = vpop.permute.xlu0 %1613  ;;  %3382 = vmatmul.msk.f32.gmra.mxu2 %vm2282_vm10, %v2271_v14  ;;  %v2851_v12 = vpop.f32.mrf.mxu1  ;;  %v2630_v44 = vsel %vm7044_vm14, %v2598_v1, 0.0  ;;  %v1038_v14 = vsel %vm7046_vm13, %v3572_v41, 0.0  ;;  %vm7053_vm14 = vmmov %vm7047_vm0  ;;  %v7064_v13 = vld [vmem:[#allocation111_spill] sm:$0xff] }
 0x29a   : > { %2945 = vst.msk [vmem:[%s5664_s15 + $0x8] sm:$0xff] %vm2051_vm4, %v2851_v12  ;;  %v2977_v60 = vsel %vm2051_vm4, %v2851_v12, 0.0  ;;  %v3047_v11 = vmul.f32 %v2851_v12, %v2851_v12  ;;  %v2173_v21 = vsel %vm2150_vm7, %v2140_v54, %v1614_v23  ;;  %v7067_v54 = vld [vmem:[#allocation43_spill] sm:$0xff] }
 0x29b   : > { %v2978_v42 = vadd.f32 %v2977_v60, %v2976_v55  ;;  %v2206_v23 = vsel %vm2183_vm8, %v2173_v21, %v5605_v61  ;;  %v7054_v61 = vld [vmem:[#allocation44_spill] sm:$0xff] }
 0x29c   : > { %1825 = vrot.lane.b32.xlu2 %v3570_v59, %s3693_s20  ;;  %v3079_v40 = vsel %vm2051_vm4, %v3047_v11, 0.0  ;;  %vm7056_vm13 = vcmp.lt.f32.partialorder %v7054_v61, 14.5  ;;  %v7062_v60 = vld [vmem:[#allocation80_spill] sm:$0xff] }
 0x29d   : > { %1625 = vrot.lane.b32.xlu1 %v981_v0, %s3691_s18  ;;  %v3080_v49 = vadd.f32 %v3079_v40, %v3078_v32  ;;  %v1051_v0 = vsel %vm7049_vm11, %v5722_v31, 0.0  ;;  %v982_v55 = vsel %vm7056_vm13, %v5640_v57, 0.0  ;;  %vm7057_vm11 = vcmp.gt.f32.partialorder %v6919_v4, 0.5  ;;  %v7058_v32 = vld [vmem:[#allocation34_spill] sm:$0xff]  ;;  %v2731_v21 = vld [vmem:[#allocation2 + $0x109] sm:$0xff] }
 0x29e   : > { %v2403_v16 = vpop.f32.mrf.mxu0  ;;  %v5705_v36 = vpop.permute.xlu2 %1841  ;;  %3424 = vmatmul.msk.f32.gmra.mxu3 %vm7047_vm0, %v2730_v27 }
 0x29f   : > { %2497 = vst.msk [vmem:[%s5654_s12 + $0x8] sm:$0xff] %vm7042_vm2, %v2403_v16  ;;  %v2529_v22 = vsel %vm7028_vm1, %v2403_v16, 0.0  ;;  %v2599_v6 = vmul.f32 %v2403_v16, %v2403_v16  ;;  %1753 = vrot.lane.b32.xlu0 %v1015_v45, %s3692_s19  ;;  %v1814_v7 = vpop.permute.xlu1 %1813  ;;  %vm7051_vm2 = vmmov %vm7047_vm0  ;;  %vm7052_vm1 = vcmp.gt.f32.partialorder %v4015_v46, 0.5 }
 0x2a0   : > { %v2530_v28 = vadd.f32 %v2529_v22, %v2528_v5  ;;  %v2226_v33 = vsel %vm2216_vm9, %v2193_v56, %v1814_v7  ;;  %v733_v15 = vsel %vm7052_vm1, %v3574_v48, 0.0  ;;  %v3576_v22 = vld [vmem:[#allocation2 + $0xb8] sm:$0xff]  ;;  %vm7068_vm1 = vcmp.lt.f32.partialorder %v7067_v54, 14.5  ;;  %v7072_v48 = vld [vmem:[#allocation79_spill] sm:$0xff] }
 0x2a1   : > { %v2631_v2 = vsel %vm7045_vm3, %v2599_v6, 0.0  ;;  %v1942_v18 = vpop.permute.xlu0 %1941  ;;  %v2854_v59 = vpop.f32.mrf.mxu1  ;;  %vm7055_vm3 = vcmp.gt.f32.partialorder %v7054_v61, 0.5 }
 0x2a2   : > { %v2632_v29 = vadd.f32 %v2631_v2, %v2630_v44  ;;  %v2259_v58 = vsel %vm2249_vm6, %v2226_v33, %v1942_v18  ;;  %2946 = vst.msk [vmem:[%s5664_s15 + $0x10] sm:$0xff] %vm2051_vm4, %v2854_v59  ;;  %v1016_v56 = vsel %vm7055_vm3, %v3575_v47, 0.0  ;;  %v2979_v46 = vsel %vm2051_vm4, %v2854_v59, 0.0  ;;  %v3577_v2 = vld [vmem:[#allocation2 + $0x109] sm:$0xff]  ;;  %vm7070_vm3 = vmmov %vm7047_vm0 }
 0x2a3   : > { %3370 = vmatmul.msk.f32.gmra.mxu0 %vm2282_vm10, %v2259_v58  ;;  %v3048_v5 = vmul.f32 %v2854_v59, %v2854_v59  ;;  %v2980_v6 = vadd.f32 %v2979_v46, %v2978_v42  ;;  %v952_v42 = vld [vmem:[#allocation2 + $0x10a] sm:$0xff] }
 0x2a4   : > { %1851 = vrot.lane.b32.xlu2 %v3573_v62, %s3693_s20  ;;  %v7065_v58 = vld [vmem:[#allocation144_spill] sm:$0xff] }
 0x2a5   : > { %1953 = vrot.lane.b32.xlu1 %v1038_v14, %s3694_s26  ;;  %v3081_v7 = vsel %vm2051_vm4, %v3048_v5, 0.0  ;;  %v7066_v14 = vld [vmem:[#allocation152_spill] sm:$0xff] }
 0x2a6   : > { %v2406_v38 = vpop.f32.mrf.mxu0  ;;  %v5738_v19 = vpop.permute.xlu2 %1617  ;;  %v3082_v57 = vadd.f32 %v3081_v7, %v3080_v49  ;;  %v983_v49 = vsel %vm7068_vm1, %v5722_v31, 0.0  ;;  %v1052_v31 = vsel %vm7056_vm13, %v952_v42, 0.0  ;;  %3425 = vmatmul.msk.f32.gmra.mxu3 %vm7047_vm0, %v2731_v21  ;;  %v3578_v7 = vld [vmem:[#allocation2 + $0x58] sm:$0xff]  ;;  %vm7083_vm13 = vmmov %vm7047_vm0  ;;  %v7084_v21 = vld [vmem:[#allocation104_spill] sm:$0xff] }
 0x2a7   : > { %2498 = vst.msk [vmem:[%s5654_s12 + $0x10] sm:$0xff] %vm7050_vm12, %v2406_v38  ;;  %v2531_v52 = vsel %vm7051_vm2, %v2406_v38, 0.0  ;;  %v2600_v30 = vmul.f32 %v2406_v38, %v2406_v38  ;;  %1979 = vrot.lane.b32.xlu0 %v1051_v0, %s3694_s26  ;;  %v1840_v24 = vpop.permute.xlu1 %1839  ;;  %vm7059_vm12 = vmmov %vm7047_vm0 }
 0x2a8   : > { %v2532_v35 = vadd.f32 %v2531_v52, %v2530_v28  ;;  %v2239_v45 = vsel %vm2216_vm9, %v2206_v23, %v1840_v24  ;;  %v2029_v12 = vsel %vm7059_vm12, %v733_v15, %v7058_v32  ;;  %v7060_v28 = vld [vmem:[#allocation40_spill] sm:$0xff]  ;;  %vm7061_vm2 = vmmov %vm7047_vm0  ;;  %v985_v52 = vld [vmem:[#allocation2 + $0x110] sm:$0xff]  ;;  %vm7074_vm12 = vcmp.gt.f32.partialorder %v7067_v54, 0.5 }
 0x2a9   : > { %v2633_v43 = vsel %vm7053_vm14, %v2600_v30, 0.0  ;;  %v1718_v1 = vpop.permute.xlu0 %1717  ;;  %v2272_v9 = vsel %vm2249_vm6, %v2239_v45, %v5625_v50  ;;  %v746_v50 = vsel %vm7057_vm11, %v3576_v22, 0.0  ;;  %v2062_v4 = vsel %vm2051_vm4, %v2029_v12, %v7062_v60  ;;  %vm7069_vm14 = vmmov %vm7047_vm0  ;;  %v7071_v24 = vld [vmem:[#allocation17_spill] sm:$0xff] }
 0x2aa   : > { %v2634_v16 = vadd.f32 %v2633_v43, %v2632_v29  ;;  %3383 = vmatmul.msk.f32.gmra.mxu2 %vm2282_vm10, %v2272_v9  ;;  %v2042_v33 = vsel %vm7061_vm2, %v746_v50, %v7060_v28  ;;  %v2095_v44 = vsel %vm2084_vm15, %v2062_v4, %v7064_v13  ;;  %v2857_v29 = vpop.f32.mrf.mxu1  ;;  %vm7073_vm11 = vmmov %vm7047_vm0  ;;  %v1021_v50 = vld [vmem:[#allocation2 + $0x112] sm:$0xff]  ;;  %vm7075_vm2 = vcmp.gt.f32.partialorder %v4052_v8, 0.5 }
 0x2ab   : > { %v2075_v26 = vsel %vm2051_vm4, %v2042_v33, %v7063_v25  ;;  %v2128_v40 = vsel %vm2117_vm5, %v2095_v44, %v7066_v14  ;;  %2947 = vst.msk [vmem:[%s5664_s15 + $0x18] sm:$0xff] %vm2051_vm4, %v2857_v29  ;;  %v2981_v30 = vsel %vm2051_vm4, %v2857_v29, 0.0  ;;  %v3049_v23 = vmul.f32 %v2857_v29, %v2857_v29  ;;  %v1019_v25 = vld [vmem:[#allocation2 + $0x111] sm:$0xff] }
 0x2ac   : > { %1755 = vrot.lane.b32.xlu2 %v1016_v56, %s3692_s19  ;;  %v2108_v41 = vsel %vm2084_vm15, %v2075_v26, %v7065_v58  ;;  %v2982_v27 = vadd.f32 %v2981_v30, %v2980_v6  ;;  %v2161_v15 = vsel %vm2150_vm7, %v2128_v40, %v7072_v48  ;;  %v734_v32 = vsel %vm7075_vm2, %v3578_v7, 0.0  ;;  %v7076_v13 = vld [vmem:[#allocation14_spill] sm:$0xff]  ;;  %v7079_v29 = vld [vmem:[#allocation45_spill] sm:$0xff]  ;;  %vm7089_vm2 = vmmov %vm7083_vm13 }
 0x2ad   : > { %1627 = vrot.lane.b32.xlu1 %v982_v55, %s3691_s18  ;;  %v2141_v59 = vsel %vm2117_vm5, %v2108_v41, %v7071_v24  ;;  %v3083_v47 = vsel %vm2051_vm4, %v3049_v23, 0.0  ;;  %v2194_v56 = vsel %vm2183_vm8, %v2161_v15, %v1718_v1  ;;  %v1017_v55 = vsel %vm7074_vm12, %v985_v52, 0.0  ;;  %v7081_v41 = vld [vmem:[#allocation126_spill] sm:$0xff] }
 0x2ae   : > { %v5773_v11 = vpop.permute.xlu2 %1945  ;;  %v3084_v46 = vadd.f32 %v3083_v47, %v3082_v57  ;;  %v2227_v1 = vsel %vm2216_vm9, %v2194_v56, %v5668_v34  ;;  %v1053_v4 = vsel %vm7068_vm1, %v1021_v50, 0.0  ;;  %v1020_v48 = vld [vmem:[#allocation2 + $0x119] sm:$0xff]  ;;  %vm7090_vm1 = vmmov %vm7089_vm2 }
 0x2af   : > { %1853 = vrot.lane.b32.xlu0 %v3577_v2, %s3693_s20  ;;  %v1616_v18 = vpop.permute.xlu1 %1615 }
 0x2b0   : > { %v2409_v37 = vpop.f32.mrf.mxu0  ;;  %v2174_v43 = vsel %vm2150_vm7, %v2141_v59, %v1616_v18  ;;  %v7078_v18 = vld [vmem:[#allocation83_spill] sm:$0xff] }
 0x2b1   : > { %2499 = vst.msk [vmem:[%s5654_s12 + $0x18] sm:$0xff] %vm7069_vm14, %v2409_v37  ;;  %v2533_v62 = vsel %vm7070_vm3, %v2409_v37, 0.0  ;;  %v2601_v0 = vmul.f32 %v2409_v37, %v2409_v37  ;;  %v1744_v38 = vpop.permute.xlu0 %1743  ;;  %vm7077_vm14 = vmmov %vm7047_vm0  ;;  %vm7080_vm3 = vcmp.lt.f32.partialorder %v7079_v29, 14.5  ;;  %v7082_v37 = vld [vmem:[#allocation150_spill] sm:$0xff]  ;;  %vm7085_vm0 = vcmp.gt.f32.partialorder %v7079_v29, 0.5 }
 0x2b2   : > { %v5795_v45 = vadd.f32 %v2533_v62, %v2532_v35  ;;  %v2207_v5 = vsel %vm2183_vm8, %v2174_v43, %v1744_v38  ;;  %v2030_v44 = vsel %vm7077_vm14, %v734_v32, %v7076_v13  ;;  %v984_v58 = vsel %vm7080_vm3, %v952_v42, 0.0  ;;  %vm7087_vm12 = vmmov %vm7080_vm3 }
 0x2b3   : > { %v2635_v9 = vsel %vm7073_vm11, %v2601_v0, 0.0  ;;  %v2240_v60 = vsel %vm2216_vm9, %v2207_v5, %v5705_v36  ;;  %v2063_v36 = vsel %vm2051_vm4, %v2030_v44, %v7078_v18  ;;  %v986_v0 = vld [vmem:[#allocation2 + $0x118] sm:$0xff]  ;;  %vm7086_vm11 = vcmp.gt.f32.partialorder %v6937_v51, 0.5  ;;  %vm7091_vm14 = vmmov %vm7090_vm1 }
 0x2b4   : > { %v5806_v35 = vadd.f32 %v2635_v9, %v2634_v16  ;;  %1629 = vrot.lane.b32.xlu2 %v983_v49, %s3691_s18  ;;  %v2860_v16 = vpop.f32.mrf.mxu1  ;;  %v2096_v14 = vsel %vm2084_vm15, %v2063_v36, %v7081_v41  ;;  %v1018_v43 = vsel %vm7085_vm0, %v986_v0, 0.0  ;;  %vm7094_vm3 = vmmov %vm7090_vm1  ;;  %v3580_v36 = vld [vmem:[#allocation2 + $0x60] sm:$0xff]  ;;  %v7102_v0 = vld [vmem:[#allocation69_spill] sm:$0xff] }
 0x2b5   : > { %1981 = vrot.lane.b32.xlu1 %v1052_v31, %s3694_s26  ;;  %2948 = vst.msk [vmem:[%s5664_s15 + $0x20] sm:$0xff] %vm2051_vm4, %v2860_v16  ;;  %v2983_v57 = vsel %vm2051_vm4, %v2860_v16, 0.0  ;;  %v3050_v28 = vmul.f32 %v2860_v16, %v2860_v16  ;;  %v2129_v49 = vsel %vm2117_vm5, %v2096_v14, %v7082_v37  ;;  %v1022_v31 = vld [vmem:[#allocation2 + $0x11a] sm:$0xff]  ;;  %vm7097_vm0 = vmmov %vm7090_vm1 }
 0x2b6   : > { %v5813_v22 = vpop.permute.xlu2 %1721  ;;  %v2984_v34 = vadd.f32 %v2983_v57, %v2982_v27  ;;  %v2162_v62 = vsel %vm2150_vm7, %v2129_v49, %v7084_v21  ;;  %v1054_v5 = vsel %vm7087_vm12, %v1022_v31, 0.0  ;;  %v5874_v50 = vpop.f32.mrf.mxu3  ;;  %v7098_v21 = vld [vmem:[#allocation36_spill] sm:$0xff]  ;;  %vm7100_vm12 = vmmov %vm7097_vm0 }
 0x2b7   : > { %1757 = vrot.lane.b32.xlu0 %v1017_v55, %s3692_s19  ;;  %v1944_v6 = vpop.permute.xlu1 %1943  ;;  %v3085_v26 = vsel %vm2051_vm4, %v3050_v28, 0.0  ;;  %v3579_v55 = vld [vmem:[#allocation2 + $0xc0] sm:$0xff]  ;;  %2961 = vst.msk [vmem:[%s5664_s15 + $0x88] sm:$0xff] %vm2051_vm4, %v5874_v50 }
 0x2b8   : > { %v2260_v12 = vsel %vm2249_vm6, %v2227_v1, %v1944_v6  ;;  %v3086_v2 = vadd.f32 %v3085_v26, %v3084_v46  ;;  %v747_v46 = vsel %vm7086_vm11, %v3579_v55, 0.0  ;;  %v7088_v6 = vld [vmem:[#allocation55_spill] sm:$0xff]  ;;  %vm7099_vm11 = vmmov %vm7097_vm0 }
 0x2b9   : > { %v1970_v33 = vpop.permute.xlu0 %1969  ;;  %3371 = vmatmul.msk.f32.gmra.mxu0 %vm2282_vm10, %v2260_v12  ;;  %v2043_v51 = vsel %vm7089_vm2, %v747_v46, %v7088_v6  ;;  %v7092_v12 = vld [vmem:[#allocation88_spill] sm:$0xff]  ;;  %vm7101_vm2 = vmmov %vm7097_vm0  ;;  %v7107_v46 = vld [vmem:[#allocation162_spill] sm:$0xff] }
 0x2ba   : > { %v2273_v8 = vsel %vm2249_vm6, %v2240_v60, %v1970_v33  ;;  %v2076_v57 = vsel %vm2051_vm4, %v2043_v51, %v7092_v12  ;;  %v7093_v33 = vld [vmem:[#allocation145_spill] sm:$0xff] }
 0x2bb   : > { %3384 = vmatmul.msk.f32.gmra.mxu2 %vm2282_vm10, %v2273_v8  ;;  %v2109_v60 = vsel %vm2084_vm15, %v2076_v57, %v7093_v33  ;;  %v7095_v8 = vld [vmem:[#allocation157_spill] sm:$0xff] }
 0x2bc   : > { %1983 = vrot.lane.b32.xlu2 %v1053_v4, %s3694_s26  ;;  %v2863_v38 = vpop.f32.mrf.mxu1 }
 0x2bd   : > { %1855 = vrot.lane.b32.xlu1 %v1019_v25, %s3693_s20  ;;  %v5842_v40 = vpop.f32.mrf.mxu2  ;;  %2949 = vst.msk [vmem:[%s5664_s15 + $0x28] sm:$0xff] %vm2051_vm4, %v2863_v38  ;;  %v2985_v23 = vsel %vm2051_vm4, %v2863_v38, 0.0  ;;  %v3051_v24 = vmul.f32 %v2863_v38, %v2863_v38  ;;  %v2142_v25 = vsel %vm2117_vm5, %v2109_v60, %v7095_v8  ;;  %v7112_v60 = vld [vmem:[#allocation19_spill] sm:$0xff] }
 0x2be   : > { %2512 = vst.msk [vmem:[%s5654_s12 + $0x80] sm:$0xff] %vm7083_vm13, %v5842_v40  ;;  %v5852_v52 = vpop.permute.xlu2 %1747  ;;  %v5858_v27 = vadd.f32 %v2985_v23, %v2984_v34  ;;  %vm7096_vm13 = vcmp.gt.f32.partialorder %v4046_v3, 0.5  ;;  %v7103_v23 = vld [vmem:[#allocation131_spill] sm:$0xff] }
 0x2bf   : > { %1631 = vrot.lane.b32.xlu0 %v984_v58, %s3691_s18  ;;  %v1720_v42 = vpop.permute.xlu1 %1719  ;;  %v3087_v9 = vsel %vm2051_vm4, %v3051_v24, 0.0  ;;  %v735_v58 = vsel %vm7096_vm13, %v3580_v36, 0.0  ;;  %vm7113_vm13 = vcmp.gt.f32.partialorder %v6983_v63, 0.5  ;;  %s3352_s18 = sshll.u32 %s6348_s10, 1 }
 0x2c0   : > { %v2195_v30 = vsel %vm2183_vm8, %v2162_v62, %v1720_v42  ;;  %v5866_v56 = vadd.f32 %v3087_v9, %v3086_v2  ;;  %v5903_v2 = vpop.f32.mrf.mxu3  ;;  %v2031_v3 = vsel %vm7099_vm11, %v735_v58, %v7098_v21  ;;  %vm7115_vm11 = vmmov %vm7097_vm0 }
 0x2c1   : > { %v1818_v59 = vpop.permute.xlu0 %1817  ;;  %2962 = vst.msk [vmem:[%s5664_s15 + $0x90] sm:$0xff] %vm2051_vm4, %v5903_v2  ;;  %v2064_v38 = vsel %vm2051_vm4, %v2031_v3, %v7102_v0 }
 0x2c2   : > { %v2228_v15 = vsel %vm2216_vm9, %v2195_v30, %v1818_v59  ;;  %v2097_v24 = vsel %vm2084_vm15, %v2064_v38, %v7103_v23  ;;  %v7117_v38 = vld [vmem:[#allocation146_spill] sm:$0xff] }
 0x2c3   : > { %v2261_v47 = vsel %vm2249_vm6, %v2228_v15, %v5773_v11 }
 0x2c4   : > { %3372 = vmatmul.msk.f32.gmra.mxu0 %vm2282_vm10, %v2261_v47  ;;  %1857 = vrot.lane.b32.xlu2 %v1020_v48, %s3693_s20  ;;  %v5886_v32 = vpop.f32.mrf.mxu1  ;;  %v3581_v48 = vld [vmem:[#allocation2 + $0xc8] sm:$0xff]  ;;  %s3428_s20 = sshll.u32 %s3751_s25, 1 }
 0x2c5   : > { %1759 = vrot.lane.b32.xlu1 %v1018_v43, %s3692_s19  ;;  %2950 = vst.msk [vmem:[%s5664_s15 + $0x30] sm:$0xff] %vm2051_vm4, %v5886_v32  ;;  %v7106_v43 = vld [vmem:[#allocation153_spill] sm:$0xff]  ;;  %s269_s19 = scalar_lea.vmem [#allocation5], %s3352_s18  ;;  %s3201_s17 = scalar_lea.hbm %s6529_s6, %s3428_s20 }
 0x2c6   : > { %v2412_v11 = vpop.f32.mrf.mxu0  ;;  %v1974_v13 = vpop.permute.xlu2 %1973  ;;  %v2130_v9 = vsel %vm2117_vm5, %v2097_v24, %v7106_v43  ;;  %s3203_s28 = sshll.u32 %s269_s19, 4  ;;  %s3205_s29 = sshll.u32 %s3201_s17, 4  ;;  %s3204_s28 = int_to_ptr.vmem [resolvable:$true] %s3203_s28  ;;  %s3206_s29 = int_to_ptr.hbm [resolvable:$true] %s3205_s29 }
 0x2c7   : > { %2500 = vst.msk [vmem:[%s5654_s12 + $0x20] sm:$0xff] %vm7090_vm1, %v2412_v11  ;;  %v2535_v1 = vsel %vm7091_vm14, %v2412_v11, 0.0  ;;  %v2602_v16 = vmul.f32 %v2412_v11, %v2412_v11  ;;  %1985 = vrot.lane.b32.xlu0 %v1054_v5, %s3694_s26  ;;  %v1746_v7 = vpop.permute.xlu1 %1745  ;;  %vm7104_vm1 = vmmov %vm7097_vm0  ;;  %vm7105_vm14 = vcmp.gt.f32.partialorder %v6961_v20, 0.5  ;;  %v2163_v5 = vsel %vm2150_vm7, %v2130_v9, %v7107_v46  ;;  %v7108_v20 = vld [vmem:[#allocation56_spill] sm:$0xff]  ;;  %s3603_s11 = sshra.s32 %s3206_s29, 4  ;;  %s3604_s11 = int_to_ptr.hbm [resolvable:$true] %s3603_s11 }
 0x2c8   : > { %v2536_v28 = vadd.f32 %v2535_v1, %v5795_v45  ;;  %v2175_v45 = vsel %vm2150_vm7, %v2142_v25, %v5738_v19  ;;  %v748_v15 = vsel %vm7105_vm14, %v3581_v48, 0.0  ;;  %v5939_v55 = vpop.f32.mrf.mxu3  ;;  %v2196_v11 = vsel %vm2183_vm8, %v2163_v5, %v5813_v22  ;;  %vm7123_vm14 = vmmov %vm7097_vm0  ;;  %s3605_s13 = scalar_lea.hbm %s3604_s11, 2  ;;  %p3610_p0 = scmp.lt.s32.totalorder %s3604_s11, %s6529_s6 }
 0x2c9   : > { %v2637_v34 = vsel %vm7094_vm3, %v2602_v16, 0.0  ;;  %v1844_v4 = vpop.permute.xlu0 %1843  ;;  %v2208_v44 = vsel %vm2183_vm8, %v2175_v45, %v1746_v7  ;;  %2963 = vst.msk [vmem:[%s5664_s15 + $0x98] sm:$0xff] %vm2051_vm4, %v5939_v55  ;;  %vm7109_vm3 = vmmov %vm7097_vm0  ;;  %v7110_v7 = vld [vmem:[#allocation100_spill] sm:$0xff]  ;;  %p3606_p11 = scmp.ne.s32.totalorder %s3604_s11, %s3605_s13 }
 0x2ca   : > { %v2638_v26 = vadd.f32 %v2637_v34, %v5806_v35  ;;  %v2241_v35 = vsel %vm2216_vm9, %v2208_v44, %v1844_v4  ;;  %v2044_v1 = vsel %vm7109_vm3, %v748_v15, %v7108_v20  ;;  %v7120_v15 = vld [vmem:[#allocation155_spill] sm:$0xff]  ;;  %v3052_v20 = vmul.f32 %v5886_v32, %v5886_v32 }
 0x2cb   : > { %v2077_v12 = vsel %vm2051_vm4, %v2044_v1, %v7110_v7  ;;  %vm7124_vm3 = vcmp.gt.f32.partialorder %v7003_v17, 0.5  ;;  %p3607_p12 = pnand %p3606_p11, %p3768_p5 }
 0x2cc   : > { %v5916_v41 = vpop.f32.mrf.mxu1 }
 0x2cd   : > { %2951 = vst.msk [vmem:[%s5664_s15 + $0x38] sm:$0xff] %vm2051_vm4, %v5916_v41  ;;  %p3608_p13 = pneg %p3607_p12 }
 0x2ce   : > { %v5905_v18 = vpop.f32.mrf.mxu2  ;;  %v5932_v59 = vpop.permute.xlu2 %1821 }
 0x2cf   : > { %2513 = vst.msk [vmem:[%s5654_s12 + $0x88] sm:$0xff] %vm7097_vm0, %v5905_v18  ;;  %v1972_v19 = vpop.permute.xlu1 %1971 }
 0x2d0   : > { %v2274_v14 = vsel %vm2249_vm6, %v2241_v35, %v1972_v19  ;;  %v5965_v8 = vpop.f32.mrf.mxu3  ;;  %v3582_v19 = vld [vmem:[#allocation2 + $0xd0] sm:$0xff] }
 0x2d1   : > { %v1620_v37 = vpop.permute.xlu0 %1619  ;;  %v2415_v49 = vpop.f32.mrf.mxu0  ;;  %3385 = vmatmul.msk.f32.gmra.mxu2 %vm2282_vm10, %v2274_v14  ;;  %2964 = vst.msk [vmem:[%s5664_s15 + $0xa0] sm:$0xff] %vm2051_vm4, %v5965_v8  ;;  %v749_v14 = vsel %vm7113_vm13, %v3582_v19, 0.0  ;;  %vm7126_vm13 = vmmov %vm7097_vm0 }
 0x2d2   : > { %2501 = vst.msk [vmem:[%s5654_s12 + $0x28] sm:$0xff] %vm7100_vm12, %v2415_v49  ;;  %v2537_v62 = vsel %vm7101_vm2, %v2415_v49, 0.0  ;;  %v2603_v42 = vmul.f32 %v2415_v49, %v2415_v49  ;;  %v7114_v49 = vld [vmem:[#allocation46_spill] sm:$0xff]  ;;  %vm7118_vm12 = vmmov %vm7097_vm0 }
 0x2d3   : > { %v2538_v30 = vadd.f32 %v2537_v62, %v2536_v28  ;;  %v7111_v28 = vld [vmem:[#allocation135_spill] sm:$0xff]  ;;  %v7116_v62 = vld [vmem:[#allocation102_spill] sm:$0xff]  ;;  %vm7119_vm2 = vmmov %vm7097_vm0 }
 0x2d4   : > { %v2639_v31 = vsel %vm7104_vm1, %v2603_v42, 0.0  ;;  %v5948_v51 = vpop.f32.mrf.mxu1  ;;  %v2110_v33 = vsel %vm2084_vm15, %v2077_v12, %v7111_v28  ;;  %vm7121_vm1 = vmmov %vm7097_vm0 }
 0x2d5   : > { %v2640_v47 = vadd.f32 %v2639_v31, %v2638_v26  ;;  %2952 = vst.msk [vmem:[%s5664_s15 + $0x40] sm:$0xff] %vm2051_vm4, %v5948_v51  ;;  %v2143_v34 = vsel %vm2117_vm5, %v2110_v33, %v7112_v60  ;;  %v3089_v33 = vsel %vm2051_vm4, %v3052_v20, 0.0 }
 0x2d6   : > { %v2176_v4 = vsel %vm2150_vm7, %v2143_v34, %v1620_v37  ;;  %v1848_v25 = vpop.permute.xlu2 %1847 }
 0x2d7   : > { %v1820_v6 = vpop.permute.xlu1 %1819  ;;  %v2209_v26 = vsel %vm2183_vm8, %v2176_v4, %v5852_v52 }
 0x2d8   : > { %v2229_v16 = vsel %vm2216_vm9, %v2196_v11, %v1820_v6  ;;  %v7122_v11 = vld [vmem:[#allocation35_spill] sm:$0xff] }
 0x2d9   : > { %v1948_v57 = vpop.permute.xlu0 %1947  ;;  %v5987_v37 = vpop.f32.mrf.mxu3 }
 0x2da   : > { %v2262_v22 = vsel %vm2249_vm6, %v2229_v16, %v1948_v57  ;;  %2965 = vst.msk [vmem:[%s5664_s15 + $0xa8] sm:$0xff] %vm2051_vm4, %v5987_v37 }
 0x2db   : > { %3373 = vmatmul.msk.f32.gmra.mxu0 %vm2282_vm10, %v2262_v22 }
 0x2dc   : > { %v5972_v44 = vpop.f32.mrf.mxu1 }
 0x2dd   : > { %2953 = vst.msk [vmem:[%s5664_s15 + $0x48] sm:$0xff] %vm2051_vm4, %v5972_v44 }
 0x2de   : > { %v5998_v42 = vpop.permute.xlu2 %1623 }
 0x2df   : > { %v1846_v45 = vpop.permute.xlu1 %1845 }
 0x2e0   : > { %v2242_v36 = vsel %vm2216_vm9, %v2209_v26, %v1846_v45  ;;  %v3090_v26 = vadd.f32 %v3089_v33, %v5866_v56  ;;  %v2989_v45 = vsel %vm2051_vm4, %v5916_v41, 0.0 }
 0x2e1   : > { %v1724_v58 = vpop.permute.xlu0 %1723  ;;  %v2275_v35 = vsel %vm2249_vm6, %v2242_v36, %v1974_v13  ;;  %v2045_v13 = vsel %vm7115_vm11, %v749_v14, %v7114_v49  ;;  %v6020_v16 = vpop.f32.mrf.mxu3  ;;  %vm7127_vm11 = vmmov %vm7097_vm0 }
 0x2e2   : > { %3386 = vmatmul.msk.f32.gmra.mxu2 %vm2282_vm10, %v2275_v35  ;;  %v2078_v63 = vsel %vm2051_vm4, %v2045_v13, %v7116_v62  ;;  %v2197_v6 = vsel %vm2183_vm8, %v7122_v11, %v1724_v58  ;;  %2966 = vst.msk [vmem:[%s5664_s15 + $0xb0] sm:$0xff] %vm2051_vm4, %v6020_v16  ;;  %v3054_v58 = vmul.f32 %v5948_v51, %v5948_v51 }
 0x2e3   : > { %v2111_v23 = vsel %vm2084_vm15, %v2078_v63, %v7117_v38  ;;  %v2230_v57 = vsel %vm2216_vm9, %v2197_v6, %v5932_v59 }
 0x2e4   : > { %v5982_v52 = vpop.f32.mrf.mxu2  ;;  %v5994_v3 = vpop.f32.mrf.mxu1  ;;  %v2144_v43 = vsel %vm2117_vm5, %v2111_v23, %v7120_v15  ;;  %v3093_v49 = vsel %vm2051_vm4, %v3054_v58, 0.0 }
 0x2e5   : > { %2514 = vst.msk [vmem:[%s5654_s12 + $0x90] sm:$0xff] %vm7097_vm0, %v5982_v52  ;;  %v3056_v15 = vmul.f32 %v5994_v3, %v5994_v3 }
 0x2e6   : > { %2954 = vst.msk [vmem:[%s5664_s15 + $0x50] sm:$0xff] %vm2051_vm4, %v5994_v3  ;;  %v1952_v34 = vpop.permute.xlu2 %1951 }
 0x2e7   : > { %v1622_v21 = vpop.permute.xlu1 %1621 }
 0x2e8   : > { %v2418_v0 = vpop.f32.mrf.mxu0  ;;  %v2177_v46 = vsel %vm2150_vm7, %v2144_v43, %v1622_v21  ;;  %v3055_v21 = vmul.f32 %v5972_v44, %v5972_v44 }
 0x2e9   : > { %2502 = vst.msk [vmem:[%s5654_s12 + $0x30] sm:$0xff] %vm7118_vm12, %v2418_v0  ;;  %v2539_v24 = vsel %vm7119_vm2, %v2418_v0, 0.0  ;;  %v2604_v31 = vmul.f32 %v2418_v0, %v2418_v0  ;;  %v1750_v48 = vpop.permute.xlu0 %1749  ;;  %v6052_v35 = vpop.f32.mrf.mxu3  ;;  %v3583_v0 = vld [vmem:[#allocation2 + $0xd8] sm:$0xff]  ;;  %vm7130_vm12 = vmmov %vm7097_vm0 }
 0x2ea   : > { %v6010_v9 = vadd.f32 %v2539_v24, %v2538_v30  ;;  %v2210_v7 = vsel %vm2183_vm8, %v2177_v46, %v1750_v48  ;;  %v2987_v30 = vsel %vm2051_vm4, %v5886_v32, 0.0  ;;  %2967 = vst.msk [vmem:[%s5664_s15 + $0xb8] sm:$0xff] %vm2051_vm4, %v6052_v35  ;;  %v750_v38 = vsel %vm7124_vm3, %v3583_v0, 0.0  ;;  %v7125_v46 = vld [vmem:[#allocation57_spill] sm:$0xff]  ;;  %vm7132_vm2 = vmmov %vm7097_vm0 }
 0x2eb   : > { %v2641_v5 = vsel %vm7121_vm1, %v2604_v31, 0.0  ;;  %v2243_v32 = vsel %vm2216_vm9, %v2210_v7, %v1848_v25  ;;  %v2988_v59 = vadd.f32 %v2987_v30, %v5858_v27  ;;  %v3095_v48 = vsel %vm2051_vm4, %v3055_v21, 0.0  ;;  %vm7133_vm1 = vmmov %vm7097_vm0 }
 0x2ec   : > { %v6018_v1 = vadd.f32 %v2641_v5, %v2640_v47  ;;  %v6030_v28 = vpop.f32.mrf.mxu1  ;;  %v3053_v47 = vmul.f32 %v5916_v41, %v5916_v41  ;;  %v2991_v41 = vsel %vm2051_vm4, %v5948_v51, 0.0  ;;  %v2046_v17 = vsel %vm7126_vm13, %v750_v38, %v7125_v46 }
 0x2ed   : > { %2955 = vst.msk [vmem:[%s5664_s15 + $0x58] sm:$0xff] %vm2051_vm4, %v6030_v28  ;;  %v2990_v27 = vadd.f32 %v2989_v45, %v2988_v59  ;;  %v2995_v30 = vsel %vm2051_vm4, %v5994_v3, 0.0  ;;  %vm7135_vm3 = vcmp.gt.f32.partialorder %v7019_v53, 0.5  ;;  %vm7136_vm13 = vcmp.gt.f32.partialorder %v7031_v10, 0.5 }
 0x2ee   : > { %v3091_v36 = vsel %vm2051_vm4, %v3053_v47, 0.0  ;;  %v6075_v31 = vpop.permute.xlu2 %1599 }
 0x2ef   : > { %v1950_v12 = vpop.permute.xlu1 %1949  ;;  %v3092_v56 = vadd.f32 %v3091_v36, %v3090_v26  ;;  %v2992_v63 = vadd.f32 %v2991_v41, %v2990_v27  ;;  %v2997_v27 = vsel %vm2051_vm4, %v6030_v28, 0.0 }
 0x2f0   : > { %v2263_v22 = vsel %vm2249_vm6, %v2230_v57, %v1950_v12  ;;  %v7128_v57 = vld [vmem:[#allocation92_spill] sm:$0xff] }
 0x2f1   : > { %v1976_v60 = vpop.permute.xlu0 %1975  ;;  %3374 = vmatmul.msk.f32.gmra.mxu0 %vm2282_vm10, %v2263_v22  ;;  %v3094_v23 = vadd.f32 %v3093_v49, %v3092_v56  ;;  %v6081_v43 = vpop.f32.mrf.mxu3  ;;  %v2079_v33 = vsel %vm2051_vm4, %v2046_v17, %v7128_v57  ;;  %v3097_v22 = vsel %vm2051_vm4, %v3056_v15, 0.0 }
 0x2f2   : > { %v2276_v4 = vsel %vm2249_vm6, %v2243_v32, %v1976_v60  ;;  %2968 = vst.msk [vmem:[%s5664_s15 + $0xc0] sm:$0xff] %vm2051_vm4, %v6081_v43  ;;  %v3057_v60 = vmul.f32 %v6030_v28, %v6030_v28  ;;  %v7129_v32 = vld [vmem:[#allocation147_spill] sm:$0xff] }
 0x2f3   : > { %3387 = vmatmul.msk.f32.gmra.mxu2 %vm2282_vm10, %v2276_v4  ;;  %v3096_v20 = vadd.f32 %v3095_v48, %v3094_v23  ;;  %v2112_v59 = vsel %vm2084_vm15, %v2079_v33, %v7129_v32  ;;  %v7131_v4 = vld [vmem:[#allocation24_spill] sm:$0xff] }
 0x2f4   : > { %v2884_v14 = vpop.f32.mrf.mxu1  ;;  %v2145_v26 = vsel %vm2117_vm5, %v2112_v59, %v7131_v4  ;;  %v3099_v41 = vsel %vm2051_vm4, %v3057_v60, 0.0  ;;  %v7139_v60 = vld [vmem:[#allocation59_spill] sm:$0xff]  ;;  %v7141_v4 = vld [vmem:[#allocation73_spill] sm:$0xff] }
 0x2f5   : > { %v6050_v25 = vpop.f32.mrf.mxu2  ;;  %2956 = vst.msk [vmem:[%s5664_s15 + $0x60] sm:$0xff] %vm2051_vm4, %v2884_v14  ;;  %v2178_v36 = vsel %vm2150_vm7, %v2145_v26, %v5998_v42  ;;  %v3098_v58 = vadd.f32 %v3097_v22, %v3096_v20 }
 0x2f6   : > { %2515 = vst.msk [vmem:[%s5654_s12 + $0x98] sm:$0xff] %vm7123_vm14, %v6050_v25  ;;  %vm7134_vm14 = vmmov %vm7097_vm0 }
 0x2f7   : > { %v1726_v19 = vpop.permute.xlu1 %1725 }
 0x2f8   : > { %v2198_v13 = vsel %vm2183_vm8, %v5171_v39, %v1726_v19  ;;  %v2993_v39 = vsel %vm2051_vm4, %v5972_v44, 0.0  ;;  %v3058_v19 = vmul.f32 %v2884_v14, %v2884_v14 }
 0x2f9   : > { %v1824_v62 = vpop.permute.xlu0 %1823  ;;  %v2994_v11 = vadd.f32 %v2993_v39, %v2992_v63  ;;  %v6113_v49 = vpop.f32.mrf.mxu3  ;;  %v2999_v63 = vsel %vm2051_vm4, %v2884_v14, 0.0  ;;  %v3584_v14 = vld [vmem:[#allocation2 + $0x78] sm:$0xff] }
 0x2fa   : > { %v2231_v51 = vsel %vm2216_vm9, %v2198_v13, %v1824_v62  ;;  %v6115_v13 = vpop.permute.xlu2 %1825  ;;  %2969 = vst.msk [vmem:[%s5664_s15 + $0xc8] sm:$0xff] %vm2051_vm4, %v6113_v49  ;;  %v3100_v62 = vadd.f32 %v3099_v41, %v3098_v58  ;;  %v3101_v38 = vsel %vm2051_vm4, %v3058_v19, 0.0  ;;  %v738_v17 = vsel %vm7135_vm3, %v3584_v14, 0.0  ;;  %v7144_v19 = vld [vmem:[#allocation140_spill] sm:$0xff]  ;;  %vm7154_vm3 = vmmov %vm7097_vm0 }
 0x2fb   : > { %v2264_v24 = vsel %vm2249_vm6, %v2231_v51, %v1952_v34  ;;  %v2996_v45 = vadd.f32 %v2995_v30, %v2994_v11  ;;  %v3063_v14 = vmul.f32 %v5874_v50, %v5874_v50 }
 0x2fc   : > { %3375 = vmatmul.msk.f32.gmra.mxu0 %vm2282_vm10, %v2264_v24  ;;  %v2887_v12 = vpop.f32.mrf.mxu1  ;;  %v3102_v11 = vadd.f32 %v3101_v38, %v3100_v62 }
 0x2fd   : > { %2957 = vst.msk [vmem:[%s5664_s15 + $0x68] sm:$0xff] %vm2051_vm4, %v2887_v12  ;;  %v3059_v23 = vmul.f32 %v2887_v12, %v2887_v12 }
 0x2fe   : > { %v2421_v5 = vpop.f32.mrf.mxu0 }
 0x2ff   : > { %2503 = vst.msk [vmem:[%s5654_s12 + $0x38] sm:$0xff] %vm7097_vm0, %v2421_v5  ;;  %v2541_v44 = vsel %vm7127_vm11, %v2421_v5, 0.0  ;;  %v2605_v6 = vmul.f32 %v2421_v5, %v2421_v5  ;;  %v1752_v7 = vpop.permute.xlu1 %1751  ;;  %v3103_v30 = vsel %vm2051_vm4, %v3059_v23, 0.0  ;;  %vm7138_vm11 = vmmov %vm7097_vm0 }
 0x300   : > { %v2542_v47 = vadd.f32 %v2541_v44, %v6010_v9  ;;  %v2211_v56 = vsel %vm2183_vm8, %v2178_v36, %v1752_v7  ;;  %v3001_v44 = vsel %vm2051_vm4, %v2887_v12, 0.0  ;;  %v3104_v59 = vadd.f32 %v3103_v30, %v3102_v11 }
 0x301   : > { %v2643_v34 = vsel %vm7130_vm12, %v2605_v6, 0.0  ;;  %v1850_v3 = vpop.permute.xlu0 %1849  ;;  %v3585_v6 = vld [vmem:[#allocation2 + $0xe0] sm:$0xff]  ;;  %v6146_v22 = vpop.f32.mrf.mxu3  ;;  %vm7140_vm12 = vmmov %vm7097_vm0 }
 0x302   : > { %v2644_v9 = vadd.f32 %v2643_v34, %v6018_v1  ;;  %v2998_v1 = vadd.f32 %v2997_v27, %v2996_v45  ;;  %v2244_v42 = vsel %vm2216_vm9, %v2211_v56, %v1850_v3  ;;  %v751_v20 = vsel %vm7136_vm13, %v3585_v6, 0.0  ;;  %2970 = vst.msk [vmem:[%s5664_s15 + $0xd0] sm:$0xff] %vm2051_vm4, %v6146_v22  ;;  %v1852_v36 = vpop.permute.xlu2 %1851  ;;  %v7143_v56 = vld [vmem:[#allocation137_spill] sm:$0xff]  ;;  %vm7155_vm13 = vmmov %vm7097_vm0 }
 0x303   : > { %v2047_v10 = vsel %vm7140_vm12, %v751_v20, %v7139_v60  ;;  %v3111_v60 = vsel %vm2051_vm4, %v3063_v14, 0.0  ;;  %v3017_v14 = vsel %vm2051_vm4, %v5987_v37, 0.0  ;;  %vm7158_vm12 = vmmov %vm7097_vm0 }
 0x304   : > { %v2890_v51 = vpop.f32.mrf.mxu1  ;;  %v3000_v46 = vadd.f32 %v2999_v63, %v2998_v1  ;;  %v7146_v63 = vld [vmem:[#allocation158_spill] sm:$0xff] }
 0x305   : > { %2958 = vst.msk [vmem:[%s5664_s15 + $0x70] sm:$0xff] %vm2051_vm4, %v2890_v51  ;;  %v3060_v57 = vmul.f32 %v2890_v51, %v2890_v51  ;;  %v3003_v34 = vsel %vm2051_vm4, %v2890_v51, 0.0 }
 0x306   : > { %v6117_v21 = vpop.f32.mrf.mxu2  ;;  %v3002_v53 = vadd.f32 %v3001_v44, %v3000_v46 }
 0x307   : > { %2516 = vst.msk [vmem:[%s5654_s12 + $0xa0] sm:$0xff] %vm7132_vm2, %v6117_v21  ;;  %v1978_v28 = vpop.permute.xlu1 %1977  ;;  %v3105_v58 = vsel %vm2051_vm4, %v3060_v57, 0.0  ;;  %vm7147_vm2 = vcmp.gt.f32.partialorder %v7054_v61, 0.5  ;;  %v3064_v57 = vmul.f32 %v5903_v2, %v5903_v2 }
 0x308   : > { %v2277_v0 = vsel %vm2249_vm6, %v2244_v42, %v1978_v28  ;;  %v7145_v28 = vld [vmem:[#allocation154_spill] sm:$0xff] }
 0x309   : > { %v1728_v24 = vpop.permute.xlu0 %1727  ;;  %v2424_v39 = vpop.f32.mrf.mxu0  ;;  %3388 = vmatmul.msk.f32.gmra.mxu2 %vm2282_vm10, %v2277_v0  ;;  %v3004_v0 = vadd.f32 %v3003_v34, %v3002_v53 }
 0x30a   : > { %2504 = vst.msk [vmem:[%s5654_s12 + $0x40] sm:$0xff] %vm7133_vm1, %v2424_v39  ;;  %v2543_v48 = vsel %vm7134_vm14, %v2424_v39, 0.0  ;;  %v2606_v15 = vmul.f32 %v2424_v39, %v2424_v39  ;;  %v3106_v39 = vadd.f32 %v3105_v58, %v3104_v59  ;;  %v1756_v59 = vpop.permute.xlu2 %1755  ;;  %vm7149_vm1 = vmmov %vm7097_vm0 }
 0x30b   : > { %v6137_v5 = vadd.f32 %v2543_v48, %v2542_v47  ;;  %v7137_v47 = vld [vmem:[#allocation42_spill] sm:$0xff]  ;;  %vm7150_vm14 = vmmov %vm7097_vm0 }
 0x30c   : > { %v2645_v7 = vsel %vm7097_vm0, %v2606_v15, 0.0  ;;  %v2034_v12 = vsel %vm7138_vm11, %v738_v17, %v7137_v47  ;;  %v2893_v3 = vpop.f32.mrf.mxu1  ;;  %v6179_v17 = vpop.f32.mrf.mxu3  ;;  %vm7156_vm11 = vcmp.gt.f32.partialorder %v7067_v54, 0.5 }
 0x30d   : > { %v6144_v33 = vadd.f32 %v2645_v7, %v2644_v9  ;;  %v2067_v26 = vsel %vm2051_vm4, %v2034_v12, %v7141_v4  ;;  %v7142_v9 = vld [vmem:[#allocation103_spill] sm:$0xff]  ;;  %2959 = vst.msk [vmem:[%s5664_s15 + $0x78] sm:$0xff] %vm2051_vm4, %v2893_v3  ;;  %v3061_v27 = vmul.f32 %v2893_v3, %v2893_v3  ;;  %v3005_v48 = vsel %vm2051_vm4, %v2893_v3, 0.0 }
 0x30e   : > { %v2080_v45 = vsel %vm2051_vm4, %v2047_v10, %v7142_v9  ;;  %v2100_v41 = vsel %vm2084_vm15, %v2067_v26, %v7143_v56  ;;  %v3006_v44 = vadd.f32 %v3005_v48, %v3004_v0  ;;  %2971 = vst.msk [vmem:[%s5664_s15 + $0xd8] sm:$0xff] %vm2051_vm4, %v6179_v17  ;;  %v3009_v12 = vsel %vm2051_vm4, %v5874_v50, 0.0  ;;  %v7153_v48 = vld [vmem:[#allocation156_spill] sm:$0xff] }
 0x30f   : > { %v1626_v32 = vpop.permute.xlu1 %1625  ;;  %v2113_v1 = vsel %vm2084_vm15, %v2080_v45, %v7144_v19  ;;  %v2133_v62 = vsel %vm2117_vm5, %v2100_v41, %v7145_v28  ;;  %v3107_v46 = vsel %vm2051_vm4, %v3061_v27, 0.0  ;;  %v3011_v50 = vsel %vm2051_vm4, %v5903_v2, 0.0  ;;  %v7148_v27 = vld [vmem:[#allocation49_spill] sm:$0xff] }
 0x310   : > { %v2146_v51 = vsel %vm2117_vm5, %v2113_v1, %v7146_v63  ;;  %v2166_v38 = vsel %vm2150_vm7, %v2133_v62, %v6075_v31  ;;  %v3108_v20 = vadd.f32 %v3107_v46, %v3106_v39  ;;  %v3113_v9 = vsel %vm2051_vm4, %v3064_v57, 0.0  ;;  %v7151_v1 = vld [vmem:[#allocation107_spill] sm:$0xff] }
 0x311   : > { %v1754_v42 = vpop.permute.xlu0 %1753  ;;  %v2179_v23 = vsel %vm2150_vm7, %v2146_v51, %v1626_v32  ;;  %v2199_v15 = vsel %vm2183_vm8, %v2166_v38, %v1728_v24  ;;  %v3586_v24 = vld [vmem:[#allocation2 + $0xe8] sm:$0xff]  ;;  %v3065_v32 = vmul.f32 %v5939_v55, %v5939_v55  ;;  %v3066_v45 = vmul.f32 %v5965_v8, %v5965_v8 }
 0x312   : > { %v2212_v11 = vsel %vm2183_vm8, %v2179_v23, %v1754_v42  ;;  %v2232_v6 = vsel %vm2216_vm9, %v2199_v15, %v6115_v13  ;;  %v752_v30 = vsel %vm7147_vm2, %v3586_v24, 0.0  ;;  %v3013_v41 = vsel %vm2051_vm4, %v5939_v55, 0.0  ;;  %v7152_v55 = vld [vmem:[#allocation148_spill] sm:$0xff]  ;;  %vm7162_vm2 = vmmov %vm7097_vm0 }
 0x313   : > { %v2245_v10 = vsel %vm2216_vm9, %v2212_v11, %v1852_v36  ;;  %v2048_v56 = vsel %vm7149_vm1, %v752_v30, %v7148_v27  ;;  %v3115_v28 = vsel %vm2051_vm4, %v3065_v32, 0.0  ;;  %v3067_v62 = vmul.f32 %v5987_v37, %v5987_v37 }
 0x314   : > { %v2896_v7 = vpop.f32.mrf.mxu1  ;;  %v6219_v19 = vpop.f32.mrf.mxu3  ;;  %v2081_v42 = vsel %vm2051_vm4, %v2048_v56, %v7151_v1  ;;  %v3015_v0 = vsel %vm2051_vm4, %v5965_v8, 0.0  ;;  %v3068_v38 = vmul.f32 %v6020_v16, %v6020_v16  ;;  %v3117_v46 = vsel %vm2051_vm4, %v3066_v45, 0.0 }
 0x315   : > { %2960 = vst.msk [vmem:[%s5664_s15 + $0x80] sm:$0xff] %vm2051_vm4, %v2896_v7  ;;  %v3062_v47 = vmul.f32 %v2896_v7, %v2896_v7  ;;  %v3007_v61 = vsel %vm2051_vm4, %v2896_v7, 0.0  ;;  %v2114_v51 = vsel %vm2084_vm15, %v2081_v42, %v7152_v55  ;;  %v3119_v24 = vsel %vm2051_vm4, %v3067_v62, 0.0 }
 0x316   : > { %v3008_v3 = vadd.f32 %v3007_v61, %v3006_v44  ;;  %2972 = vst.msk [vmem:[%s5664_s15 + $0xe0] sm:$0xff] %vm2051_vm4, %v6219_v19  ;;  %v2147_v15 = vsel %vm2117_vm5, %v2114_v51, %v7153_v48  ;;  %v3069_v30 = vmul.f32 %v6052_v35, %v6052_v35  ;;  %v3025_v1 = vsel %vm2051_vm4, %v6113_v49, 0.0  ;;  %v7159_v51 = vld [vmem:[#allocation95_spill] sm:$0xff] }
 0x317   : > { %v1954_v31 = vpop.permute.xlu1 %1953  ;;  %v3109_v4 = vsel %vm2051_vm4, %v3062_v47, 0.0  ;;  %v3121_v47 = vsel %vm2051_vm4, %v3068_v38, 0.0  ;;  %vm7163_vm1 = vcmp.gt.f32.partialorder %v7079_v29, 0.5 }
 0x318   : > { %v2265_v53 = vsel %vm2249_vm6, %v2232_v6, %v1954_v31  ;;  %v3110_v26 = vadd.f32 %v3109_v4, %v3108_v20  ;;  %v3010_v58 = vadd.f32 %v3009_v12, %v3008_v3  ;;  %v3123_v4 = vsel %vm2051_vm4, %v3069_v30, 0.0 }
 0x319   : > { %v1980_v13 = vpop.permute.xlu0 %1979  ;;  %3376 = vmatmul.msk.f32.gmra.mxu0 %vm2282_vm10, %v2265_v53  ;;  %v3019_v53 = vsel %vm2051_vm4, %v6020_v16, 0.0 }
 0x31a   : > { %v2278_v34 = vsel %vm2249_vm6, %v2245_v10, %v1980_v13  ;;  %v3112_v2 = vadd.f32 %v3111_v60, %v3110_v26  ;;  %v3012_v63 = vadd.f32 %v3011_v50, %v3010_v58  ;;  %v1630_v13 = vpop.permute.xlu2 %1629  ;;  %v3070_v10 = vmul.f32 %v6081_v43, %v6081_v43 }
 0x31b   : > { %3389 = vmatmul.msk.f32.gmra.mxu2 %vm2282_vm10, %v2278_v34  ;;  %v3021_v34 = vsel %vm2051_vm4, %v6052_v35, 0.0  ;;  %v3071_v50 = vmul.f32 %v6113_v49, %v6113_v49  ;;  %v3027_v49 = vsel %vm2051_vm4, %v6146_v22, 0.0 }
 0x31c   : > { %v6210_v36 = vpop.f32.mrf.mxu2  ;;  %v3114_v39 = vadd.f32 %v3113_v9, %v3112_v2  ;;  %v3014_v44 = vadd.f32 %v3013_v41, %v3012_v63  ;;  %v2935_v16 = vpop.f32.mrf.mxu3  ;;  %v3587_v9 = vld [vmem:[#allocation2 + $0xf0] sm:$0xff]  ;;  %v3125_v27 = vsel %vm2051_vm4, %v3070_v10, 0.0  ;;  %v3072_v41 = vmul.f32 %v6146_v22, %v6146_v22 }
 0x31d   : > { %2517 = vst.msk [vmem:[%s5654_s12 + $0xa8] sm:$0xff] %vm7150_vm14, %v6210_v36  ;;  %v3127_v62 = vsel %vm2051_vm4, %v3071_v50, 0.0  ;;  %v3073_v63 = vmul.f32 %v6179_v17, %v6179_v17  ;;  %v3029_v22 = vsel %vm2051_vm4, %v6179_v17, 0.0  ;;  %v3075_v30 = vmul.f32 %v2935_v16, %v2935_v16  ;;  %v7164_v50 = vld [vmem:[#allocation65_spill] sm:$0xff]  ;;  %vm7165_vm14 = vmmov %vm7097_vm0 }
 0x31e   : > { %v3116_v7 = vadd.f32 %v3115_v28, %v3114_v39  ;;  %v3016_v37 = vadd.f32 %v3015_v0, %v3014_v44  ;;  %2973 = vst.msk [vmem:[%s5664_s15 + $0xe8] sm:$0xff] %vm2051_vm4, %v2935_v16  ;;  %v3129_v48 = vsel %vm2051_vm4, %v3072_v41, 0.0  ;;  %v3031_v17 = vsel %vm2051_vm4, %v6219_v19, 0.0  ;;  %v7168_v41 = vld [vmem:[#allocation161_spill] sm:$0xff] }
 0x31f   : > { %v1628_v23 = vpop.permute.xlu1 %1627 }
 0x320   : > { %v2427_v11 = vpop.f32.mrf.mxu0  ;;  %v2180_v31 = vsel %vm2150_vm7, %v2147_v15, %v1628_v23  ;;  %v3118_v60 = vadd.f32 %v3117_v46, %v3116_v7  ;;  %v3018_v32 = vadd.f32 %v3017_v14, %v3016_v37  ;;  %v7160_v23 = vld [vmem:[#allocation149_spill] sm:$0xff]  ;;  %v3074_v14 = vmul.f32 %v6219_v19, %v6219_v19  ;;  %v3588_v37 = vld [vmem:[#allocation2 + $0xf8] sm:$0xff] }
 0x321   : > { %2505 = vst.msk [vmem:[%s5654_s12 + $0x48] sm:$0xff] %vm7154_vm3, %v2427_v11  ;;  %v2545_v8 = vsel %vm7155_vm13, %v2427_v11, 0.0  ;;  %v2607_v6 = vmul.f32 %v2427_v11, %v2427_v11  ;;  %v1854_v20 = vpop.permute.xlu0 %1853  ;;  %v7161_v11 = vld [vmem:[#allocation159_spill] sm:$0xff]  ;;  %v3131_v7 = vsel %vm2051_vm4, %v3073_v63, 0.0  ;;  %vm7169_vm3 = vmmov %vm7097_vm0 }
 0x322   : > { %v6248_v57 = vadd.f32 %v2545_v8, %v6137_v5  ;;  %v2213_v5 = vsel %vm2183_vm8, %v2180_v31, %v1756_v59  ;;  %v3120_v3 = vadd.f32 %v3119_v24, %v3118_v60  ;;  %v3020_v26 = vadd.f32 %v3019_v53, %v3018_v32  ;;  %v1984_v15 = vpop.permute.xlu2 %1983  ;;  %vm7170_vm13 = vmmov %vm7097_vm0 }
 0x323   : > { %v2647_v12 = vsel %vm7097_vm0, %v2607_v6, 0.0  ;;  %v3023_v59 = vsel %vm2051_vm4, %v6081_v43, 0.0  ;;  %v2246_v45 = vsel %vm2216_vm9, %v2213_v5, %v1854_v20  ;;  %v7157_v43 = vld [vmem:[#allocation62_spill] sm:$0xff]  ;;  %v754_v53 = vsel %vm7163_vm1, %v3588_v37, 0.0 }
 0x324   : > { %v6257_v61 = vadd.f32 %v2647_v12, %v6144_v33  ;;  %v753_v33 = vsel %vm7156_vm11, %v3587_v9, 0.0  ;;  %v3122_v58 = vadd.f32 %v3121_v47, %v3120_v3  ;;  %v3022_v2 = vadd.f32 %v3021_v34, %v3020_v26  ;;  %v2938_v6 = vpop.f32.mrf.mxu3 }
 0x325   : > { %v2049_v28 = vsel %vm7158_vm12, %v753_v33, %v7157_v43  ;;  %2974 = vst.msk [vmem:[%s5664_s15 + $0xf0] sm:$0xff] %vm2051_vm4, %v2938_v6  ;;  %v3133_v5 = vsel %vm2051_vm4, %v3074_v14, 0.0  ;;  %v3076_v32 = vmul.f32 %v2938_v6, %v2938_v6  ;;  %v2050_v26 = vsel %vm7165_vm14, %v754_v53, %v7164_v50  ;;  %v7166_v33 = vld [vmem:[#allocation108_spill] sm:$0xff] }
 0x326   : > { %v3124_v42 = vadd.f32 %v3123_v4, %v3122_v58  ;;  %v3024_v55 = vadd.f32 %v3023_v59, %v3022_v2  ;;  %v2082_v0 = vsel %vm2051_vm4, %v2049_v28, %v7159_v51  ;;  %v3033_v4 = vsel %vm2051_vm4, %v2935_v16, 0.0  ;;  %v7167_v58 = vld [vmem:[#allocation143_spill] sm:$0xff] }
 0x327   : > { %v1982_v35 = vpop.permute.xlu1 %1981  ;;  %v2115_v39 = vsel %vm2084_vm15, %v2082_v0, %v7160_v23  ;;  %v3135_v9 = vsel %vm2051_vm4, %v3075_v30, 0.0  ;;  %v2083_v59 = vsel %vm2051_vm4, %v2050_v26, %v7166_v33 }
 0x328   : > { %v2279_v56 = vsel %vm2249_vm6, %v2246_v45, %v1982_v35  ;;  %v3126_v38 = vadd.f32 %v3125_v27, %v3124_v42  ;;  %v3026_v46 = vadd.f32 %v3025_v1, %v3024_v55  ;;  %v2148_v44 = vsel %vm2117_vm5, %v2115_v39, %v7161_v11 }
 0x329   : > { %v1758_v54 = vpop.permute.xlu0 %1757  ;;  %3390 = vmatmul.msk.f32.gmra.mxu2 %vm2282_vm10, %v2279_v56  ;;  %v2181_v20 = vsel %vm2150_vm7, %v2148_v44, %v1630_v13  ;;  %v3035_v35 = vsel %vm2051_vm4, %v2938_v6, 0.0  ;;  %v2116_v27 = vsel %vm2084_vm15, %v2083_v59, %v7167_v58  ;;  %v3137_v56 = vsel %vm2051_vm4, %v3076_v32, 0.0  ;;  %vm7171_vm15 = vmmov %vm7097_vm0 }
 0x32a   : > { %v3128_v8 = vadd.f32 %v3127_v62, %v3126_v38  ;;  %v3028_v24 = vadd.f32 %v3027_v49, %v3026_v46  ;;  %v2214_v47 = vsel %vm2183_vm8, %v2181_v20, %v1758_v54  ;;  %v2149_v2 = vsel %vm2117_vm5, %v2116_v27, %v7168_v41  ;;  %v1858_v28 = vpop.permute.xlu2 %1857  ;;  %vm7173_vm5 = vmmov %vm7097_vm0 }
 0x32c   : > { %v3130_v60 = vadd.f32 %v3129_v48, %v3128_v8  ;;  %v3030_v10 = vadd.f32 %v3029_v22, %v3028_v24  ;;  %v2941_v54 = vpop.f32.mrf.mxu3 }
 0x32d   : > { %v6295_v31 = vpop.f32.mrf.mxu2  ;;  %2975 = vst.msk [vmem:[%s5664_s15 + $0xf8] sm:$0xff] %vm2051_vm4, %v2941_v54  ;;  %v3077_v63 = vmul.f32 %v2941_v54, %v2941_v54  ;;  %v3037_v38 = vsel %vm2051_vm4, %v2941_v54, 0.0 }
 0x32e   : > { %2518 = vst.msk [vmem:[%s5654_s12 + $0xb0] sm:$0xff] %vm7162_vm2, %v6295_v31  ;;  %v3132_v29 = vadd.f32 %v3131_v7, %v3130_v60  ;;  %v3032_v19 = vadd.f32 %v3031_v17, %v3030_v10 }
 0x32f   : > { %v1856_v12 = vpop.permute.xlu1 %1855 }
 0x330   : > { %v2247_v13 = vsel %vm2216_vm9, %v2214_v47, %v1856_v12  ;;  %v3134_v45 = vadd.f32 %v3133_v5, %v3132_v29  ;;  %v3034_v16 = vadd.f32 %v3033_v4, %v3032_v19 }
 0x331   : > { %v1632_v34 = vpop.permute.xlu0 %1631  ;;  %v2280_v3 = vsel %vm2249_vm6, %v2247_v13, %v1984_v15  ;;  %v3139_v15 = vsel %vm2051_vm4, %v3077_v63, 0.0  ;;  %vm7172_vm4 = vmmov %vm7097_vm0 }
 0x332   : > { %3391 = vmatmul.msk.f32.gmra.mxu2 %vm2282_vm10, %v2280_v3  ;;  %v3136_v1 = vadd.f32 %v3135_v9, %v3134_v45  ;;  %v2182_v42 = vsel %vm2150_vm7, %v2149_v2, %v1632_v34  ;;  %v3036_v62 = vadd.f32 %v3035_v35, %v3034_v16  ;;  %vm7174_vm7 = vmmov %vm7097_vm0 }
 0x334   : > { %v3138_v49 = vadd.f32 %v3137_v56, %v3136_v1  ;;  %v3038_v48 = vadd.f32 %v3037_v38, %v3036_v62 }
 0x336   : > { %v2430_v43 = vpop.f32.mrf.mxu0  ;;  %v3140_v44 = vadd.f32 %v3139_v15, %v3138_v49  ;;  %v3039_v6 = vrot.slane %v3038_v48, 4 }
 0x337   : > { %2506 = vst.msk [vmem:[%s5654_s12 + $0x50] sm:$0xff] %vm7169_vm3, %v2430_v43  ;;  %v2547_v55 = vsel %vm7170_vm13, %v2430_v43, 0.0  ;;  %v2608_v51 = vmul.f32 %v2430_v43, %v2430_v43  ;;  %v1760_v0 = vpop.permute.xlu1 %1759 }
 0x338   : > { %v2548_v23 = vadd.f32 %v2547_v55, %v6248_v57  ;;  %v2215_v39 = vsel %vm2183_vm8, %v2182_v42, %v1760_v0  ;;  %v3141_v57 = vrot.slane %v3140_v44, 4  ;;  %v3040_v20 = vadd.f32 %v3039_v6, %v3038_v48  ;;  %vm7175_vm8 = vmmov %vm7097_vm0 }
 0x339   : > { %v2649_v46 = vsel %vm7171_vm15, %v2608_v51, 0.0  ;;  %v2248_v14 = vsel %vm2216_vm9, %v2215_v39, %v1858_v28  ;;  %v1986_v11 = vpop.permute.xlu0 %1985  ;;  %vm3148_vm9 = vcmask 1040384  }
 0x33a   : > { %v2650_v22 = vadd.f32 %v2649_v46, %v6257_v61  ;;  %v2281_v8 = vsel %vm2249_vm6, %v2248_v14, %v1986_v11  ;;  %v3142_v7 = vadd.f32 %v3141_v57, %v3140_v44  ;;  %v3041_v30 = vrot.slane %v3040_v20, 2 }
 0x33b   : > { %3392 = vmatmul.msk.f32.gmra.mxu2 %vm2282_vm10, %v2281_v8  ;;  %vm3153_vm6 = vcmask 58368   ;;  %vm7176_vm10 = vmmov %vm7097_vm0 }
 0x33c   : > { %v3143_v37 = vrot.slane %v3142_v7, 2  ;;  %v3042_v53 = vadd.f32 %v3041_v30, %v3040_v20 }
 0x33e   : > { %v6342_v24 = vpop.f32.mrf.mxu2  ;;  %v3144_v47 = vadd.f32 %v3143_v37, %v3142_v7  ;;  %v3043_v60 = vrot.slane %v3042_v53, 1 }
 0x33f   : > { %2519 = vst.msk [vmem:[%s5654_s12 + $0xb8] sm:$0xff] %vm7172_vm4, %v6342_v24 }
 0x340   : > { %v3145_v10 = vrot.slane %v3144_v47, 1  ;;  %v3044_v32 = vadd.f32 %v3043_v60, %v3042_v53 }
 0x341   : > { %v2433_v61 = vpop.f32.mrf.mxu0 }
 0x342   : > { %2507 = vst.msk [vmem:[%s5654_s12 + $0x58] sm:$0xff] %vm7173_vm5, %v2433_v61  ;;  %v2549_v12 = vsel %vm7174_vm7, %v2433_v61, 0.0  ;;  %v2609_v17 = vmul.f32 %v2433_v61, %v2433_v61  ;;  %v3146_v3 = vadd.f32 %v3145_v10, %v3144_v47 }
 0x343   : > { %v2550_v13 = vadd.f32 %v2549_v12, %v2548_v23 }
 0x344   : > { %v2651_v5 = vsel %vm7175_vm8, %v2609_v17, 0.0  ;;  %v3152_v29 = vsel %vm3148_vm9, %v3044_v32, %v3146_v3 }
 0x345   : > { %v2652_v34 = vadd.f32 %v2651_v5, %v2650_v22  ;;  %3154 = vst.msk [vmem:[%s269_s19] sm:$0x3] %vm3153_vm6, %v3152_v29  ;;  %s3609_s19 = scalar_lea.hbm %s6529_s6, 4 }
 0x346   : > { %p3611_p1 = scmp.lt.s32.totalorder %s3609_s19, %s3605_s13 }
 0x348   : > { %p3612_p2 = por %p3611_p1, %p3610_p0 }
 0x34a   : > { %p3613_p3 = pnand %p3612_p2, %p3608_p13 }
 0x354   : > { %v6364_v4 = vpop.f32.mrf.mxu2 }
 0x355   : > { %2520 = vst.msk [vmem:[%s5654_s12 + $0xc0] sm:$0xff] %vm7176_vm10, %v6364_v4 }
 0x356   : > { %3616 = shalt.err (!%p3613_p3)
}
 0x357   : > { %3442 = dma.vmem_to_hbm [thread:$0]  (%p3768_p5), %s3204_s28, 32, %s3206_s29, %s3171_s9   ;;  %vm7177_vm11 = vmmov %vm7097_vm0  ;;  %v2614_v55 = vmul.f32 %v5842_v40, %v5842_v40  ;;  %v2615_v39 = vmul.f32 %v5905_v18, %v5905_v18  ;;  %v2616_v44 = vmul.f32 %v5982_v52, %v5982_v52  ;;  %v2617_v57 = vmul.f32 %v6050_v25, %v6050_v25 }
 0x358   : > { %v2436_v50 = vpop.f32.mrf.mxu0  ;;  %vm7178_vm12 = vmmov %vm7097_vm0  ;;  %v2618_v53 = vmul.f32 %v6117_v21, %v6117_v21  ;;  %v2619_v17 = vmul.f32 %v6210_v36, %v6210_v36  ;;  %v2620_v5 = vmul.f32 %v6295_v31, %v6295_v31  ;;  %v2621_v29 = vmul.f32 %v6342_v24, %v6342_v24  ;;  %s3187_s28 = scalar_lea.hbm %s6528_s5, %s3428_s20  ;;  %s262_s29 = scalar_lea.vmem [#allocation3], %s3352_s18 }
 0x359   : > { %2508 = vst.msk [vmem:[%s5654_s12 + $0x60] sm:$0xff] %vm7097_vm0, %v2436_v50  ;;  %v2551_v26 = vsel %vm7177_vm11, %v2436_v50, 0.0  ;;  %v2610_v19 = vmul.f32 %v2436_v50, %v2436_v50  ;;  %vm7179_vm2 = vmmov %vm7097_vm0  ;;  %s3189_s9 = sshll.u32 %s262_s29, 4  ;;  %s3191_s11 = sshll.u32 %s3187_s28, 4  ;;  %s3190_s9 = int_to_ptr.vmem [resolvable:$true] %s3189_s9  ;;  %s3192_s11 = int_to_ptr.hbm [resolvable:$true] %s3191_s11 }
 0x35a   : > { %v2552_v9 = vadd.f32 %v2551_v26, %v2550_v13  ;;  %vm7180_vm1 = vmmov %vm7097_vm0  ;;  %s3166_s25 = scalar_lea.sflag [#allocation4], %s6348_s10  ;;  %s3631_s13 = sshra.s32 %s3192_s11, 4  ;;  %s3632_s13 = int_to_ptr.hbm [resolvable:$true] %s3631_s13 }
 0x35b   : > { %v2653_v33 = vsel %vm7178_vm12, %v2610_v19, 0.0  ;;  %vm7181_vm14 = vmmov %vm7097_vm0  ;;  %s3633_s20 = scalar_lea.hbm %s3632_s13, 2  ;;  %s3637_s15 = scalar_lea.hbm %s6528_s5, 4 }
 0x35c   : > { %v2654_v59 = vadd.f32 %v2653_v33, %v2652_v34  ;;  %vm7182_vm3 = vmmov %vm7097_vm0  ;;  %p3634_p4 = scmp.ne.s32.totalorder %s3632_s13, %s3633_s20  ;;  %p3638_p9 = scmp.lt.s32.totalorder %s3632_s13, %s6528_s5 }
 0x35d   : > { %vm7183_vm13 = vmmov %vm7097_vm0  ;;  %p3639_p10 = scmp.lt.s32.totalorder %s3637_s15, %s3633_s20 }
 0x35e   : > { %vm7184_vm15 = vmmov %vm7097_vm0  ;;  %p3635_p7 = pnand %p3634_p4, %p3768_p5 }
 0x35f   : > { %vm7185_vm4 = vmmov %vm7097_vm0  ;;  %p3640_p11 = por %p3639_p10, %p3638_p9 }
 0x360   : > { %vm7186_vm5 = vmmov %vm7097_vm0  ;;  %p3636_p8 = pneg %p3635_p7 }
 0x361   : > { %vm7187_vm7 = vmmov %vm7097_vm0 }
 0x362   : > { %vm7188_vm8 = vmmov %vm7097_vm0  ;;  %p3641_p12 = pnand %p3640_p11, %p3636_p8 }
 0x363   : > { %vm7189_vm6 = vmmov %vm7097_vm0 }
 0x364   : > { %vm7190_vm10 = vmmov %vm7097_vm0 }
 0x365   : > { %v6384_v45 = vpop.f32.mrf.mxu2  ;;  %v2559_v23 = vsel %vm7190_vm10, %v5842_v40, 0.0  ;;  %vm7191_vm11 = vmmov %vm7097_vm0 }
 0x366   : > { %2521 = vst.msk [vmem:[%s5654_s12 + $0xc8] sm:$0xff] %vm7179_vm2, %v6384_v45  ;;  %v2661_v14 = vsel %vm7191_vm11, %v2614_v55, 0.0  ;;  %vm7192_vm12 = vmmov %vm7097_vm0 }
 0x367   : > { %v2561_v11 = vsel %vm7192_vm12, %v5905_v18, 0.0  ;;  %vm7193_vm2 = vmmov %vm7097_vm0 }
 0x368   : > { %v2663_v40 = vsel %vm7193_vm2, %v2615_v39, 0.0  ;;  %vm7204_vm10 = vmmov %vm7097_vm0 }
 0x369   : > { %v2673_v19 = vsel %vm7204_vm10, %v2620_v5, 0.0  ;;  %vm7205_vm11 = vmmov %vm7097_vm0 }
 0x36a   : > { %vm7206_vm12 = vmmov %vm7097_vm0 }
 0x36b   : > { %vm7207_vm2 = vmmov %vm7097_vm0 }
 0x36c   : > { %vm7218_vm10 = vmmov %vm7097_vm0 }
 0x36e   : > { %v2439_v35 = vpop.f32.mrf.mxu0 }
 0x36f   : > { %2509 = vst.msk [vmem:[%s5654_s12 + $0x68] sm:$0xff] %vm7180_vm1, %v2439_v35  ;;  %v2611_v56 = vmul.f32 %v2439_v35, %v2439_v35  ;;  %v2553_v41 = vsel %vm7184_vm15, %v2439_v35, 0.0  ;;  %vm7194_vm1 = vmmov %vm7097_vm0  ;;  %v2675_v35 = vsel %vm7205_vm11, %v2621_v29, 0.0 }
 0x370   : > { %v2554_v42 = vadd.f32 %v2553_v41, %v2552_v9  ;;  %v2563_v6 = vsel %vm7194_vm1, %v5982_v52, 0.0  ;;  %vm7198_vm15 = vmmov %vm7097_vm0  ;;  %v2622_v9 = vmul.f32 %v6364_v4, %v6364_v4 }
 0x371   : > { %v2655_v1 = vsel %vm7185_vm4, %v2611_v56, 0.0  ;;  %v2667_v52 = vsel %vm7198_vm15, %v2617_v57, 0.0  ;;  %vm7199_vm4 = vmmov %vm7097_vm0 }
 0x372   : > { %v2656_v28 = vadd.f32 %v2655_v1, %v2654_v59  ;;  %v2567_v12 = vsel %vm7199_vm4, %v6117_v21, 0.0  ;;  %vm7208_vm1 = vmmov %vm7097_vm0 }
 0x373   : > { %vm7212_vm15 = vmmov %vm7097_vm0 }
 0x374   : > { %vm7213_vm4 = vmmov %vm7097_vm0 }
 0x375   : > { %vm7219_vm11 = vmmov %vm7097_vm0 }
 0x376   : > { %v6391_v58 = vpop.f32.mrf.mxu2 }
 0x377   : > { %2522 = vst.msk [vmem:[%s5654_s12 + $0xd0] sm:$0xff] %vm7181_vm14, %v6391_v58  ;;  %vm7195_vm14 = vmmov %vm7097_vm0  ;;  %v2624_v1 = vmul.f32 %v6391_v58, %v6391_v58 }
 0x378   : > { %v2665_v37 = vsel %vm7195_vm14, %v2616_v44, 0.0  ;;  %vm7209_vm14 = vmmov %vm7097_vm0 }
 0x379   : > { %v2442_v27 = vpop.f32.mrf.mxu0  ;;  %v2681_v55 = vsel %vm7212_vm15, %v2624_v1, 0.0 }
 0x37a   : > { %2510 = vst.msk [vmem:[%s5654_s12 + $0x70] sm:$0xff] %vm7182_vm3, %v2442_v27  ;;  %v2612_v2 = vmul.f32 %v2442_v27, %v2442_v27  ;;  %v2555_v54 = vsel %vm7186_vm5, %v2442_v27, 0.0  ;;  %vm7196_vm3 = vmmov %vm7097_vm0  ;;  %v2623_v27 = vmul.f32 %v6384_v45, %v6384_v45 }
 0x37b   : > { %v2556_v62 = vadd.f32 %v2555_v54, %v2554_v42  ;;  %v2565_v18 = vsel %vm7196_vm3, %v6050_v25, 0.0  ;;  %vm7200_vm5 = vmmov %vm7097_vm0 }
 0x37c   : > { %v2657_v43 = vsel %vm7187_vm7, %v2612_v2, 0.0  ;;  %v2669_v10 = vsel %vm7200_vm5, %v2618_v53, 0.0  ;;  %vm7201_vm7 = vmmov %vm7097_vm0  ;;  %v2677_v2 = vsel %vm7207_vm2, %v2622_v9, 0.0 }
 0x37d   : > { %v2658_v49 = vadd.f32 %v2657_v43, %v2656_v28  ;;  %v2569_v25 = vsel %vm7201_vm7, %v6210_v36, 0.0  ;;  %v2573_v36 = vsel %vm7097_vm0, %v6342_v24, 0.0  ;;  %v2577_v24 = vsel %vm7208_vm1, %v6384_v45, 0.0  ;;  %vm7210_vm3 = vmmov %vm7097_vm0 }
 0x37e   : > { %v2679_v28 = vsel %vm7209_vm14, %v2623_v27, 0.0  ;;  %vm7214_vm5 = vmmov %vm7097_vm0 }
 0x37f   : > { %vm7215_vm7 = vmmov %vm7097_vm0 }
 0x380   : > { %vm7221_vm2 = vmmov %vm7097_vm0 }
 0x381   : > { %vm7222_vm1 = vmmov %vm7097_vm0 }
 0x382   : > { %vm7223_vm14 = vmmov %vm7097_vm0 }
 0x38c   : > { %v6398_v16 = vpop.f32.mrf.mxu2 }
 0x38d   : > { %2523 = vst.msk [vmem:[%s5654_s12 + $0xd8] sm:$0xff] %vm7183_vm13, %v6398_v16  ;;  %vm7197_vm13 = vmmov %vm7097_vm0  ;;  %v2625_v45 = vmul.f32 %v6398_v16, %v6398_v16 }
 0x396   : > { %v2445_v63 = vpop.f32.mrf.mxu0 }
 0x397   : > { %2511 = vst.msk [vmem:[%s5654_s12 + $0x78] sm:$0xff] %vm7188_vm8, %v2445_v63  ;;  %v2557_v51 = vsel %vm7189_vm6, %v2445_v63, 0.0  ;;  %v2613_v0 = vmul.f32 %v2445_v63, %v2445_v63  ;;  %vm7202_vm8 = vmmov %vm7097_vm0 }
 0x398   : > { %v2558_v38 = vadd.f32 %v2557_v51, %v2556_v62  ;;  %v2671_v3 = vsel %vm7202_vm8, %v2619_v17, 0.0  ;;  %vm7203_vm6 = vmmov %vm7097_vm0 }
 0x399   : > { %v2659_v48 = vsel %vm7097_vm0, %v2613_v0, 0.0  ;;  %v2571_v21 = vsel %vm7203_vm6, %v6295_v31, 0.0  ;;  %v2575_v31 = vsel %vm7206_vm12, %v6364_v4, 0.0  ;;  %v2579_v4 = vsel %vm7210_vm3, %v6391_v58, 0.0  ;;  %vm7216_vm8 = vmmov %vm7097_vm0 }
 0x39a   : > { %v2560_v15 = vadd.f32 %v2559_v23, %v2558_v38  ;;  %v2660_v46 = vadd.f32 %v2659_v48, %v2658_v49  ;;  %v2581_v0 = vsel %vm7213_vm4, %v6398_v16, 0.0  ;;  %v2683_v38 = vsel %vm7214_vm5, %v2625_v45, 0.0  ;;  %vm7217_vm6 = vmmov %vm7097_vm0 }
 0x39b   : > { %vm7220_vm12 = vmmov %vm7097_vm0  ;;  %vm3150_vm3 = vcmask 25600  }
 0x39c   : > { %v2562_v22 = vadd.f32 %v2561_v11, %v2560_v15  ;;  %v2662_v8 = vadd.f32 %v2661_v14, %v2660_v46 }
 0x39e   : > { %v2564_v20 = vadd.f32 %v2563_v6, %v2562_v22  ;;  %v2664_v7 = vadd.f32 %v2663_v40, %v2662_v8  ;;  %v2484_v30 = vpop.f32.mrf.mxu2 }
 0x39f   : > { %2524 = vst.msk [vmem:[%s5654_s12 + $0xe0] sm:$0xff] %vm7197_vm13, %v2484_v30  ;;  %vm7211_vm13 = vmmov %vm7097_vm0  ;;  %v2626_v23 = vmul.f32 %v2484_v30, %v2484_v30  ;;  %v2583_v58 = vsel %vm7215_vm7, %v2484_v30, 0.0 }
 0x3a0   : > { %v2566_v61 = vadd.f32 %v2565_v18, %v2564_v20  ;;  %v2666_v47 = vadd.f32 %v2665_v37, %v2664_v7 }
 0x3a1   : > { %v2685_v46 = vsel %vm7217_vm6, %v2626_v23, 0.0 }
 0x3a2   : > { %v2568_v60 = vadd.f32 %v2567_v12, %v2566_v61  ;;  %v2668_v13 = vadd.f32 %v2667_v52, %v2666_v47 }
 0x3a4   : > { %v2570_v32 = vadd.f32 %v2569_v25, %v2568_v60  ;;  %v2670_v34 = vadd.f32 %v2669_v10, %v2668_v13 }
 0x3a6   : > { %v2672_v50 = vadd.f32 %v2671_v3, %v2670_v34  ;;  %v2572_v26 = vadd.f32 %v2571_v21, %v2570_v32 }
 0x3a8   : > { %v2574_v33 = vadd.f32 %v2573_v36, %v2572_v26  ;;  %v2674_v59 = vadd.f32 %v2673_v19, %v2672_v50 }
 0x3aa   : > { %v2576_v56 = vadd.f32 %v2575_v31, %v2574_v33  ;;  %v2676_v41 = vadd.f32 %v2675_v35, %v2674_v59 }
 0x3ac   : > { %v2578_v54 = vadd.f32 %v2577_v24, %v2576_v56  ;;  %v2678_v42 = vadd.f32 %v2677_v2, %v2676_v41  ;;  %v2487_v43 = vpop.f32.mrf.mxu2 }
 0x3ad   : > { %2525 = vst.msk [vmem:[%s5654_s12 + $0xe8] sm:$0xff] %vm7211_vm13, %v2487_v43  ;;  %v2627_v14 = vmul.f32 %v2487_v43, %v2487_v43  ;;  %v2585_v44 = vsel %vm7218_vm10, %v2487_v43, 0.0 }
 0x3ae   : > { %v2580_v62 = vadd.f32 %v2579_v4, %v2578_v54  ;;  %v2680_v63 = vadd.f32 %v2679_v28, %v2678_v42 }
 0x3af   : > { %v2687_v8 = vsel %vm7097_vm0, %v2627_v14, 0.0 }
 0x3b0   : > { %v2682_v51 = vadd.f32 %v2681_v55, %v2680_v63  ;;  %v2582_v49 = vadd.f32 %v2581_v0, %v2580_v62 }
 0x3b2   : > { %v2684_v39 = vadd.f32 %v2683_v38, %v2682_v51  ;;  %v2584_v15 = vadd.f32 %v2583_v58, %v2582_v49 }
 0x3b4   : > { %v2686_v11 = vadd.f32 %v2685_v46, %v2684_v39  ;;  %v2586_v16 = vadd.f32 %v2585_v44, %v2584_v15 }
 0x3b5   : > { %v2490_v48 = vpop.f32.mrf.mxu2 }
 0x3b6   : > { %2526 = vst.msk [vmem:[%s5654_s12 + $0xf0] sm:$0xff] %vm7216_vm8, %v2490_v48  ;;  %v2628_v22 = vmul.f32 %v2490_v48, %v2490_v48  ;;  %v2587_v40 = vsel %vm7219_vm11, %v2490_v48, 0.0  ;;  %v2688_v6 = vadd.f32 %v2687_v8, %v2686_v11 }
 0x3b7   : > { %v2588_v20 = vadd.f32 %v2587_v40, %v2586_v16 }
 0x3b8   : > { %v2689_v57 = vsel %vm7220_vm12, %v2628_v22, 0.0 }
 0x3b9   : > { %v2690_v18 = vadd.f32 %v2689_v57, %v2688_v6 }
 0x3be   : > { %v2493_v7 = vpop.f32.mrf.mxu2 }
 0x3bf   : > { %2527 = vst.msk [vmem:[%s5654_s12 + $0xf8] sm:$0xff] %vm7221_vm2, %v2493_v7  ;;  %v2589_v30 = vsel %vm7222_vm1, %v2493_v7, 0.0  ;;  %v2629_v37 = vmul.f32 %v2493_v7, %v2493_v7 }
 0x3c0   : > { %v2590_v53 = vadd.f32 %v2589_v30, %v2588_v20 }
 0x3c1   : > { %v2691_v61 = vsel %vm7223_vm14, %v2629_v37, 0.0 }
 0x3c2   : > { %v2591_v47 = vrot.slane %v2590_v53, 4  ;;  %v2692_v52 = vadd.f32 %v2691_v61, %v2690_v18 }
 0x3c4   : > { %v2592_v12 = vadd.f32 %v2591_v47, %v2590_v53  ;;  %v2693_v17 = vrot.slane %v2692_v52, 4 }
 0x3c6   : > { %v2593_v60 = vrot.slane %v2592_v12, 2  ;;  %v2694_v13 = vadd.f32 %v2693_v17, %v2692_v52 }
 0x3c8   : > { %v2594_v10 = vadd.f32 %v2593_v60, %v2592_v12  ;;  %v2695_v25 = vrot.slane %v2694_v13, 2 }
 0x3ca   : > { %v2595_v5 = vrot.slane %v2594_v10, 1  ;;  %v2696_v32 = vadd.f32 %v2695_v25, %v2694_v13 }
 0x3cc   : > { %v2697_v34 = vrot.slane %v2696_v32, 1  ;;  %v2596_v3 = vadd.f32 %v2595_v5, %v2594_v10 }
 0x3ce   : > { %v2698_v21 = vadd.f32 %v2697_v34, %v2696_v32 }
 0x3d0   : > { %v3149_v29 = vsel %vm3148_vm9, %v2596_v3, %v2698_v21 }
 0x3d1   : > { %3151 = vst.msk [vmem:[%s262_s29] sm:$0x3] %vm3150_vm3, %v3149_v29 }
 0x3d2   : > { %3644 = shalt.err (!%p3641_p12)
}
 0x3d3   : > { %3441 = dma.vmem_to_hbm [thread:$0]  (%p3768_p5), %s3190_s9, 32, %s3192_s11, %s3166_s25  }
 0x3d4 PF: > { %p3452_p13 = scmp.ge.s32.totalorder %s3683_s24, 2  ;;  %s3233_s10 = sand.u32 1, %s3671_s21  }
 0x3d5   : > { %s3234_s16 = scalar_lea.sflag [#allocation4], %s3233_s10 }
 0x3d6   : > { %p3446_p0 = pnand %p3452_p13, %p3772_p6 }
 0x3d8   : > { %p3447_p1 = pneg %p3446_p0 }
 0x3da   : > { %3662 = dma.done.wait (%p3447_p1), %s3234_s16, 32  }
 0x3db   : > { %3664 = vsyncadd (%p3447_p1), %s3234_s16, 4294967264  ;;  %s3244_s17 = scalar_lea.sflag [#allocation6], %s3233_s10 }
 0x3dc   : > { %3666 = dma.done.wait (%p3447_p1), %s3244_s17, 32  }
 0x3dd   : > { %3668 = vsyncadd (%p3447_p1), %s3244_s17, 4294967264  ;;  %p20_p5 = scmp.ge.s32.totalorder %s3755_s27, 4   ;;  %s7224_s21 = smov %s3675_s22 }
 0x3de   : > { %s7225_s22 = smov %s3679_s23  ;;  %s7226_s23 = smov %s3766_s30 }
 0x3df   : > { %s7227_s24 = smov %s3755_s27  ;;  %22 = sbr.rel (!%p20_p5) target bundleno = 5 (0x5), region = 108 }
 0x3e4   :  { %3250 = vsyncpa [#allocation4], 1 }
 0x3e5   :  { %3252 = vsyncpa [#allocation4 + $0x1], 1 }
 0x3e6   :  { %3253 = vsyncpa [#allocation6], 1 }
 0x3e7   :  { %3255 = vsyncpa [#allocation6 + $0x1], 1 }

</bundles_post_ra>
